<compile_context>
chip_gen: v7x
topology: tpu7x:2x2x1
jax: 0.10.0
libtpu: 0.0.40
codegen_flags: <defaults>
</compile_context>

<pallas_src>
import functools

import numpy as np
import jax
import jax.numpy as jnp
from jax import lax
from jax.experimental import pallas as pl
from jax.experimental.pallas import tpu as pltpu


_VMEM_LIMIT = 32 * 1024 * 1024   # scoped-VMEM budget valid on v5e / v6e / v7x


def _round_up(v, m):
    return (v + m - 1) // m * m


def _pad_lanes(a, lpad):
    l = a.shape[-1]
    if l == lpad:
        return a
    pad = [(0, 0)] * (a.ndim - 1) + [(0, lpad - l)]
    return jnp.pad(a, pad)


# ----------------------------------------------------------------------------
# static tap descriptors + trace-time (numpy) boundary masks
# ----------------------------------------------------------------------------
def _taps_s1(w):
    """stride-1 3x3: tap t=3(dy+1)+(dx+1) -> (input group 0, flat shift dy*w+dx)."""
    return tuple((0, dy * w + dx) for dy in (-1, 0, 1) for dx in (-1, 0, 1))


_S2_PHASE = {0: (1, -1), 1: (0, 0), 2: (1, 0)}   # kernel index -> (input phase, shift)


def _taps_s2(wo):
    """stride-2 3x3 on a 2x2 phase-split input: tap -> (phase group, flat shift)."""
    taps = []
    for ky in range(3):
        for kx in range(3):
            p, dy = _S2_PHASE[ky]
            q, dx = _S2_PHASE[kx]
            taps.append((2 * p + q, dy * wo + dx))
    return tuple(taps)


def _tap_masks_s1(n, h, w, lpad):
    l = n * h * w
    idx = np.arange(lpad)
    valid = idx < l
    hh = (idx // w) % h
    ww = idx % w

    def rmask(d):
        if d < 0:
            return valid & (hh >= -d)
        if d > 0:
            return valid & (hh < h - d)
        return valid

    def cmask(d):
        if d < 0:
            return valid & (ww >= -d)
        if d > 0:
            return valid & (ww < w - d)
        return valid

    m = np.zeros((9, lpad), np.float32)
    t = 0
    for dy in (-1, 0, 1):
        for dx in (-1, 0, 1):
            m[t] = (rmask(dy) & cmask(dx)).astype(np.float32)
            t += 1
    return m


def _tap_masks_s2(n, ho, wo, lpad):
    l = n * ho * wo
    idx = np.arange(lpad)
    valid = idx < l
    hh = (idx // wo) % ho
    ww = idx % wo
    dmap = {0: -1, 1: 0, 2: 0}
    m = np.zeros((9, lpad), np.float32)
    for ky in range(3):
        for kx in range(3):
            mk = valid
            if dmap[ky] < 0:
                mk = mk & (hh >= 1)
            if dmap[kx] < 0:
                mk = mk & (ww >= 1)
            m[3 * ky + kx] = mk.astype(np.float32)
    return m


def _edge_masks(n, h, w, lpad):
    """rows: [valid, h>0, h<H-1, w>0, w<W-1] (all ANDed with valid)."""
    l = n * h * w
    idx = np.arange(lpad)
    valid = idx < l
    hh = (idx // w) % h
    ww = idx % w
    return np.stack([valid,
                     valid & (hh > 0),
                     valid & (hh < h - 1),
                     valid & (ww > 0),
                     valid & (ww < w - 1)]).astype(np.float32)


# ----------------------------------------------------------------------------
# Pallas kernel 1: conv (stride 1 or 2) with in-kernel im2col, fused
# leaky_relu / bias / avg-pool skip add / output scale
# ----------------------------------------------------------------------------
def _conv_kernel(x_ref, m_ref, w_ref, b_ref, o_ref, *, taps, lrelu, out_scale, pool):
    xg = x_ref[...]                                   # (G, C, Lpad) f32
    act = jnp.where(xg > 0, xg, 0.01 * xg) if lrelu else xg
    mm = m_ref[...]                                   # (9, Lpad) tap masks
    wv = w_ref[0]                                     # (9, rt, C) bf16
    lpad = xg.shape[-1]
    rt = o_ref.shape[1]

    acc = jnp.zeros((rt, lpad), jnp.float32)
    for t, (g, delta) in enumerate(taps):
        v = act[g]
        if delta != 0:
            v = pltpu.roll(v, shift=(-delta) % lpad, axis=1)   # XLU, free under MXU
        v = v * mm[t:t + 1]                           # zero-pad boundary mask
        acc = acc + jnp.dot(wv[t], v.astype(jnp.bfloat16),
                            preferred_element_type=jnp.float32)
    acc = acc + b_ref[0]

    if pool is not None:
        # fused "+ pad_or_crop(avg_pool(x, 2))": the 4 input phases ARE the
        # pool taps -> exact f32 VPU adds, no extra HBM traffic, no MXU work.
        ncrop, off_local, gate_last = pool
        pooled = 0.25 * (xg[0] + xg[1] + xg[2] + xg[3])
        pooled = pooled[:ncrop]
        if gate_last:                                 # pool rows live in the last tile
            gate = (pl.program_id(0) == pl.num_programs(0) - 1).astype(jnp.float32)
            pooled = pooled * gate
        if off_local == 0:                            # ncrop == rt
            acc = acc + pooled
        else:
            acc = jnp.concatenate([acc[:off_local], acc[off_local:] + pooled], axis=0)

    if out_scale != 1.0:
        acc = acc * out_scale
    o_ref[0] = acc


def _conv_call(wp, bp, xg, masks, taps, *, lrelu, out_scale=1.0, pool=None):
    """out (nt*rt, Lpad) = conv(f(x)) built from in-kernel taps of xg (G,C,Lpad)."""
    nt, _, rt, _cin = wp.shape
    g, c, lpad = xg.shape
    kern = functools.partial(_conv_kernel, taps=tuple(taps), lrelu=lrelu,
                             out_scale=float(out_scale), pool=pool)
    out = pl.pallas_call(
        kern,
        out_shape=jax.ShapeDtypeStruct((nt, rt, lpad), jnp.float32),
        grid=(nt,),
        in_specs=[
            pl.BlockSpec((g, c, lpad), lambda i: (0, 0, 0)),        # x: resident
            pl.BlockSpec((9, lpad), lambda i: (0, 0)),              # tap masks
            pl.BlockSpec((1, 9, rt, _cin), lambda i: (i, 0, 0, 0)),  # weight tile
            pl.BlockSpec((1, rt, 1), lambda i: (i, 0, 0)),          # bias tile
        ],
        out_specs=pl.BlockSpec((1, rt, lpad), lambda i: (i, 0, 0)),  # lane-dense
        compiler_params=pltpu.CompilerParams(
            dimension_semantics=("parallel",),
            vmem_limit_bytes=_VMEM_LIMIT),
    )(xg, masks, wp, bp)
    return out.reshape(nt * rt, lpad)


# ----------------------------------------------------------------------------
# Pallas kernel 2: bilinear x2 upsample + add (per row-parity) + BN statistics
# ----------------------------------------------------------------------------
def _upsample_add_kernel(y_ref, xc_ref, m_ref, t_ref, sum_ref, sq_ref, *, width, fpad):
    xc = xc_ref[...]                                  # (cxc, Lpad) f32
    m = m_ref[...]                                    # (5, Lpad)
    valid, row_lo, row_hi = m[0:1], m[1:2], m[2:3]
    col_lo, col_hi = m[3:4], m[4:5]
    lpad = xc.shape[-1]

    def shift_clamped(v, delta, interior):
        rolled = pltpu.roll(v, shift=(-delta) % lpad, axis=1)
        return interior * rolled + (1.0 - interior) * v      # edge replication

    # bilinear x2, align_corners=False: 0.75 / 0.25 weights at 0 / +-1
    wa = (pl.program_id(0) == 0).astype(jnp.float32)          # 1 for even output rows
    nb = (wa * shift_clamped(xc, -width, row_lo)
          + (1.0 - wa) * shift_clamped(xc, width, row_hi))
    u = 0.75 * xc + 0.25 * nb
    ph = (0.75 * u + 0.25 * shift_clamped(u, -1, col_lo),     # even output cols
          0.75 * u + 0.25 * shift_clamped(u, 1, col_hi))      # odd output cols

    for b in (0, 1):
        yb = y_ref[0, b]                                      # (co, Lpad)
        if fpad == 0:
            t = yb + ph[b]
        else:  # pad_or_crop zero-pads missing channels at the FRONT: pass them through
            t = jnp.concatenate([yb[:fpad], yb[fpad:] + ph[b]], axis=0)
        t = t * valid                                         # zero the lane padding
        t_ref[0, b] = t
        # per-(parity, channel) sums -> BatchNorm statistics, no extra HBM pass
        sum_ref[0, b] = jnp.sum(t, axis=1, keepdims=True)
        sq_ref[0, b] = jnp.sum(t * t, axis=1, keepdims=True)


def _upsample_add_call(y4, xc, emasks, *, width, fpad, co):
    _, _, _, lpad = y4.shape
    cxc = xc.shape[0]
    kern = functools.partial(_upsample_add_kernel, width=width, fpad=fpad)
    return pl.pallas_call(
        kern,
        out_shape=(jax.ShapeDtypeStruct((2, 2, co, lpad), jnp.float32),
                   jax.ShapeDtypeStruct((2, 2, co, 1), jnp.float32),
                   jax.ShapeDtypeStruct((2, 2, co, 1), jnp.float32)),
        grid=(2,),
        in_specs=[pl.BlockSpec((1, 2, co, lpad), lambda a: (a, 0, 0, 0)),
                  pl.BlockSpec((cxc, lpad), lambda a: (0, 0)),
                  pl.BlockSpec((5, lpad), lambda a: (0, 0))],
        out_specs=(pl.BlockSpec((1, 2, co, lpad), lambda a: (a, 0, 0, 0)),
                   pl.BlockSpec((1, 2, co, 1), lambda a: (a, 0, 0, 0)),
                   pl.BlockSpec((1, 2, co, 1), lambda a: (a, 0, 0, 0))),
        compiler_params=pltpu.CompilerParams(
            dimension_semantics=("parallel",),
            vmem_limit_bytes=_VMEM_LIMIT),
    )(y4, xc, emasks)


# ----------------------------------------------------------------------------
# weight pre-packing (done ONCE at init)
# ----------------------------------------------------------------------------
def _down_tiles(cin, cout):
    nt = 2 if (cout % 2 == 0 and cout >= 8 and min(cin, cout) <= cout // 2) else 1
    return nt, cout // nt


def _pack_conv3x3(w, nt):
    """Conv2d weight (Co, Ci, 3, 3) -> (nt, 9, Co//nt, Ci) bf16, tap t = 3*ky+kx."""
    co, ci = w.shape[0], w.shape[1]
    rt = co // nt
    w9 = np.transpose(w, (2, 3, 0, 1)).reshape(9, co, ci)
    w9 = w9.reshape(9, nt, rt, ci).transpose(1, 0, 2, 3)
    return jnp.asarray(w9, dtype=jnp.bfloat16)


def _pack_convt4x4(wt):
    """ConvTranspose2d(k4,s2,p1) weight (Ci, Co, 4, 4) -> (2, 9, 2*Co, Ci) bf16.
    Tile a = output row parity; rows [b*Co + o] = output col parity b, channel o."""
    ci, co = wt.shape[0], wt.shape[1]
    kmap = {0: {-1: 3, 0: 1}, 1: {0: 2, 1: 0}}       # parity -> {grid shift: kernel idx}
    packed = np.zeros((2, 2, 9, co, ci), np.float32)  # [a, b, tap, o, c]
    for a in (0, 1):
        for b in (0, 1):
            for dy, ky in kmap[a].items():
                for dx, kx in kmap[b].items():
                    t = 3 * (dy + 1) + (dx + 1)
                    packed[a, b, t] = wt[:, :, ky, kx].T
    packed = packed.transpose(0, 2, 1, 3, 4).reshape(2, 9, 2 * co, ci)
    return jnp.asarray(packed, dtype=jnp.bfloat16)


def init_params(key, num_layers, channels, dimension):
    down = list(channels[0])
    up_out = list(channels[1])
    up_in = [down[d + 1] + (up_out[d + 1] if d + 1 < num_layers else 0)
             for d in range(num_layers)]
    params = {}
    for d in range(num_layers):
        key, k1, k2, k3, k4 = jax.random.split(key, 5)
        ci, co = down[d], down[d + 1]
        bd = 1.0 / np.sqrt(ci * 9)
        w = np.asarray(jax.random.uniform(k1, (co, ci, 3, 3), jnp.float32, -bd, bd))
        b = np.asarray(jax.random.uniform(k2, (co,), jnp.float32, -bd, bd))
        nt, rt = _down_tiles(ci, co)
        params[f"down_w_{d}"] = _pack_conv3x3(w, nt)
        params[f"down_b_{d}"] = jnp.asarray(b.reshape(nt, rt, 1))

        cti, cto = up_in[d], up_out[d]
        bu = 1.0 / np.sqrt(cto * 16)
        wt = np.asarray(jax.random.uniform(k3, (cti, cto, 4, 4), jnp.float32, -bu, bu))
        bt = np.asarray(jax.random.uniform(k4, (cto,), jnp.float32, -bu, bu))
        params[f"up_w_{d}"] = _pack_convt4x4(wt)
        params[f"up_b_{d}"] = jnp.asarray(
            np.tile(np.concatenate([bt, bt]).reshape(1, 2 * cto, 1), (2, 1, 1)))
        params[f"bn_g_{d}"] = jnp.ones((cto,), jnp.float32)
        params[f"bn_b_{d}"] = jnp.zeros((cto,), jnp.float32)

    cin_last = down[0] + up_out[0]
    # lastConv is zero-initialised in the PyTorch module
    params["last_w"] = jnp.zeros((1, 9, dimension, cin_last), jnp.bfloat16)
    params["last_b"] = jnp.zeros((1, dimension, 1), jnp.float32)
    return params


# ----------------------------------------------------------------------------
# forward
# ----------------------------------------------------------------------------
def unet2_forward(params, x, y, *, num_layers, channels, dimension):
    assert dimension == 2  # TODO(synk): 3-D (Conv3d / trilinear) variant not implemented
    down = list(channels[0])
    up_out = list(channels[1])

    x = jnp.concatenate([x, y], axis=1)            # NCHW
    x = jnp.transpose(x, (1, 0, 2, 3))             # -> (C, N, H, W) channel-major

    # ------------------------------ down path ------------------------------
    skips = []
    for d in range(num_layers):
        skips.append(x)
        cin, n, h, w = x.shape
        # TODO(synk): odd spatial sizes (avg_pool ceil_mode partial windows) unhandled
        assert h % 2 == 0 and w % 2 == 0
        cout = down[d + 1]
        ho, wo = h // 2, w // 2
        lo = n * ho * wo
        lpad = max(_round_up(lo, 128), 128)
        # 2x2 phase split (single 1x XLA pass): stride-2 taps become {0,-1} rolls
        # and the avg-pool skip is 0.25 * (sum of phases) inside the kernel.
        phases = jnp.stack(
            [x[:, :, p::2, q::2].reshape(cin, lo) for p in (0, 1) for q in (0, 1)],
            axis=0)
        phases = _pad_lanes(phases, lpad)
        nt, rt = _down_tiles(cin, cout)
        ncrop = min(cin, cout)
        pool = (ncrop, rt - ncrop, nt > 1)
        out = _conv_call(params[f"down_w_{d}"], params[f"down_b_{d}"],
                         phases, jnp.asarray(_tap_masks_s2(n, ho, wo, lpad)),
                         _taps_s2(wo), lrelu=True, pool=pool)
        x = out[:, :lo].reshape(cout, n, ho, wo)

    # ------------------------------- up path -------------------------------
    for d in reversed(range(num_layers)):
        cin, n, h, w = x.shape
        co = up_out[d]
        l = n * h * w
        lpad = max(_round_up(l, 128), 128)
        xf = _pad_lanes(x.reshape(cin, l), lpad)

        # ConvTranspose as 4 stride-1 output phases, im2col in-kernel.
        y4 = _conv_call(params[f"up_w_{d}"], params[f"up_b_{d}"],
                        xf[None], jnp.asarray(_tap_masks_s1(n, h, w, lpad)),
                        _taps_s1(w), lrelu=True)
        y4 = y4.reshape(2, 2, co, lpad)            # [row parity, col parity, c, m]

        cxc = min(cin, co)                          # pad_or_crop keeps FIRST channels
        t_all, psum, psq = _upsample_add_call(
            y4, xf[:cxc], jnp.asarray(_edge_masks(n, h, w, lpad)),
            width=w, fpad=co - cxc, co=co)

        # BatchNorm (training-mode batch statistics) from the fused in-kernel sums
        cnt = 4.0 * l
        tot = jnp.sum(psum, axis=(0, 1)).reshape(co)
        tot2 = jnp.sum(psq, axis=(0, 1)).reshape(co)
        mean = tot / cnt
        var = jnp.maximum(tot2 / cnt - mean * mean, 0.0)
        scale = params[f"bn_g_{d}"] * lax.rsqrt(var + 1e-5)
        shift = params[f"bn_b_{d}"] - mean * scale

        # phase interleave back to spatial layout (tiny tensor); the BN
        # scale/shift rides along for free in this pass.
        # TODO(synk): a fully phase-major up path would drop this XLA transpose.
        up = t_all[:, :, :, :l].reshape(2, 2, co, n, h, w)
        up = jnp.transpose(up, (2, 3, 4, 0, 5, 1)).reshape(co, n, 2 * h, 2 * w)
        up = up * scale[:, None, None, None] + shift[:, None, None, None]
        sk = skips[d]
        up = up[:, :, :sk.shape[2], :sk.shape[3]]   # spatial crop to skip size
        x = jnp.concatenate([up, sk], axis=0)

    # -------------------------- lastConv (+ /10 fused) ----------------------
    cin, n, h, w = x.shape
    l = n * h * w
    lpad = max(_round_up(l, 128), 128)
    xf = _pad_lanes(x.reshape(cin, l), lpad)
    out = _conv_call(params["last_w"], params["last_b"], xf[None],
                     jnp.asarray(_tap_masks_s1(n, h, w, lpad)), _taps_s1(w),
                     lrelu=False, out_scale=0.1)
    out = out[:, :l].reshape(dimension, n, h, w)
    return jnp.transpose(out, (1, 0, 2, 3))         # (C, N, H, W) -> NCHW


# ----------------------------------------------------------------------------
if __name__ == "__main__":
    # UNet2(num_layers=2, channels=[[2, 8, 16], [4, 8]], dimension=2)
    num_layers = 2
    channels = [[2, 8, 16], [4, 8]]
    dimension = 2

    key = jax.random.PRNGKey(0)
    kp, kx, ky = jax.random.split(key, 3)
    params = init_params(kp, num_layers, channels, dimension)

    x = jax.random.normal(kx, (2, 1, 16, 16), jnp.float32)
    y = jax.random.normal(ky, (2, 1, 16, 16), jnp.float32)

    fwd = jax.jit(functools.partial(unet2_forward, num_layers=num_layers,
                                    channels=channels, dimension=dimension))
    out = jax.block_until_ready(fwd(params, x, y))

    assert out.shape == (2, dimension, 16, 16), out.shape
    assert bool(jnp.all(jnp.isfinite(out)))
    print("KERNEL_OK")
</pallas_src>

<mosaic_0001>
module attributes {stable_mosaic.version = 11 : i64} {
  func.func @_conv_kernel(%arg0: i32, %arg1: memref<4x2x128xf32, #tpu.memory_space<vmem>>, %arg2: memref<9x128xf32, #tpu.memory_space<vmem>>, %arg3: memref<1x9x4x2xbf16, #tpu.memory_space<vmem>>, %arg4: memref<1x4x1xf32, #tpu.memory_space<vmem>>, %arg5: memref<1x4x128xf32, #tpu.memory_space<vmem>>) attributes {dimension_semantics = [#tpu.dimension_semantics<parallel>], iteration_bounds = array<i64: 2>, scalar_prefetch = 0 : i64, scratch_operands = 0 : i64, tpu.core_type = #tpu.core_type<tc>, window_params = [{pipeline_mode = #tpu.pipeline_mode<synchronous>, transform_indices = @transform_0, window_bounds = array<i64: 4, 2, 128>}, {pipeline_mode = #tpu.pipeline_mode<synchronous>, transform_indices = @transform_1, window_bounds = array<i64: 9, 128>}, {transform_indices = @transform_2, window_bounds = array<i64: 1, 9, 4, 2>}, {transform_indices = @transform_3, window_bounds = array<i64: 1, 4, 1>}, {transform_indices = @transform_4, window_bounds = array<i64: 1, 4, 128>}]} {
    %c0 = arith.constant 0 : index
    %c0_0 = arith.constant 0 : index
    %c0_1 = arith.constant 0 : index
    %0 = vector.load %arg1[%c0, %c0_0, %c0_1] : memref<4x2x128xf32, #tpu.memory_space<vmem>>, vector<4x2x128xf32>
    %cst = arith.constant 0.000000e+00 : f32
    %1 = vector.broadcast %cst : f32 to vector<4x2x128xf32>
    %2 = arith.cmpf ogt, %0, %1 : vector<4x2x128xf32>
    %cst_2 = arith.constant 0.00999999977 : f32
    %3 = vector.broadcast %cst_2 : f32 to vector<4x2x128xf32>
    %4 = arith.mulf %3, %0 : vector<4x2x128xf32>
    %5 = arith.select %2, %0, %4 : vector<4x2x128xi1>, vector<4x2x128xf32>
    %c0_3 = arith.constant 0 : index
    %c0_4 = arith.constant 0 : index
    %6 = vector.load %arg2[%c0_3, %c0_4] : memref<9x128xf32, #tpu.memory_space<vmem>>, vector<9x128xf32>
    %c0_5 = arith.constant 0 : index
    %c0_6 = arith.constant 0 : index
    %c0_7 = arith.constant 0 : index
    %c0_8 = arith.constant 0 : index
    %7 = vector.load %arg3[%c0_5, %c0_6, %c0_7, %c0_8] : memref<1x9x4x2xbf16, #tpu.memory_space<vmem>>, vector<1x9x4x2xbf16>
    %8 = vector.shape_cast %7 : vector<1x9x4x2xbf16> to vector<9x4x2xbf16>
    %cst_9 = arith.constant 0.000000e+00 : f32
    %9 = vector.broadcast %cst_9 : f32 to vector<4x128xf32>
    %10 = vector.extract_strided_slice %5 {offsets = [3, 0, 0], sizes = [1, 2, 128], strides = [1, 1, 1]} : vector<4x2x128xf32> to vector<1x2x128xf32>
    %11 = vector.shape_cast %10 : vector<1x2x128xf32> to vector<2x128xf32>
    %c9_i32 = arith.constant 9 : i32
    %12 = tpu.dynamic_rotate %11 by %c9_i32 dim 1 : vector<2x128xf32>, i32 -> vector<2x128xf32>
    %13 = vector.extract_strided_slice %6 {offsets = [0, 0], sizes = [1, 128], strides = [1, 1]} : vector<9x128xf32> to vector<1x128xf32>
    %14 = vector.broadcast %13 : vector<1x128xf32> to vector<2x128xf32>
    %15 = arith.mulf %12, %14 : vector<2x128xf32>
    %16 = vector.extract_strided_slice %8 {offsets = [0, 0, 0], sizes = [1, 4, 2], strides = [1, 1, 1]} : vector<9x4x2xbf16> to vector<1x4x2xbf16>
    %17 = vector.shape_cast %16 : vector<1x4x2xbf16> to vector<4x2xbf16>
    %18 = arith.truncf %15 : vector<2x128xf32> to vector<2x128xbf16>
    %cst_10 = arith.constant dense<0.000000e+00> : vector<4x128xf32>
    %19 = tpu.matmul %17, %18, %cst_10 {dimension_numbers = #tpu.dot_dimension_numbers<[1], [0], [0], [1], [0, 0, 1, 1], [], []>} : vector<4x2xbf16>, vector<2x128xbf16>, vector<4x128xf32> -> vector<4x128xf32>
    %20 = arith.addf %9, %19 : vector<4x128xf32>
    %21 = vector.extract_strided_slice %5 {offsets = [2, 0, 0], sizes = [1, 2, 128], strides = [1, 1, 1]} : vector<4x2x128xf32> to vector<1x2x128xf32>
    %22 = vector.shape_cast %21 : vector<1x2x128xf32> to vector<2x128xf32>
    %c8_i32 = arith.constant 8 : i32
    %23 = tpu.dynamic_rotate %22 by %c8_i32 dim 1 : vector<2x128xf32>, i32 -> vector<2x128xf32>
    %24 = vector.extract_strided_slice %6 {offsets = [1, 0], sizes = [1, 128], strides = [1, 1]} : vector<9x128xf32> to vector<1x128xf32>
    %25 = vector.broadcast %24 : vector<1x128xf32> to vector<2x128xf32>
    %26 = arith.mulf %23, %25 : vector<2x128xf32>
    %27 = vector.extract_strided_slice %8 {offsets = [1, 0, 0], sizes = [1, 4, 2], strides = [1, 1, 1]} : vector<9x4x2xbf16> to vector<1x4x2xbf16>
    %28 = vector.shape_cast %27 : vector<1x4x2xbf16> to vector<4x2xbf16>
    %29 = arith.truncf %26 : vector<2x128xf32> to vector<2x128xbf16>
    %cst_11 = arith.constant dense<0.000000e+00> : vector<4x128xf32>
    %30 = tpu.matmul %28, %29, %cst_11 {dimension_numbers = #tpu.dot_dimension_numbers<[1], [0], [0], [1], [0, 0, 1, 1], [], []>} : vector<4x2xbf16>, vector<2x128xbf16>, vector<4x128xf32> -> vector<4x128xf32>
    %31 = arith.addf %20, %30 : vector<4x128xf32>
    %32 = vector.extract_strided_slice %5 {offsets = [3, 0, 0], sizes = [1, 2, 128], strides = [1, 1, 1]} : vector<4x2x128xf32> to vector<1x2x128xf32>
    %33 = vector.shape_cast %32 : vector<1x2x128xf32> to vector<2x128xf32>
    %c8_i32_12 = arith.constant 8 : i32
    %34 = tpu.dynamic_rotate %33 by %c8_i32_12 dim 1 : vector<2x128xf32>, i32 -> vector<2x128xf32>
    %35 = vector.extract_strided_slice %6 {offsets = [2, 0], sizes = [1, 128], strides = [1, 1]} : vector<9x128xf32> to vector<1x128xf32>
    %36 = vector.broadcast %35 : vector<1x128xf32> to vector<2x128xf32>
    %37 = arith.mulf %34, %36 : vector<2x128xf32>
    %38 = vector.extract_strided_slice %8 {offsets = [2, 0, 0], sizes = [1, 4, 2], strides = [1, 1, 1]} : vector<9x4x2xbf16> to vector<1x4x2xbf16>
    %39 = vector.shape_cast %38 : vector<1x4x2xbf16> to vector<4x2xbf16>
    %40 = arith.truncf %37 : vector<2x128xf32> to vector<2x128xbf16>
    %cst_13 = arith.constant dense<0.000000e+00> : vector<4x128xf32>
    %41 = tpu.matmul %39, %40, %cst_13 {dimension_numbers = #tpu.dot_dimension_numbers<[1], [0], [0], [1], [0, 0, 1, 1], [], []>} : vector<4x2xbf16>, vector<2x128xbf16>, vector<4x128xf32> -> vector<4x128xf32>
    %42 = arith.addf %31, %41 : vector<4x128xf32>
    %43 = vector.extract_strided_slice %5 {offsets = [1, 0, 0], sizes = [1, 2, 128], strides = [1, 1, 1]} : vector<4x2x128xf32> to vector<1x2x128xf32>
    %44 = vector.shape_cast %43 : vector<1x2x128xf32> to vector<2x128xf32>
    %c1_i32 = arith.constant 1 : i32
    %45 = tpu.dynamic_rotate %44 by %c1_i32 dim 1 : vector<2x128xf32>, i32 -> vector<2x128xf32>
    %46 = vector.extract_strided_slice %6 {offsets = [3, 0], sizes = [1, 128], strides = [1, 1]} : vector<9x128xf32> to vector<1x128xf32>
    %47 = vector.broadcast %46 : vector<1x128xf32> to vector<2x128xf32>
    %48 = arith.mulf %45, %47 : vector<2x128xf32>
    %49 = vector.extract_strided_slice %8 {offsets = [3, 0, 0], sizes = [1, 4, 2], strides = [1, 1, 1]} : vector<9x4x2xbf16> to vector<1x4x2xbf16>
    %50 = vector.shape_cast %49 : vector<1x4x2xbf16> to vector<4x2xbf16>
    %51 = arith.truncf %48 : vector<2x128xf32> to vector<2x128xbf16>
    %cst_14 = arith.constant dense<0.000000e+00> : vector<4x128xf32>
    %52 = tpu.matmul %50, %51, %cst_14 {dimension_numbers = #tpu.dot_dimension_numbers<[1], [0], [0], [1], [0, 0, 1, 1], [], []>} : vector<4x2xbf16>, vector<2x128xbf16>, vector<4x128xf32> -> vector<4x128xf32>
    %53 = arith.addf %42, %52 : vector<4x128xf32>
    %54 = vector.extract_strided_slice %5 {offsets = [0, 0, 0], sizes = [1, 2, 128], strides = [1, 1, 1]} : vector<4x2x128xf32> to vector<1x2x128xf32>
    %55 = vector.shape_cast %54 : vector<1x2x128xf32> to vector<2x128xf32>
    %56 = vector.extract_strided_slice %6 {offsets = [4, 0], sizes = [1, 128], strides = [1, 1]} : vector<9x128xf32> to vector<1x128xf32>
    %57 = vector.broadcast %56 : vector<1x128xf32> to vector<2x128xf32>
    %58 = arith.mulf %55, %57 : vector<2x128xf32>
    %59 = vector.extract_strided_slice %8 {offsets = [4, 0, 0], sizes = [1, 4, 2], strides = [1, 1, 1]} : vector<9x4x2xbf16> to vector<1x4x2xbf16>
    %60 = vector.shape_cast %59 : vector<1x4x2xbf16> to vector<4x2xbf16>
    %61 = arith.truncf %58 : vector<2x128xf32> to vector<2x128xbf16>
    %cst_15 = arith.constant dense<0.000000e+00> : vector<4x128xf32>
    %62 = tpu.matmul %60, %61, %cst_15 {dimension_numbers = #tpu.dot_dimension_numbers<[1], [0], [0], [1], [0, 0, 1, 1], [], []>} : vector<4x2xbf16>, vector<2x128xbf16>, vector<4x128xf32> -> vector<4x128xf32>
    %63 = arith.addf %53, %62 : vector<4x128xf32>
    %64 = vector.extract_strided_slice %5 {offsets = [1, 0, 0], sizes = [1, 2, 128], strides = [1, 1, 1]} : vector<4x2x128xf32> to vector<1x2x128xf32>
    %65 = vector.shape_cast %64 : vector<1x2x128xf32> to vector<2x128xf32>
    %66 = vector.extract_strided_slice %6 {offsets = [5, 0], sizes = [1, 128], strides = [1, 1]} : vector<9x128xf32> to vector<1x128xf32>
    %67 = vector.broadcast %66 : vector<1x128xf32> to vector<2x128xf32>
    %68 = arith.mulf %65, %67 : vector<2x128xf32>
    %69 = vector.extract_strided_slice %8 {offsets = [5, 0, 0], sizes = [1, 4, 2], strides = [1, 1, 1]} : vector<9x4x2xbf16> to vector<1x4x2xbf16>
    %70 = vector.shape_cast %69 : vector<1x4x2xbf16> to vector<4x2xbf16>
    %71 = arith.truncf %68 : vector<2x128xf32> to vector<2x128xbf16>
    %cst_16 = arith.constant dense<0.000000e+00> : vector<4x128xf32>
    %72 = tpu.matmul %70, %71, %cst_16 {dimension_numbers = #tpu.dot_dimension_numbers<[1], [0], [0], [1], [0, 0, 1, 1], [], []>} : vector<4x2xbf16>, vector<2x128xbf16>, vector<4x128xf32> -> vector<4x128xf32>
    %73 = arith.addf %63, %72 : vector<4x128xf32>
    %74 = vector.extract_strided_slice %5 {offsets = [3, 0, 0], sizes = [1, 2, 128], strides = [1, 1, 1]} : vector<4x2x128xf32> to vector<1x2x128xf32>
    %75 = vector.shape_cast %74 : vector<1x2x128xf32> to vector<2x128xf32>
    %c1_i32_17 = arith.constant 1 : i32
    %76 = tpu.dynamic_rotate %75 by %c1_i32_17 dim 1 : vector<2x128xf32>, i32 -> vector<2x128xf32>
    %77 = vector.extract_strided_slice %6 {offsets = [6, 0], sizes = [1, 128], strides = [1, 1]} : vector<9x128xf32> to vector<1x128xf32>
    %78 = vector.broadcast %77 : vector<1x128xf32> to vector<2x128xf32>
    %79 = arith.mulf %76, %78 : vector<2x128xf32>
    %80 = vector.extract_strided_slice %8 {offsets = [6, 0, 0], sizes = [1, 4, 2], strides = [1, 1, 1]} : vector<9x4x2xbf16> to vector<1x4x2xbf16>
    %81 = vector.shape_cast %80 : vector<1x4x2xbf16> to vector<4x2xbf16>
    %82 = arith.truncf %79 : vector<2x128xf32> to vector<2x128xbf16>
    %cst_18 = arith.constant dense<0.000000e+00> : vector<4x128xf32>
    %83 = tpu.matmul %81, %82, %cst_18 {dimension_numbers = #tpu.dot_dimension_numbers<[1], [0], [0], [1], [0, 0, 1, 1], [], []>} : vector<4x2xbf16>, vector<2x128xbf16>, vector<4x128xf32> -> vector<4x128xf32>
    %84 = arith.addf %73, %83 : vector<4x128xf32>
    %85 = vector.extract_strided_slice %5 {offsets = [2, 0, 0], sizes = [1, 2, 128], strides = [1, 1, 1]} : vector<4x2x128xf32> to vector<1x2x128xf32>
    %86 = vector.shape_cast %85 : vector<1x2x128xf32> to vector<2x128xf32>
    %87 = vector.extract_strided_slice %6 {offsets = [7, 0], sizes = [1, 128], strides = [1, 1]} : vector<9x128xf32> to vector<1x128xf32>
    %88 = vector.broadcast %87 : vector<1x128xf32> to vector<2x128xf32>
    %89 = arith.mulf %86, %88 : vector<2x128xf32>
    %90 = vector.extract_strided_slice %8 {offsets = [7, 0, 0], sizes = [1, 4, 2], strides = [1, 1, 1]} : vector<9x4x2xbf16> to vector<1x4x2xbf16>
    %91 = vector.shape_cast %90 : vector<1x4x2xbf16> to vector<4x2xbf16>
    %92 = arith.truncf %89 : vector<2x128xf32> to vector<2x128xbf16>
    %cst_19 = arith.constant dense<0.000000e+00> : vector<4x128xf32>
    %93 = tpu.matmul %91, %92, %cst_19 {dimension_numbers = #tpu.dot_dimension_numbers<[1], [0], [0], [1], [0, 0, 1, 1], [], []>} : vector<4x2xbf16>, vector<2x128xbf16>, vector<4x128xf32> -> vector<4x128xf32>
    %94 = arith.addf %84, %93 : vector<4x128xf32>
    %95 = vector.extract_strided_slice %5 {offsets = [3, 0, 0], sizes = [1, 2, 128], strides = [1, 1, 1]} : vector<4x2x128xf32> to vector<1x2x128xf32>
    %96 = vector.shape_cast %95 : vector<1x2x128xf32> to vector<2x128xf32>
    %97 = vector.extract_strided_slice %6 {offsets = [8, 0], sizes = [1, 128], strides = [1, 1]} : vector<9x128xf32> to vector<1x128xf32>
    %98 = vector.broadcast %97 : vector<1x128xf32> to vector<2x128xf32>
    %99 = arith.mulf %96, %98 : vector<2x128xf32>
    %100 = vector.extract_strided_slice %8 {offsets = [8, 0, 0], sizes = [1, 4, 2], strides = [1, 1, 1]} : vector<9x4x2xbf16> to vector<1x4x2xbf16>
    %101 = vector.shape_cast %100 : vector<1x4x2xbf16> to vector<4x2xbf16>
    %102 = arith.truncf %99 : vector<2x128xf32> to vector<2x128xbf16>
    %cst_20 = arith.constant dense<0.000000e+00> : vector<4x128xf32>
    %103 = tpu.matmul %101, %102, %cst_20 {dimension_numbers = #tpu.dot_dimension_numbers<[1], [0], [0], [1], [0, 0, 1, 1], [], []>} : vector<4x2xbf16>, vector<2x128xbf16>, vector<4x128xf32> -> vector<4x128xf32>
    %104 = arith.addf %94, %103 : vector<4x128xf32>
    %c0_21 = arith.constant 0 : index
    %c0_22 = arith.constant 0 : index
    %c0_23 = arith.constant 0 : index
    %105 = vector.load %arg4[%c0_21, %c0_22, %c0_23] : memref<1x4x1xf32, #tpu.memory_space<vmem>>, vector<1x4x1xf32>
    %106 = vector.shape_cast %105 : vector<1x4x1xf32> to vector<4x1xf32>
    %107 = vector.broadcast %106 : vector<4x1xf32> to vector<4x128xf32>
    %108 = arith.addf %104, %107 : vector<4x128xf32>
    %109 = vector.extract_strided_slice %0 {offsets = [0, 0, 0], sizes = [1, 2, 128], strides = [1, 1, 1]} : vector<4x2x128xf32> to vector<1x2x128xf32>
    %110 = vector.shape_cast %109 : vector<1x2x128xf32> to vector<2x128xf32>
    %111 = vector.extract_strided_slice %0 {offsets = [1, 0, 0], sizes = [1, 2, 128], strides = [1, 1, 1]} : vector<4x2x128xf32> to vector<1x2x128xf32>
    %112 = vector.shape_cast %111 : vector<1x2x128xf32> to vector<2x128xf32>
    %113 = arith.addf %110, %112 : vector<2x128xf32>
    %114 = vector.extract_strided_slice %0 {offsets = [2, 0, 0], sizes = [1, 2, 128], strides = [1, 1, 1]} : vector<4x2x128xf32> to vector<1x2x128xf32>
    %115 = vector.shape_cast %114 : vector<1x2x128xf32> to vector<2x128xf32>
    %116 = arith.addf %113, %115 : vector<2x128xf32>
    %117 = vector.extract_strided_slice %0 {offsets = [3, 0, 0], sizes = [1, 2, 128], strides = [1, 1, 1]} : vector<4x2x128xf32> to vector<1x2x128xf32>
    %118 = vector.shape_cast %117 : vector<1x2x128xf32> to vector<2x128xf32>
    %119 = arith.addf %116, %118 : vector<2x128xf32>
    %cst_24 = arith.constant 2.500000e-01 : f32
    %120 = vector.broadcast %cst_24 : f32 to vector<2x128xf32>
    %121 = arith.mulf %120, %119 : vector<2x128xf32>
    %c1_i32_25 = arith.constant 1 : i32
    %122 = arith.cmpi eq, %arg0, %c1_i32_25 : i32
    %123 = arith.extui %122 : i1 to i32
    %124 = arith.sitofp %123 : i32 to f32
    %125 = vector.broadcast %124 : f32 to vector<2x128xf32>
    %126 = arith.mulf %121, %125 : vector<2x128xf32>
    %127 = vector.extract_strided_slice %108 {offsets = [0, 0], sizes = [2, 128], strides = [1, 1]} : vector<4x128xf32> to vector<2x128xf32>
    %128 = vector.extract_strided_slice %108 {offsets = [2, 0], sizes = [2, 128], strides = [1, 1]} : vector<4x128xf32> to vector<2x128xf32>
    %129 = arith.addf %128, %126 : vector<2x128xf32>
    %130 = tpu.concatenate %127, %129 in 0 : vector<2x128xf32>, vector<2x128xf32> -> vector<4x128xf32>
    %c0_26 = arith.constant 0 : index
    %c0_27 = arith.constant 0 : index
    %c0_28 = arith.constant 0 : index
    %131 = vector.load %arg5[%c0_26, %c0_27, %c0_28] : memref<1x4x128xf32, #tpu.memory_space<vmem>>, vector<1x4x128xf32>
    %132 = vector.shape_cast %131 : vector<1x4x128xf32> to vector<4x128xf32>
    %133 = vector.shape_cast %130 : vector<4x128xf32> to vector<1x4x128xf32>
    tpu.vector_store %arg5[%c0_26, %c0_27, %c0_28], %133 {strides = array<i32>} : memref<1x4x128xf32, #tpu.memory_space<vmem>>, vector<1x4x128xf32>,
    return
  }
  func.func @transform_0(%arg0: i32) -> (i32, i32, i32) {
    %c0_i32 = arith.constant 0 : i32
    %c0_i32_0 = arith.constant 0 : i32
    %c0_i32_1 = arith.constant 0 : i32
    %c0_i32_2 = arith.constant 0 : i32
    return %c0_i32, %c0_i32_0, %c0_i32_1 : i32, i32, i32
  }
  func.func @transform_1(%arg0: i32) -> (i32, i32) {
    %c0_i32 = arith.constant 0 : i32
    %c0_i32_0 = arith.constant 0 : i32
    %c0_i32_1 = arith.constant 0 : i32
    return %c0_i32, %c0_i32_0 : i32, i32
  }
  func.func @transform_2(%arg0: i32) -> (i32, i32, i32, i32) {
    %c0_i32 = arith.constant 0 : i32
    %c0_i32_0 = arith.constant 0 : i32
    %c0_i32_1 = arith.constant 0 : i32
    %c0_i32_2 = arith.constant 0 : i32
    return %arg0, %c0_i32, %c0_i32_0, %c0_i32_1 : i32, i32, i32, i32
  }
  func.func @transform_3(%arg0: i32) -> (i32, i32, i32) {
    %c0_i32 = arith.constant 0 : i32
    %c0_i32_0 = arith.constant 0 : i32
    %c0_i32_1 = arith.constant 0 : i32
    return %arg0, %c0_i32, %c0_i32_0 : i32, i32, i32
  }
  func.func @transform_4(%arg0: i32) -> (i32, i32, i32) {
    %c0_i32 = arith.constant 0 : i32
    %c0_i32_0 = arith.constant 0 : i32
    %c0_i32_1 = arith.constant 0 : i32
    return %arg0, %c0_i32, %c0_i32_0 : i32, i32, i32
  }
}

module attributes {stable_mosaic.version = 11 : i64} {
  func.func @_conv_kernel(%arg0: i32, %arg1: memref<4x8x128xf32, #tpu.memory_space<vmem>>, %arg2: memref<9x128xf32, #tpu.memory_space<vmem>>, %arg3: memref<1x9x8x8xbf16, #tpu.memory_space<vmem>>, %arg4: memref<1x8x1xf32, #tpu.memory_space<vmem>>, %arg5: memref<1x8x128xf32, #tpu.memory_space<vmem>>) attributes {dimension_semantics = [#tpu.dimension_semantics<parallel>], iteration_bounds = array<i64: 2>, scalar_prefetch = 0 : i64, scratch_operands = 0 : i64, tpu.core_type = #tpu.core_type<tc>, window_params = [{pipeline_mode = #tpu.pipeline_mode<synchronous>, transform_indices = @transform_0, window_bounds = array<i64: 4, 8, 128>}, {pipeline_mode = #tpu.pipeline_mode<synchronous>, transform_indices = @transform_1, window_bounds = array<i64: 9, 128>}, {transform_indices = @transform_2, window_bounds = array<i64: 1, 9, 8, 8>}, {transform_indices = @transform_3, window_bounds = array<i64: 1, 8, 1>}, {transform_indices = @transform_4, window_bounds = array<i64: 1, 8, 128>}]} {
    %c0 = arith.constant 0 : index
    %c0_0 = arith.constant 0 : index
    %c0_1 = arith.constant 0 : index
    %0 = vector.load %arg1[%c0, %c0_0, %c0_1] : memref<4x8x128xf32, #tpu.memory_space<vmem>>, vector<4x8x128xf32>
    %cst = arith.constant 0.000000e+00 : f32
    %1 = vector.broadcast %cst : f32 to vector<4x8x128xf32>
    %2 = arith.cmpf ogt, %0, %1 : vector<4x8x128xf32>
    %cst_2 = arith.constant 0.00999999977 : f32
    %3 = vector.broadcast %cst_2 : f32 to vector<4x8x128xf32>
    %4 = arith.mulf %3, %0 : vector<4x8x128xf32>
    %5 = arith.select %2, %0, %4 : vector<4x8x128xi1>, vector<4x8x128xf32>
    %c0_3 = arith.constant 0 : index
    %c0_4 = arith.constant 0 : index
    %6 = vector.load %arg2[%c0_3, %c0_4] : memref<9x128xf32, #tpu.memory_space<vmem>>, vector<9x128xf32>
    %c0_5 = arith.constant 0 : index
    %c0_6 = arith.constant 0 : index
    %c0_7 = arith.constant 0 : index
    %c0_8 = arith.constant 0 : index
    %7 = vector.load %arg3[%c0_5, %c0_6, %c0_7, %c0_8] : memref<1x9x8x8xbf16, #tpu.memory_space<vmem>>, vector<1x9x8x8xbf16>
    %8 = vector.shape_cast %7 : vector<1x9x8x8xbf16> to vector<9x8x8xbf16>
    %cst_9 = arith.constant 0.000000e+00 : f32
    %9 = vector.broadcast %cst_9 : f32 to vector<8x128xf32>
    %10 = vector.extract_strided_slice %5 {offsets = [3, 0, 0], sizes = [1, 8, 128], strides = [1, 1, 1]} : vector<4x8x128xf32> to vector<1x8x128xf32>
    %11 = vector.shape_cast %10 : vector<1x8x128xf32> to vector<8x128xf32>
    %c5_i32 = arith.constant 5 : i32
    %12 = tpu.dynamic_rotate %11 by %c5_i32 dim 1 : vector<8x128xf32>, i32 -> vector<8x128xf32>
    %13 = vector.extract_strided_slice %6 {offsets = [0, 0], sizes = [1, 128], strides = [1, 1]} : vector<9x128xf32> to vector<1x128xf32>
    %14 = vector.broadcast %13 : vector<1x128xf32> to vector<8x128xf32>
    %15 = arith.mulf %12, %14 : vector<8x128xf32>
    %16 = vector.extract_strided_slice %8 {offsets = [0, 0, 0], sizes = [1, 8, 8], strides = [1, 1, 1]} : vector<9x8x8xbf16> to vector<1x8x8xbf16>
    %17 = vector.shape_cast %16 : vector<1x8x8xbf16> to vector<8x8xbf16>
    %18 = arith.truncf %15 : vector<8x128xf32> to vector<8x128xbf16>
    %cst_10 = arith.constant dense<0.000000e+00> : vector<8x128xf32>
    %19 = tpu.matmul %17, %18, %cst_10 {dimension_numbers = #tpu.dot_dimension_numbers<[1], [0], [0], [1], [0, 0, 1, 1], [], []>} : vector<8x8xbf16>, vector<8x128xbf16>, vector<8x128xf32> -> vector<8x128xf32>
    %20 = arith.addf %9, %19 : vector<8x128xf32>
    %21 = vector.extract_strided_slice %5 {offsets = [2, 0, 0], sizes = [1, 8, 128], strides = [1, 1, 1]} : vector<4x8x128xf32> to vector<1x8x128xf32>
    %22 = vector.shape_cast %21 : vector<1x8x128xf32> to vector<8x128xf32>
    %c4_i32 = arith.constant 4 : i32
    %23 = tpu.dynamic_rotate %22 by %c4_i32 dim 1 : vector<8x128xf32>, i32 -> vector<8x128xf32>
    %24 = vector.extract_strided_slice %6 {offsets = [1, 0], sizes = [1, 128], strides = [1, 1]} : vector<9x128xf32> to vector<1x128xf32>
    %25 = vector.broadcast %24 : vector<1x128xf32> to vector<8x128xf32>
    %26 = arith.mulf %23, %25 : vector<8x128xf32>
    %27 = vector.extract_strided_slice %8 {offsets = [1, 0, 0], sizes = [1, 8, 8], strides = [1, 1, 1]} : vector<9x8x8xbf16> to vector<1x8x8xbf16>
    %28 = vector.shape_cast %27 : vector<1x8x8xbf16> to vector<8x8xbf16>
    %29 = arith.truncf %26 : vector<8x128xf32> to vector<8x128xbf16>
    %cst_11 = arith.constant dense<0.000000e+00> : vector<8x128xf32>
    %30 = tpu.matmul %28, %29, %cst_11 {dimension_numbers = #tpu.dot_dimension_numbers<[1], [0], [0], [1], [0, 0, 1, 1], [], []>} : vector<8x8xbf16>, vector<8x128xbf16>, vector<8x128xf32> -> vector<8x128xf32>
    %31 = arith.addf %20, %30 : vector<8x128xf32>
    %32 = vector.extract_strided_slice %5 {offsets = [3, 0, 0], sizes = [1, 8, 128], strides = [1, 1, 1]} : vector<4x8x128xf32> to vector<1x8x128xf32>
    %33 = vector.shape_cast %32 : vector<1x8x128xf32> to vector<8x128xf32>
    %c4_i32_12 = arith.constant 4 : i32
    %34 = tpu.dynamic_rotate %33 by %c4_i32_12 dim 1 : vector<8x128xf32>, i32 -> vector<8x128xf32>
    %35 = vector.extract_strided_slice %6 {offsets = [2, 0], sizes = [1, 128], strides = [1, 1]} : vector<9x128xf32> to vector<1x128xf32>
    %36 = vector.broadcast %35 : vector<1x128xf32> to vector<8x128xf32>
    %37 = arith.mulf %34, %36 : vector<8x128xf32>
    %38 = vector.extract_strided_slice %8 {offsets = [2, 0, 0], sizes = [1, 8, 8], strides = [1, 1, 1]} : vector<9x8x8xbf16> to vector<1x8x8xbf16>
    %39 = vector.shape_cast %38 : vector<1x8x8xbf16> to vector<8x8xbf16>
    %40 = arith.truncf %37 : vector<8x128xf32> to vector<8x128xbf16>
    %cst_13 = arith.constant dense<0.000000e+00> : vector<8x128xf32>
    %41 = tpu.matmul %39, %40, %cst_13 {dimension_numbers = #tpu.dot_dimension_numbers<[1], [0], [0], [1], [0, 0, 1, 1], [], []>} : vector<8x8xbf16>, vector<8x128xbf16>, vector<8x128xf32> -> vector<8x128xf32>
    %42 = arith.addf %31, %41 : vector<8x128xf32>
    %43 = vector.extract_strided_slice %5 {offsets = [1, 0, 0], sizes = [1, 8, 128], strides = [1, 1, 1]} : vector<4x8x128xf32> to vector<1x8x128xf32>
    %44 = vector.shape_cast %43 : vector<1x8x128xf32> to vector<8x128xf32>
    %c1_i32 = arith.constant 1 : i32
    %45 = tpu.dynamic_rotate %44 by %c1_i32 dim 1 : vector<8x128xf32>, i32 -> vector<8x128xf32>
    %46 = vector.extract_strided_slice %6 {offsets = [3, 0], sizes = [1, 128], strides = [1, 1]} : vector<9x128xf32> to vector<1x128xf32>
    %47 = vector.broadcast %46 : vector<1x128xf32> to vector<8x128xf32>
    %48 = arith.mulf %45, %47 : vector<8x128xf32>
    %49 = vector.extract_strided_slice %8 {offsets = [3, 0, 0], sizes = [1, 8, 8], strides = [1, 1, 1]} : vector<9x8x8xbf16> to vector<1x8x8xbf16>
    %50 = vector.shape_cast %49 : vector<1x8x8xbf16> to vector<8x8xbf16>
    %51 = arith.truncf %48 : vector<8x128xf32> to vector<8x128xbf16>
    %cst_14 = arith.constant dense<0.000000e+00> : vector<8x128xf32>
    %52 = tpu.matmul %50, %51, %cst_14 {dimension_numbers = #tpu.dot_dimension_numbers<[1], [0], [0], [1], [0, 0, 1, 1], [], []>} : vector<8x8xbf16>, vector<8x128xbf16>, vector<8x128xf32> -> vector<8x128xf32>
    %53 = arith.addf %42, %52 : vector<8x128xf32>
    %54 = vector.extract_strided_slice %5 {offsets = [0, 0, 0], sizes = [1, 8, 128], strides = [1, 1, 1]} : vector<4x8x128xf32> to vector<1x8x128xf32>
    %55 = vector.shape_cast %54 : vector<1x8x128xf32> to vector<8x128xf32>
    %56 = vector.extract_strided_slice %6 {offsets = [4, 0], sizes = [1, 128], strides = [1, 1]} : vector<9x128xf32> to vector<1x128xf32>
    %57 = vector.broadcast %56 : vector<1x128xf32> to vector<8x128xf32>
    %58 = arith.mulf %55, %57 : vector<8x128xf32>
    %59 = vector.extract_strided_slice %8 {offsets = [4, 0, 0], sizes = [1, 8, 8], strides = [1, 1, 1]} : vector<9x8x8xbf16> to vector<1x8x8xbf16>
    %60 = vector.shape_cast %59 : vector<1x8x8xbf16> to vector<8x8xbf16>
    %61 = arith.truncf %58 : vector<8x128xf32> to vector<8x128xbf16>
    %cst_15 = arith.constant dense<0.000000e+00> : vector<8x128xf32>
    %62 = tpu.matmul %60, %61, %cst_15 {dimension_numbers = #tpu.dot_dimension_numbers<[1], [0], [0], [1], [0, 0, 1, 1], [], []>} : vector<8x8xbf16>, vector<8x128xbf16>, vector<8x128xf32> -> vector<8x128xf32>
    %63 = arith.addf %53, %62 : vector<8x128xf32>
    %64 = vector.extract_strided_slice %5 {offsets = [1, 0, 0], sizes = [1, 8, 128], strides = [1, 1, 1]} : vector<4x8x128xf32> to vector<1x8x128xf32>
    %65 = vector.shape_cast %64 : vector<1x8x128xf32> to vector<8x128xf32>
    %66 = vector.extract_strided_slice %6 {offsets = [5, 0], sizes = [1, 128], strides = [1, 1]} : vector<9x128xf32> to vector<1x128xf32>
    %67 = vector.broadcast %66 : vector<1x128xf32> to vector<8x128xf32>
    %68 = arith.mulf %65, %67 : vector<8x128xf32>
    %69 = vector.extract_strided_slice %8 {offsets = [5, 0, 0], sizes = [1, 8, 8], strides = [1, 1, 1]} : vector<9x8x8xbf16> to vector<1x8x8xbf16>
    %70 = vector.shape_cast %69 : vector<1x8x8xbf16> to vector<8x8xbf16>
    %71 = arith.truncf %68 : vector<8x128xf32> to vector<8x128xbf16>
    %cst_16 = arith.constant dense<0.000000e+00> : vector<8x128xf32>
    %72 = tpu.matmul %70, %71, %cst_16 {dimension_numbers = #tpu.dot_dimension_numbers<[1], [0], [0], [1], [0, 0, 1, 1], [], []>} : vector<8x8xbf16>, vector<8x128xbf16>, vector<8x128xf32> -> vector<8x128xf32>
    %73 = arith.addf %63, %72 : vector<8x128xf32>
    %74 = vector.extract_strided_slice %5 {offsets = [3, 0, 0], sizes = [1, 8, 128], strides = [1, 1, 1]} : vector<4x8x128xf32> to vector<1x8x128xf32>
    %75 = vector.shape_cast %74 : vector<1x8x128xf32> to vector<8x128xf32>
    %c1_i32_17 = arith.constant 1 : i32
    %76 = tpu.dynamic_rotate %75 by %c1_i32_17 dim 1 : vector<8x128xf32>, i32 -> vector<8x128xf32>
    %77 = vector.extract_strided_slice %6 {offsets = [6, 0], sizes = [1, 128], strides = [1, 1]} : vector<9x128xf32> to vector<1x128xf32>
    %78 = vector.broadcast %77 : vector<1x128xf32> to vector<8x128xf32>
    %79 = arith.mulf %76, %78 : vector<8x128xf32>
    %80 = vector.extract_strided_slice %8 {offsets = [6, 0, 0], sizes = [1, 8, 8], strides = [1, 1, 1]} : vector<9x8x8xbf16> to vector<1x8x8xbf16>
    %81 = vector.shape_cast %80 : vector<1x8x8xbf16> to vector<8x8xbf16>
    %82 = arith.truncf %79 : vector<8x128xf32> to vector<8x128xbf16>
    %cst_18 = arith.constant dense<0.000000e+00> : vector<8x128xf32>
    %83 = tpu.matmul %81, %82, %cst_18 {dimension_numbers = #tpu.dot_dimension_numbers<[1], [0], [0], [1], [0, 0, 1, 1], [], []>} : vector<8x8xbf16>, vector<8x128xbf16>, vector<8x128xf32> -> vector<8x128xf32>
    %84 = arith.addf %73, %83 : vector<8x128xf32>
    %85 = vector.extract_strided_slice %5 {offsets = [2, 0, 0], sizes = [1, 8, 128], strides = [1, 1, 1]} : vector<4x8x128xf32> to vector<1x8x128xf32>
    %86 = vector.shape_cast %85 : vector<1x8x128xf32> to vector<8x128xf32>
    %87 = vector.extract_strided_slice %6 {offsets = [7, 0], sizes = [1, 128], strides = [1, 1]} : vector<9x128xf32> to vector<1x128xf32>
    %88 = vector.broadcast %87 : vector<1x128xf32> to vector<8x128xf32>
    %89 = arith.mulf %86, %88 : vector<8x128xf32>
    %90 = vector.extract_strided_slice %8 {offsets = [7, 0, 0], sizes = [1, 8, 8], strides = [1, 1, 1]} : vector<9x8x8xbf16> to vector<1x8x8xbf16>
    %91 = vector.shape_cast %90 : vector<1x8x8xbf16> to vector<8x8xbf16>
    %92 = arith.truncf %89 : vector<8x128xf32> to vector<8x128xbf16>
    %cst_19 = arith.constant dense<0.000000e+00> : vector<8x128xf32>
    %93 = tpu.matmul %91, %92, %cst_19 {dimension_numbers = #tpu.dot_dimension_numbers<[1], [0], [0], [1], [0, 0, 1, 1], [], []>} : vector<8x8xbf16>, vector<8x128xbf16>, vector<8x128xf32> -> vector<8x128xf32>
    %94 = arith.addf %84, %93 : vector<8x128xf32>
    %95 = vector.extract_strided_slice %5 {offsets = [3, 0, 0], sizes = [1, 8, 128], strides = [1, 1, 1]} : vector<4x8x128xf32> to vector<1x8x128xf32>
    %96 = vector.shape_cast %95 : vector<1x8x128xf32> to vector<8x128xf32>
    %97 = vector.extract_strided_slice %6 {offsets = [8, 0], sizes = [1, 128], strides = [1, 1]} : vector<9x128xf32> to vector<1x128xf32>
    %98 = vector.broadcast %97 : vector<1x128xf32> to vector<8x128xf32>
    %99 = arith.mulf %96, %98 : vector<8x128xf32>
    %100 = vector.extract_strided_slice %8 {offsets = [8, 0, 0], sizes = [1, 8, 8], strides = [1, 1, 1]} : vector<9x8x8xbf16> to vector<1x8x8xbf16>
    %101 = vector.shape_cast %100 : vector<1x8x8xbf16> to vector<8x8xbf16>
    %102 = arith.truncf %99 : vector<8x128xf32> to vector<8x128xbf16>
    %cst_20 = arith.constant dense<0.000000e+00> : vector<8x128xf32>
    %103 = tpu.matmul %101, %102, %cst_20 {dimension_numbers = #tpu.dot_dimension_numbers<[1], [0], [0], [1], [0, 0, 1, 1], [], []>} : vector<8x8xbf16>, vector<8x128xbf16>, vector<8x128xf32> -> vector<8x128xf32>
    %104 = arith.addf %94, %103 : vector<8x128xf32>
    %c0_21 = arith.constant 0 : index
    %c0_22 = arith.constant 0 : index
    %c0_23 = arith.constant 0 : index
    %105 = vector.load %arg4[%c0_21, %c0_22, %c0_23] : memref<1x8x1xf32, #tpu.memory_space<vmem>>, vector<1x8x1xf32>
    %106 = vector.shape_cast %105 : vector<1x8x1xf32> to vector<8x1xf32>
    %107 = vector.broadcast %106 : vector<8x1xf32> to vector<8x128xf32>
    %108 = arith.addf %104, %107 : vector<8x128xf32>
    %109 = vector.extract_strided_slice %0 {offsets = [0, 0, 0], sizes = [1, 8, 128], strides = [1, 1, 1]} : vector<4x8x128xf32> to vector<1x8x128xf32>
    %110 = vector.shape_cast %109 : vector<1x8x128xf32> to vector<8x128xf32>
    %111 = vector.extract_strided_slice %0 {offsets = [1, 0, 0], sizes = [1, 8, 128], strides = [1, 1, 1]} : vector<4x8x128xf32> to vector<1x8x128xf32>
    %112 = vector.shape_cast %111 : vector<1x8x128xf32> to vector<8x128xf32>
    %113 = arith.addf %110, %112 : vector<8x128xf32>
    %114 = vector.extract_strided_slice %0 {offsets = [2, 0, 0], sizes = [1, 8, 128], strides = [1, 1, 1]} : vector<4x8x128xf32> to vector<1x8x128xf32>
    %115 = vector.shape_cast %114 : vector<1x8x128xf32> to vector<8x128xf32>
    %116 = arith.addf %113, %115 : vector<8x128xf32>
    %117 = vector.extract_strided_slice %0 {offsets = [3, 0, 0], sizes = [1, 8, 128], strides = [1, 1, 1]} : vector<4x8x128xf32> to vector<1x8x128xf32>
    %118 = vector.shape_cast %117 : vector<1x8x128xf32> to vector<8x128xf32>
    %119 = arith.addf %116, %118 : vector<8x128xf32>
    %cst_24 = arith.constant 2.500000e-01 : f32
    %120 = vector.broadcast %cst_24 : f32 to vector<8x128xf32>
    %121 = arith.mulf %120, %119 : vector<8x128xf32>
    %c1_i32_25 = arith.constant 1 : i32
    %122 = arith.cmpi eq, %arg0, %c1_i32_25 : i32
    %123 = arith.extui %122 : i1 to i32
    %124 = arith.sitofp %123 : i32 to f32
    %125 = vector.broadcast %124 : f32 to vector<8x128xf32>
    %126 = arith.mulf %121, %125 : vector<8x128xf32>
    %127 = arith.addf %108, %126 : vector<8x128xf32>
    %c0_26 = arith.constant 0 : index
    %c0_27 = arith.constant 0 : index
    %c0_28 = arith.constant 0 : index
    %128 = vector.load %arg5[%c0_26, %c0_27, %c0_28] : memref<1x8x128xf32, #tpu.memory_space<vmem>>, vector<1x8x128xf32>
    %129 = vector.shape_cast %128 : vector<1x8x128xf32> to vector<8x128xf32>
    %130 = vector.shape_cast %127 : vector<8x128xf32> to vector<1x8x128xf32>
    tpu.vector_store %arg5[%c0_26, %c0_27, %c0_28], %130 {strides = array<i32>} : memref<1x8x128xf32, #tpu.memory_space<vmem>>, vector<1x8x128xf32>,
    return
  }
  func.func @transform_0(%arg0: i32) -> (i32, i32, i32) {
    %c0_i32 = arith.constant 0 : i32
    %c0_i32_0 = arith.constant 0 : i32
    %c0_i32_1 = arith.constant 0 : i32
    %c0_i32_2 = arith.constant 0 : i32
    return %c0_i32, %c0_i32_0, %c0_i32_1 : i32, i32, i32
  }
  func.func @transform_1(%arg0: i32) -> (i32, i32) {
    %c0_i32 = arith.constant 0 : i32
    %c0_i32_0 = arith.constant 0 : i32
    %c0_i32_1 = arith.constant 0 : i32
    return %c0_i32, %c0_i32_0 : i32, i32
  }
  func.func @transform_2(%arg0: i32) -> (i32, i32, i32, i32) {
    %c0_i32 = arith.constant 0 : i32
    %c0_i32_0 = arith.constant 0 : i32
    %c0_i32_1 = arith.constant 0 : i32
    %c0_i32_2 = arith.constant 0 : i32
    return %arg0, %c0_i32, %c0_i32_0, %c0_i32_1 : i32, i32, i32, i32
  }
  func.func @transform_3(%arg0: i32) -> (i32, i32, i32) {
    %c0_i32 = arith.constant 0 : i32
    %c0_i32_0 = arith.constant 0 : i32
    %c0_i32_1 = arith.constant 0 : i32
    return %arg0, %c0_i32, %c0_i32_0 : i32, i32, i32
  }
  func.func @transform_4(%arg0: i32) -> (i32, i32, i32) {
    %c0_i32 = arith.constant 0 : i32
    %c0_i32_0 = arith.constant 0 : i32
    %c0_i32_1 = arith.constant 0 : i32
    return %arg0, %c0_i32, %c0_i32_0 : i32, i32, i32
  }
}

module attributes {stable_mosaic.version = 11 : i64} {
  func.func @_conv_kernel(%arg0: i32, %arg1: memref<1x16x128xf32, #tpu.memory_space<vmem>>, %arg2: memref<9x128xf32, #tpu.memory_space<vmem>>, %arg3: memref<1x9x16x16xbf16, #tpu.memory_space<vmem>>, %arg4: memref<1x16x1xf32, #tpu.memory_space<vmem>>, %arg5: memref<1x16x128xf32, #tpu.memory_space<vmem>>) attributes {dimension_semantics = [#tpu.dimension_semantics<parallel>], iteration_bounds = array<i64: 2>, scalar_prefetch = 0 : i64, scratch_operands = 0 : i64, tpu.core_type = #tpu.core_type<tc>, window_params = [{pipeline_mode = #tpu.pipeline_mode<synchronous>, transform_indices = @transform_0, window_bounds = array<i64: 1, 16, 128>}, {pipeline_mode = #tpu.pipeline_mode<synchronous>, transform_indices = @transform_1, window_bounds = array<i64: 9, 128>}, {transform_indices = @transform_2, window_bounds = array<i64: 1, 9, 16, 16>}, {transform_indices = @transform_3, window_bounds = array<i64: 1, 16, 1>}, {transform_indices = @transform_4, window_bounds = array<i64: 1, 16, 128>}]} {
    %c0 = arith.constant 0 : index
    %c0_0 = arith.constant 0 : index
    %c0_1 = arith.constant 0 : index
    %0 = vector.load %arg1[%c0, %c0_0, %c0_1] : memref<1x16x128xf32, #tpu.memory_space<vmem>>, vector<1x16x128xf32>
    %cst = arith.constant 0.000000e+00 : f32
    %1 = vector.broadcast %cst : f32 to vector<1x16x128xf32>
    %2 = arith.cmpf ogt, %0, %1 : vector<1x16x128xf32>
    %cst_2 = arith.constant 0.00999999977 : f32
    %3 = vector.broadcast %cst_2 : f32 to vector<1x16x128xf32>
    %4 = arith.mulf %3, %0 : vector<1x16x128xf32>
    %5 = arith.select %2, %0, %4 : vector<1x16x128xi1>, vector<1x16x128xf32>
    %c0_3 = arith.constant 0 : index
    %c0_4 = arith.constant 0 : index
    %6 = vector.load %arg2[%c0_3, %c0_4] : memref<9x128xf32, #tpu.memory_space<vmem>>, vector<9x128xf32>
    %c0_5 = arith.constant 0 : index
    %c0_6 = arith.constant 0 : index
    %c0_7 = arith.constant 0 : index
    %c0_8 = arith.constant 0 : index
    %7 = vector.load %arg3[%c0_5, %c0_6, %c0_7, %c0_8] : memref<1x9x16x16xbf16, #tpu.memory_space<vmem>>, vector<1x9x16x16xbf16>
    %8 = vector.shape_cast %7 : vector<1x9x16x16xbf16> to vector<9x16x16xbf16>
    %cst_9 = arith.constant 0.000000e+00 : f32
    %9 = vector.broadcast %cst_9 : f32 to vector<16x128xf32>
    %10 = vector.shape_cast %5 : vector<1x16x128xf32> to vector<16x128xf32>
    %c5_i32 = arith.constant 5 : i32
    %11 = tpu.dynamic_rotate %10 by %c5_i32 dim 1 : vector<16x128xf32>, i32 -> vector<16x128xf32>
    %12 = vector.extract_strided_slice %6 {offsets = [0, 0], sizes = [1, 128], strides = [1, 1]} : vector<9x128xf32> to vector<1x128xf32>
    %13 = vector.broadcast %12 : vector<1x128xf32> to vector<16x128xf32>
    %14 = arith.mulf %11, %13 : vector<16x128xf32>
    %15 = vector.extract_strided_slice %8 {offsets = [0, 0, 0], sizes = [1, 16, 16], strides = [1, 1, 1]} : vector<9x16x16xbf16> to vector<1x16x16xbf16>
    %16 = vector.shape_cast %15 : vector<1x16x16xbf16> to vector<16x16xbf16>
    %17 = arith.truncf %14 : vector<16x128xf32> to vector<16x128xbf16>
    %cst_10 = arith.constant dense<0.000000e+00> : vector<16x128xf32>
    %18 = tpu.matmul %16, %17, %cst_10 {dimension_numbers = #tpu.dot_dimension_numbers<[1], [0], [0], [1], [0, 0, 1, 1], [], []>} : vector<16x16xbf16>, vector<16x128xbf16>, vector<16x128xf32> -> vector<16x128xf32>
    %19 = arith.addf %9, %18 : vector<16x128xf32>
    %20 = vector.shape_cast %5 : vector<1x16x128xf32> to vector<16x128xf32>
    %c4_i32 = arith.constant 4 : i32
    %21 = tpu.dynamic_rotate %20 by %c4_i32 dim 1 : vector<16x128xf32>, i32 -> vector<16x128xf32>
    %22 = vector.extract_strided_slice %6 {offsets = [1, 0], sizes = [1, 128], strides = [1, 1]} : vector<9x128xf32> to vector<1x128xf32>
    %23 = vector.broadcast %22 : vector<1x128xf32> to vector<16x128xf32>
    %24 = arith.mulf %21, %23 : vector<16x128xf32>
    %25 = vector.extract_strided_slice %8 {offsets = [1, 0, 0], sizes = [1, 16, 16], strides = [1, 1, 1]} : vector<9x16x16xbf16> to vector<1x16x16xbf16>
    %26 = vector.shape_cast %25 : vector<1x16x16xbf16> to vector<16x16xbf16>
    %27 = arith.truncf %24 : vector<16x128xf32> to vector<16x128xbf16>
    %cst_11 = arith.constant dense<0.000000e+00> : vector<16x128xf32>
    %28 = tpu.matmul %26, %27, %cst_11 {dimension_numbers = #tpu.dot_dimension_numbers<[1], [0], [0], [1], [0, 0, 1, 1], [], []>} : vector<16x16xbf16>, vector<16x128xbf16>, vector<16x128xf32> -> vector<16x128xf32>
    %29 = arith.addf %19, %28 : vector<16x128xf32>
    %30 = vector.shape_cast %5 : vector<1x16x128xf32> to vector<16x128xf32>
    %c3_i32 = arith.constant 3 : i32
    %31 = tpu.dynamic_rotate %30 by %c3_i32 dim 1 : vector<16x128xf32>, i32 -> vector<16x128xf32>
    %32 = vector.extract_strided_slice %6 {offsets = [2, 0], sizes = [1, 128], strides = [1, 1]} : vector<9x128xf32> to vector<1x128xf32>
    %33 = vector.broadcast %32 : vector<1x128xf32> to vector<16x128xf32>
    %34 = arith.mulf %31, %33 : vector<16x128xf32>
    %35 = vector.extract_strided_slice %8 {offsets = [2, 0, 0], sizes = [1, 16, 16], strides = [1, 1, 1]} : vector<9x16x16xbf16> to vector<1x16x16xbf16>
    %36 = vector.shape_cast %35 : vector<1x16x16xbf16> to vector<16x16xbf16>
    %37 = arith.truncf %34 : vector<16x128xf32> to vector<16x128xbf16>
    %cst_12 = arith.constant dense<0.000000e+00> : vector<16x128xf32>
    %38 = tpu.matmul %36, %37, %cst_12 {dimension_numbers = #tpu.dot_dimension_numbers<[1], [0], [0], [1], [0, 0, 1, 1], [], []>} : vector<16x16xbf16>, vector<16x128xbf16>, vector<16x128xf32> -> vector<16x128xf32>
    %39 = arith.addf %29, %38 : vector<16x128xf32>
    %40 = vector.shape_cast %5 : vector<1x16x128xf32> to vector<16x128xf32>
    %c1_i32 = arith.constant 1 : i32
    %41 = tpu.dynamic_rotate %40 by %c1_i32 dim 1 : vector<16x128xf32>, i32 -> vector<16x128xf32>
    %42 = vector.extract_strided_slice %6 {offsets = [3, 0], sizes = [1, 128], strides = [1, 1]} : vector<9x128xf32> to vector<1x128xf32>
    %43 = vector.broadcast %42 : vector<1x128xf32> to vector<16x128xf32>
    %44 = arith.mulf %41, %43 : vector<16x128xf32>
    %45 = vector.extract_strided_slice %8 {offsets = [3, 0, 0], sizes = [1, 16, 16], strides = [1, 1, 1]} : vector<9x16x16xbf16> to vector<1x16x16xbf16>
    %46 = vector.shape_cast %45 : vector<1x16x16xbf16> to vector<16x16xbf16>
    %47 = arith.truncf %44 : vector<16x128xf32> to vector<16x128xbf16>
    %cst_13 = arith.constant dense<0.000000e+00> : vector<16x128xf32>
    %48 = tpu.matmul %46, %47, %cst_13 {dimension_numbers = #tpu.dot_dimension_numbers<[1], [0], [0], [1], [0, 0, 1, 1], [], []>} : vector<16x16xbf16>, vector<16x128xbf16>, vector<16x128xf32> -> vector<16x128xf32>
    %49 = arith.addf %39, %48 : vector<16x128xf32>
    %50 = vector.shape_cast %5 : vector<1x16x128xf32> to vector<16x128xf32>
    %51 = vector.extract_strided_slice %6 {offsets = [4, 0], sizes = [1, 128], strides = [1, 1]} : vector<9x128xf32> to vector<1x128xf32>
    %52 = vector.broadcast %51 : vector<1x128xf32> to vector<16x128xf32>
    %53 = arith.mulf %50, %52 : vector<16x128xf32>
    %54 = vector.extract_strided_slice %8 {offsets = [4, 0, 0], sizes = [1, 16, 16], strides = [1, 1, 1]} : vector<9x16x16xbf16> to vector<1x16x16xbf16>
    %55 = vector.shape_cast %54 : vector<1x16x16xbf16> to vector<16x16xbf16>
    %56 = arith.truncf %53 : vector<16x128xf32> to vector<16x128xbf16>
    %cst_14 = arith.constant dense<0.000000e+00> : vector<16x128xf32>
    %57 = tpu.matmul %55, %56, %cst_14 {dimension_numbers = #tpu.dot_dimension_numbers<[1], [0], [0], [1], [0, 0, 1, 1], [], []>} : vector<16x16xbf16>, vector<16x128xbf16>, vector<16x128xf32> -> vector<16x128xf32>
    %58 = arith.addf %49, %57 : vector<16x128xf32>
    %59 = vector.shape_cast %5 : vector<1x16x128xf32> to vector<16x128xf32>
    %c127_i32 = arith.constant 127 : i32
    %60 = tpu.dynamic_rotate %59 by %c127_i32 dim 1 : vector<16x128xf32>, i32 -> vector<16x128xf32>
    %61 = vector.extract_strided_slice %6 {offsets = [5, 0], sizes = [1, 128], strides = [1, 1]} : vector<9x128xf32> to vector<1x128xf32>
    %62 = vector.broadcast %61 : vector<1x128xf32> to vector<16x128xf32>
    %63 = arith.mulf %60, %62 : vector<16x128xf32>
    %64 = vector.extract_strided_slice %8 {offsets = [5, 0, 0], sizes = [1, 16, 16], strides = [1, 1, 1]} : vector<9x16x16xbf16> to vector<1x16x16xbf16>
    %65 = vector.shape_cast %64 : vector<1x16x16xbf16> to vector<16x16xbf16>
    %66 = arith.truncf %63 : vector<16x128xf32> to vector<16x128xbf16>
    %cst_15 = arith.constant dense<0.000000e+00> : vector<16x128xf32>
    %67 = tpu.matmul %65, %66, %cst_15 {dimension_numbers = #tpu.dot_dimension_numbers<[1], [0], [0], [1], [0, 0, 1, 1], [], []>} : vector<16x16xbf16>, vector<16x128xbf16>, vector<16x128xf32> -> vector<16x128xf32>
    %68 = arith.addf %58, %67 : vector<16x128xf32>
    %69 = vector.shape_cast %5 : vector<1x16x128xf32> to vector<16x128xf32>
    %c125_i32 = arith.constant 125 : i32
    %70 = tpu.dynamic_rotate %69 by %c125_i32 dim 1 : vector<16x128xf32>, i32 -> vector<16x128xf32>
    %71 = vector.extract_strided_slice %6 {offsets = [6, 0], sizes = [1, 128], strides = [1, 1]} : vector<9x128xf32> to vector<1x128xf32>
    %72 = vector.broadcast %71 : vector<1x128xf32> to vector<16x128xf32>
    %73 = arith.mulf %70, %72 : vector<16x128xf32>
    %74 = vector.extract_strided_slice %8 {offsets = [6, 0, 0], sizes = [1, 16, 16], strides = [1, 1, 1]} : vector<9x16x16xbf16> to vector<1x16x16xbf16>
    %75 = vector.shape_cast %74 : vector<1x16x16xbf16> to vector<16x16xbf16>
    %76 = arith.truncf %73 : vector<16x128xf32> to vector<16x128xbf16>
    %cst_16 = arith.constant dense<0.000000e+00> : vector<16x128xf32>
    %77 = tpu.matmul %75, %76, %cst_16 {dimension_numbers = #tpu.dot_dimension_numbers<[1], [0], [0], [1], [0, 0, 1, 1], [], []>} : vector<16x16xbf16>, vector<16x128xbf16>, vector<16x128xf32> -> vector<16x128xf32>
    %78 = arith.addf %68, %77 : vector<16x128xf32>
    %79 = vector.shape_cast %5 : vector<1x16x128xf32> to vector<16x128xf32>
    %c124_i32 = arith.constant 124 : i32
    %80 = tpu.dynamic_rotate %79 by %c124_i32 dim 1 : vector<16x128xf32>, i32 -> vector<16x128xf32>
    %81 = vector.extract_strided_slice %6 {offsets = [7, 0], sizes = [1, 128], strides = [1, 1]} : vector<9x128xf32> to vector<1x128xf32>
    %82 = vector.broadcast %81 : vector<1x128xf32> to vector<16x128xf32>
    %83 = arith.mulf %80, %82 : vector<16x128xf32>
    %84 = vector.extract_strided_slice %8 {offsets = [7, 0, 0], sizes = [1, 16, 16], strides = [1, 1, 1]} : vector<9x16x16xbf16> to vector<1x16x16xbf16>
    %85 = vector.shape_cast %84 : vector<1x16x16xbf16> to vector<16x16xbf16>
    %86 = arith.truncf %83 : vector<16x128xf32> to vector<16x128xbf16>
    %cst_17 = arith.constant dense<0.000000e+00> : vector<16x128xf32>
    %87 = tpu.matmul %85, %86, %cst_17 {dimension_numbers = #tpu.dot_dimension_numbers<[1], [0], [0], [1], [0, 0, 1, 1], [], []>} : vector<16x16xbf16>, vector<16x128xbf16>, vector<16x128xf32> -> vector<16x128xf32>
    %88 = arith.addf %78, %87 : vector<16x128xf32>
    %89 = vector.shape_cast %5 : vector<1x16x128xf32> to vector<16x128xf32>
    %c123_i32 = arith.constant 123 : i32
    %90 = tpu.dynamic_rotate %89 by %c123_i32 dim 1 : vector<16x128xf32>, i32 -> vector<16x128xf32>
    %91 = vector.extract_strided_slice %6 {offsets = [8, 0], sizes = [1, 128], strides = [1, 1]} : vector<9x128xf32> to vector<1x128xf32>
    %92 = vector.broadcast %91 : vector<1x128xf32> to vector<16x128xf32>
    %93 = arith.mulf %90, %92 : vector<16x128xf32>
    %94 = vector.extract_strided_slice %8 {offsets = [8, 0, 0], sizes = [1, 16, 16], strides = [1, 1, 1]} : vector<9x16x16xbf16> to vector<1x16x16xbf16>
    %95 = vector.shape_cast %94 : vector<1x16x16xbf16> to vector<16x16xbf16>
    %96 = arith.truncf %93 : vector<16x128xf32> to vector<16x128xbf16>
    %cst_18 = arith.constant dense<0.000000e+00> : vector<16x128xf32>
    %97 = tpu.matmul %95, %96, %cst_18 {dimension_numbers = #tpu.dot_dimension_numbers<[1], [0], [0], [1], [0, 0, 1, 1], [], []>} : vector<16x16xbf16>, vector<16x128xbf16>, vector<16x128xf32> -> vector<16x128xf32>
    %98 = arith.addf %88, %97 : vector<16x128xf32>
    %c0_19 = arith.constant 0 : index
    %c0_20 = arith.constant 0 : index
    %c0_21 = arith.constant 0 : index
    %99 = vector.load %arg4[%c0_19, %c0_20, %c0_21] : memref<1x16x1xf32, #tpu.memory_space<vmem>>, vector<1x16x1xf32>
    %100 = vector.shape_cast %99 : vector<1x16x1xf32> to vector<16x1xf32>
    %101 = vector.broadcast %100 : vector<16x1xf32> to vector<16x128xf32>
    %102 = arith.addf %98, %101 : vector<16x128xf32>
    %c0_22 = arith.constant 0 : index
    %c0_23 = arith.constant 0 : index
    %c0_24 = arith.constant 0 : index
    %103 = vector.load %arg5[%c0_22, %c0_23, %c0_24] : memref<1x16x128xf32, #tpu.memory_space<vmem>>, vector<1x16x128xf32>
    %104 = vector.shape_cast %103 : vector<1x16x128xf32> to vector<16x128xf32>
    %105 = vector.shape_cast %102 : vector<16x128xf32> to vector<1x16x128xf32>
    tpu.vector_store %arg5[%c0_22, %c0_23, %c0_24], %105 {strides = array<i32>} : memref<1x16x128xf32, #tpu.memory_space<vmem>>, vector<1x16x128xf32>,
    return
  }
  func.func @transform_0(%arg0: i32) -> (i32, i32, i32) {
    %c0_i32 = arith.constant 0 : i32
    %c0_i32_0 = arith.constant 0 : i32
    %c0_i32_1 = arith.constant 0 : i32
    %c0_i32_2 = arith.constant 0 : i32
    return %c0_i32, %c0_i32_0, %c0_i32_1 : i32, i32, i32
  }
  func.func @transform_1(%arg0: i32) -> (i32, i32) {
    %c0_i32 = arith.constant 0 : i32
    %c0_i32_0 = arith.constant 0 : i32
    %c0_i32_1 = arith.constant 0 : i32
    return %c0_i32, %c0_i32_0 : i32, i32
  }
  func.func @transform_2(%arg0: i32) -> (i32, i32, i32, i32) {
    %c0_i32 = arith.constant 0 : i32
    %c0_i32_0 = arith.constant 0 : i32
    %c0_i32_1 = arith.constant 0 : i32
    %c0_i32_2 = arith.constant 0 : i32
    return %arg0, %c0_i32, %c0_i32_0, %c0_i32_1 : i32, i32, i32, i32
  }
  func.func @transform_3(%arg0: i32) -> (i32, i32, i32) {
    %c0_i32 = arith.constant 0 : i32
    %c0_i32_0 = arith.constant 0 : i32
    %c0_i32_1 = arith.constant 0 : i32
    return %arg0, %c0_i32, %c0_i32_0 : i32, i32, i32
  }
  func.func @transform_4(%arg0: i32) -> (i32, i32, i32) {
    %c0_i32 = arith.constant 0 : i32
    %c0_i32_0 = arith.constant 0 : i32
    %c0_i32_1 = arith.constant 0 : i32
    return %arg0, %c0_i32, %c0_i32_0 : i32, i32, i32
  }
}

module attributes {stable_mosaic.version = 11 : i64} {
  func.func @_upsample_add_kernel(%arg0: i32, %arg1: memref<1x2x8x128xf32, #tpu.memory_space<vmem>>, %arg2: memref<8x128xf32, #tpu.memory_space<vmem>>, %arg3: memref<5x128xf32, #tpu.memory_space<vmem>>, %arg4: memref<1x2x8x128xf32, #tpu.memory_space<vmem>>, %arg5: memref<1x2x8x1xf32, #tpu.memory_space<vmem>>, %arg6: memref<1x2x8x1xf32, #tpu.memory_space<vmem>>) attributes {dimension_semantics = [#tpu.dimension_semantics<parallel>], iteration_bounds = array<i64: 2>, scalar_prefetch = 0 : i64, scratch_operands = 0 : i64, tpu.core_type = #tpu.core_type<tc>, window_params = [{transform_indices = @transform_0, window_bounds = array<i64: 1, 2, 8, 128>}, {pipeline_mode = #tpu.pipeline_mode<synchronous>, transform_indices = @transform_1, window_bounds = array<i64: 8, 128>}, {pipeline_mode = #tpu.pipeline_mode<synchronous>, transform_indices = @transform_2, window_bounds = array<i64: 5, 128>}, {transform_indices = @transform_3, window_bounds = array<i64: 1, 2, 8, 128>}, {transform_indices = @transform_4, window_bounds = array<i64: 1, 2, 8, 1>}, {transform_indices = @transform_5, window_bounds = array<i64: 1, 2, 8, 1>}]} {
    %c0 = arith.constant 0 : index
    %c0_0 = arith.constant 0 : index
    %0 = vector.load %arg2[%c0, %c0_0] : memref<8x128xf32, #tpu.memory_space<vmem>>, vector<8x128xf32>
    %c0_1 = arith.constant 0 : index
    %c0_2 = arith.constant 0 : index
    %1 = vector.load %arg3[%c0_1, %c0_2] : memref<5x128xf32, #tpu.memory_space<vmem>>, vector<5x128xf32>
    %2 = vector.extract_strided_slice %1 {offsets = [0, 0], sizes = [1, 128], strides = [1, 1]} : vector<5x128xf32> to vector<1x128xf32>
    %3 = vector.extract_strided_slice %1 {offsets = [1, 0], sizes = [1, 128], strides = [1, 1]} : vector<5x128xf32> to vector<1x128xf32>
    %4 = vector.extract_strided_slice %1 {offsets = [2, 0], sizes = [1, 128], strides = [1, 1]} : vector<5x128xf32> to vector<1x128xf32>
    %5 = vector.extract_strided_slice %1 {offsets = [3, 0], sizes = [1, 128], strides = [1, 1]} : vector<5x128xf32> to vector<1x128xf32>
    %6 = vector.extract_strided_slice %1 {offsets = [4, 0], sizes = [1, 128], strides = [1, 1]} : vector<5x128xf32> to vector<1x128xf32>
    %c0_i32 = arith.constant 0 : i32
    %7 = arith.cmpi eq, %arg0, %c0_i32 : i32
    %8 = arith.extui %7 : i1 to i32
    %9 = arith.sitofp %8 : i32 to f32
    %c4_i32 = arith.constant 4 : i32
    %10 = tpu.dynamic_rotate %0 by %c4_i32 dim 1 : vector<8x128xf32>, i32 -> vector<8x128xf32>
    %11 = vector.broadcast %3 : vector<1x128xf32> to vector<8x128xf32>
    %12 = arith.mulf %11, %10 : vector<8x128xf32>
    %cst = arith.constant 1.000000e+00 : f32
    %13 = vector.broadcast %cst : f32 to vector<1x128xf32>
    %14 = arith.subf %13, %3 : vector<1x128xf32>
    %15 = vector.broadcast %14 : vector<1x128xf32> to vector<8x128xf32>
    %16 = arith.mulf %15, %0 : vector<8x128xf32>
    %17 = arith.addf %12, %16 : vector<8x128xf32>
    %18 = vector.broadcast %9 : f32 to vector<8x128xf32>
    %19 = arith.mulf %18, %17 : vector<8x128xf32>
    %cst_3 = arith.constant 1.000000e+00 : f32
    %20 = arith.subf %cst_3, %9 : f32
    %c124_i32 = arith.constant 124 : i32
    %21 = tpu.dynamic_rotate %0 by %c124_i32 dim 1 : vector<8x128xf32>, i32 -> vector<8x128xf32>
    %22 = vector.broadcast %4 : vector<1x128xf32> to vector<8x128xf32>
    %23 = arith.mulf %22, %21 : vector<8x128xf32>
    %cst_4 = arith.constant 1.000000e+00 : f32
    %24 = vector.broadcast %cst_4 : f32 to vector<1x128xf32>
    %25 = arith.subf %24, %4 : vector<1x128xf32>
    %26 = vector.broadcast %25 : vector<1x128xf32> to vector<8x128xf32>
    %27 = arith.mulf %26, %0 : vector<8x128xf32>
    %28 = arith.addf %23, %27 : vector<8x128xf32>
    %29 = vector.broadcast %20 : f32 to vector<8x128xf32>
    %30 = arith.mulf %29, %28 : vector<8x128xf32>
    %31 = arith.addf %19, %30 : vector<8x128xf32>
    %cst_5 = arith.constant 7.500000e-01 : f32
    %32 = vector.broadcast %cst_5 : f32 to vector<8x128xf32>
    %33 = arith.mulf %32, %0 : vector<8x128xf32>
    %cst_6 = arith.constant 2.500000e-01 : f32
    %34 = vector.broadcast %cst_6 : f32 to vector<8x128xf32>
    %35 = arith.mulf %34, %31 : vector<8x128xf32>
    %36 = arith.addf %33, %35 : vector<8x128xf32>
    %cst_7 = arith.constant 7.500000e-01 : f32
    %37 = vector.broadcast %cst_7 : f32 to vector<8x128xf32>
    %38 = arith.mulf %37, %36 : vector<8x128xf32>
    %c1_i32 = arith.constant 1 : i32
    %39 = tpu.dynamic_rotate %36 by %c1_i32 dim 1 : vector<8x128xf32>, i32 -> vector<8x128xf32>
    %40 = vector.broadcast %5 : vector<1x128xf32> to vector<8x128xf32>
    %41 = arith.mulf %40, %39 : vector<8x128xf32>
    %cst_8 = arith.constant 1.000000e+00 : f32
    %42 = vector.broadcast %cst_8 : f32 to vector<1x128xf32>
    %43 = arith.subf %42, %5 : vector<1x128xf32>
    %44 = vector.broadcast %43 : vector<1x128xf32> to vector<8x128xf32>
    %45 = arith.mulf %44, %36 : vector<8x128xf32>
    %46 = arith.addf %41, %45 : vector<8x128xf32>
    %cst_9 = arith.constant 2.500000e-01 : f32
    %47 = vector.broadcast %cst_9 : f32 to vector<8x128xf32>
    %48 = arith.mulf %47, %46 : vector<8x128xf32>
    %49 = arith.addf %38, %48 : vector<8x128xf32>
    %cst_10 = arith.constant 7.500000e-01 : f32
    %50 = vector.broadcast %cst_10 : f32 to vector<8x128xf32>
    %51 = arith.mulf %50, %36 : vector<8x128xf32>
    %c127_i32 = arith.constant 127 : i32
    %52 = tpu.dynamic_rotate %36 by %c127_i32 dim 1 : vector<8x128xf32>, i32 -> vector<8x128xf32>
    %53 = vector.broadcast %6 : vector<1x128xf32> to vector<8x128xf32>
    %54 = arith.mulf %53, %52 : vector<8x128xf32>
    %cst_11 = arith.constant 1.000000e+00 : f32
    %55 = vector.broadcast %cst_11 : f32 to vector<1x128xf32>
    %56 = arith.subf %55, %6 : vector<1x128xf32>
    %57 = vector.broadcast %56 : vector<1x128xf32> to vector<8x128xf32>
    %58 = arith.mulf %57, %36 : vector<8x128xf32>
    %59 = arith.addf %54, %58 : vector<8x128xf32>
    %cst_12 = arith.constant 2.500000e-01 : f32
    %60 = vector.broadcast %cst_12 : f32 to vector<8x128xf32>
    %61 = arith.mulf %60, %59 : vector<8x128xf32>
    %62 = arith.addf %51, %61 : vector<8x128xf32>
    %c0_13 = arith.constant 0 : index
    %c0_14 = arith.constant 0 : index
    %c0_15 = arith.constant 0 : index
    %c0_16 = arith.constant 0 : index
    %63 = vector.load %arg1[%c0_13, %c0_14, %c0_15, %c0_16] : memref<1x2x8x128xf32, #tpu.memory_space<vmem>>, vector<1x1x8x128xf32>
    %64 = vector.shape_cast %63 : vector<1x1x8x128xf32> to vector<8x128xf32>
    %65 = arith.addf %64, %49 : vector<8x128xf32>
    %66 = vector.broadcast %2 : vector<1x128xf32> to vector<8x128xf32>
    %67 = arith.mulf %65, %66 : vector<8x128xf32>
    %c0_17 = arith.constant 0 : index
    %c0_18 = arith.constant 0 : index
    %c0_19 = arith.constant 0 : index
    %c0_20 = arith.constant 0 : index
    %68 = vector.load %arg4[%c0_17, %c0_18, %c0_19, %c0_20] : memref<1x2x8x128xf32, #tpu.memory_space<vmem>>, vector<1x1x8x128xf32>
    %69 = vector.shape_cast %68 : vector<1x1x8x128xf32> to vector<8x128xf32>
    %70 = vector.shape_cast %67 : vector<8x128xf32> to vector<1x1x8x128xf32>
    tpu.vector_store %arg4[%c0_17, %c0_18, %c0_19, %c0_20], %70 {strides = array<i32>} : memref<1x2x8x128xf32, #tpu.memory_space<vmem>>, vector<1x1x8x128xf32>,
    %cst_21 = arith.constant dense<0.000000e+00> : vector<8xf32>
    %71 = vector.multi_reduction <add>, %67, %cst_21 [1] : vector<8x128xf32> to vector<8xf32>
    %72 = vector.shape_cast %71 : vector<8xf32> to vector<8x1xf32>
    %c0_22 = arith.constant 0 : index
    %c0_23 = arith.constant 0 : index
    %c0_24 = arith.constant 0 : index
    %c0_25 = arith.constant 0 : index
    %73 = vector.load %arg5[%c0_22, %c0_23, %c0_24, %c0_25] : memref<1x2x8x1xf32, #tpu.memory_space<vmem>>, vector<1x1x8x1xf32>
    %74 = vector.shape_cast %73 : vector<1x1x8x1xf32> to vector<8x1xf32>
    %75 = vector.shape_cast %72 : vector<8x1xf32> to vector<1x1x8x1xf32>
    tpu.vector_store %arg5[%c0_22, %c0_23, %c0_24, %c0_25], %75 {strides = array<i32>} : memref<1x2x8x1xf32, #tpu.memory_space<vmem>>, vector<1x1x8x1xf32>,
    %76 = arith.mulf %67, %67 : vector<8x128xf32>
    %cst_26 = arith.constant dense<0.000000e+00> : vector<8xf32>
    %77 = vector.multi_reduction <add>, %76, %cst_26 [1] : vector<8x128xf32> to vector<8xf32>
    %78 = vector.shape_cast %77 : vector<8xf32> to vector<8x1xf32>
    %c0_27 = arith.constant 0 : index
    %c0_28 = arith.constant 0 : index
    %c0_29 = arith.constant 0 : index
    %c0_30 = arith.constant 0 : index
    %79 = vector.load %arg6[%c0_27, %c0_28, %c0_29, %c0_30] : memref<1x2x8x1xf32, #tpu.memory_space<vmem>>, vector<1x1x8x1xf32>
    %80 = vector.shape_cast %79 : vector<1x1x8x1xf32> to vector<8x1xf32>
    %81 = vector.shape_cast %78 : vector<8x1xf32> to vector<1x1x8x1xf32>
    tpu.vector_store %arg6[%c0_27, %c0_28, %c0_29, %c0_30], %81 {strides = array<i32>} : memref<1x2x8x1xf32, #tpu.memory_space<vmem>>, vector<1x1x8x1xf32>,
    %c0_31 = arith.constant 0 : index
    %c1 = arith.constant 1 : index
    %c0_32 = arith.constant 0 : index
    %c0_33 = arith.constant 0 : index
    %82 = vector.load %arg1[%c0_31, %c1, %c0_32, %c0_33] : memref<1x2x8x128xf32, #tpu.memory_space<vmem>>, vector<1x1x8x128xf32>
    %83 = vector.shape_cast %82 : vector<1x1x8x128xf32> to vector<8x128xf32>
    %84 = arith.addf %83, %62 : vector<8x128xf32>
    %85 = vector.broadcast %2 : vector<1x128xf32> to vector<8x128xf32>
    %86 = arith.mulf %84, %85 : vector<8x128xf32>
    %c0_34 = arith.constant 0 : index
    %c1_35 = arith.constant 1 : index
    %c0_36 = arith.constant 0 : index
    %c0_37 = arith.constant 0 : index
    %87 = vector.load %arg4[%c0_34, %c1_35, %c0_36, %c0_37] : memref<1x2x8x128xf32, #tpu.memory_space<vmem>>, vector<1x1x8x128xf32>
    %88 = vector.shape_cast %87 : vector<1x1x8x128xf32> to vector<8x128xf32>
    %89 = vector.shape_cast %86 : vector<8x128xf32> to vector<1x1x8x128xf32>
    tpu.vector_store %arg4[%c0_34, %c1_35, %c0_36, %c0_37], %89 {strides = array<i32>} : memref<1x2x8x128xf32, #tpu.memory_space<vmem>>, vector<1x1x8x128xf32>,
    %cst_38 = arith.constant dense<0.000000e+00> : vector<8xf32>
    %90 = vector.multi_reduction <add>, %86, %cst_38 [1] : vector<8x128xf32> to vector<8xf32>
    %91 = vector.shape_cast %90 : vector<8xf32> to vector<8x1xf32>
    %c0_39 = arith.constant 0 : index
    %c1_40 = arith.constant 1 : index
    %c0_41 = arith.constant 0 : index
    %c0_42 = arith.constant 0 : index
    %92 = vector.load %arg5[%c0_39, %c1_40, %c0_41, %c0_42] : memref<1x2x8x1xf32, #tpu.memory_space<vmem>>, vector<1x1x8x1xf32>
    %93 = vector.shape_cast %92 : vector<1x1x8x1xf32> to vector<8x1xf32>
    %94 = vector.shape_cast %91 : vector<8x1xf32> to vector<1x1x8x1xf32>
    tpu.vector_store %arg5[%c0_39, %c1_40, %c0_41, %c0_42], %94 {strides = array<i32>} : memref<1x2x8x1xf32, #tpu.memory_space<vmem>>, vector<1x1x8x1xf32>,
    %95 = arith.mulf %86, %86 : vector<8x128xf32>
    %cst_43 = arith.constant dense<0.000000e+00> : vector<8xf32>
    %96 = vector.multi_reduction <add>, %95, %cst_43 [1] : vector<8x128xf32> to vector<8xf32>
    %97 = vector.shape_cast %96 : vector<8xf32> to vector<8x1xf32>
    %c0_44 = arith.constant 0 : index
    %c1_45 = arith.constant 1 : index
    %c0_46 = arith.constant 0 : index
    %c0_47 = arith.constant 0 : index
    %98 = vector.load %arg6[%c0_44, %c1_45, %c0_46, %c0_47] : memref<1x2x8x1xf32, #tpu.memory_space<vmem>>, vector<1x1x8x1xf32>
    %99 = vector.shape_cast %98 : vector<1x1x8x1xf32> to vector<8x1xf32>
    %100 = vector.shape_cast %97 : vector<8x1xf32> to vector<1x1x8x1xf32>
    tpu.vector_store %arg6[%c0_44, %c1_45, %c0_46, %c0_47], %100 {strides = array<i32>} : memref<1x2x8x1xf32, #tpu.memory_space<vmem>>, vector<1x1x8x1xf32>,
    return
  }
  func.func @transform_0(%arg0: i32) -> (i32, i32, i32, i32) {
    %c0_i32 = arith.constant 0 : i32
    %c0_i32_0 = arith.constant 0 : i32
    %c0_i32_1 = arith.constant 0 : i32
    %c0_i32_2 = arith.constant 0 : i32
    return %arg0, %c0_i32, %c0_i32_0, %c0_i32_1 : i32, i32, i32, i32
  }
  func.func @transform_1(%arg0: i32) -> (i32, i32) {
    %c0_i32 = arith.constant 0 : i32
    %c0_i32_0 = arith.constant 0 : i32
    %c0_i32_1 = arith.constant 0 : i32
    return %c0_i32, %c0_i32_0 : i32, i32
  }
  func.func @transform_2(%arg0: i32) -> (i32, i32) {
    %c0_i32 = arith.constant 0 : i32
    %c0_i32_0 = arith.constant 0 : i32
    %c0_i32_1 = arith.constant 0 : i32
    return %c0_i32, %c0_i32_0 : i32, i32
  }
  func.func @transform_3(%arg0: i32) -> (i32, i32, i32, i32) {
    %c0_i32 = arith.constant 0 : i32
    %c0_i32_0 = arith.constant 0 : i32
    %c0_i32_1 = arith.constant 0 : i32
    %c0_i32_2 = arith.constant 0 : i32
    return %arg0, %c0_i32, %c0_i32_0, %c0_i32_1 : i32, i32, i32, i32
  }
  func.func @transform_4(%arg0: i32) -> (i32, i32, i32, i32) {
    %c0_i32 = arith.constant 0 : i32
    %c0_i32_0 = arith.constant 0 : i32
    %c0_i32_1 = arith.constant 0 : i32
    %c0_i32_2 = arith.constant 0 : i32
    return %arg0, %c0_i32, %c0_i32_0, %c0_i32_1 : i32, i32, i32, i32
  }
  func.func @transform_5(%arg0: i32) -> (i32, i32, i32, i32) {
    %c0_i32 = arith.constant 0 : i32
    %c0_i32_0 = arith.constant 0 : i32
    %c0_i32_1 = arith.constant 0 : i32
    %c0_i32_2 = arith.constant 0 : i32
    return %arg0, %c0_i32, %c0_i32_0, %c0_i32_1 : i32, i32, i32, i32
  }
}

module attributes {stable_mosaic.version = 11 : i64} {
  func.func @_conv_kernel(%arg0: i32, %arg1: memref<1x16x128xf32, #tpu.memory_space<vmem>>, %arg2: memref<9x128xf32, #tpu.memory_space<vmem>>, %arg3: memref<1x9x8x16xbf16, #tpu.memory_space<vmem>>, %arg4: memref<1x8x1xf32, #tpu.memory_space<vmem>>, %arg5: memref<1x8x128xf32, #tpu.memory_space<vmem>>) attributes {dimension_semantics = [#tpu.dimension_semantics<parallel>], iteration_bounds = array<i64: 2>, scalar_prefetch = 0 : i64, scratch_operands = 0 : i64, tpu.core_type = #tpu.core_type<tc>, window_params = [{pipeline_mode = #tpu.pipeline_mode<synchronous>, transform_indices = @transform_0, window_bounds = array<i64: 1, 16, 128>}, {pipeline_mode = #tpu.pipeline_mode<synchronous>, transform_indices = @transform_1, window_bounds = array<i64: 9, 128>}, {transform_indices = @transform_2, window_bounds = array<i64: 1, 9, 8, 16>}, {transform_indices = @transform_3, window_bounds = array<i64: 1, 8, 1>}, {transform_indices = @transform_4, window_bounds = array<i64: 1, 8, 128>}]} {
    %c0 = arith.constant 0 : index
    %c0_0 = arith.constant 0 : index
    %c0_1 = arith.constant 0 : index
    %0 = vector.load %arg1[%c0, %c0_0, %c0_1] : memref<1x16x128xf32, #tpu.memory_space<vmem>>, vector<1x16x128xf32>
    %cst = arith.constant 0.000000e+00 : f32
    %1 = vector.broadcast %cst : f32 to vector<1x16x128xf32>
    %2 = arith.cmpf ogt, %0, %1 : vector<1x16x128xf32>
    %cst_2 = arith.constant 0.00999999977 : f32
    %3 = vector.broadcast %cst_2 : f32 to vector<1x16x128xf32>
    %4 = arith.mulf %3, %0 : vector<1x16x128xf32>
    %5 = arith.select %2, %0, %4 : vector<1x16x128xi1>, vector<1x16x128xf32>
    %c0_3 = arith.constant 0 : index
    %c0_4 = arith.constant 0 : index
    %6 = vector.load %arg2[%c0_3, %c0_4] : memref<9x128xf32, #tpu.memory_space<vmem>>, vector<9x128xf32>
    %c0_5 = arith.constant 0 : index
    %c0_6 = arith.constant 0 : index
    %c0_7 = arith.constant 0 : index
    %c0_8 = arith.constant 0 : index
    %7 = vector.load %arg3[%c0_5, %c0_6, %c0_7, %c0_8] : memref<1x9x8x16xbf16, #tpu.memory_space<vmem>>, vector<1x9x8x16xbf16>
    %8 = vector.shape_cast %7 : vector<1x9x8x16xbf16> to vector<9x8x16xbf16>
    %cst_9 = arith.constant 0.000000e+00 : f32
    %9 = vector.broadcast %cst_9 : f32 to vector<8x128xf32>
    %10 = vector.shape_cast %5 : vector<1x16x128xf32> to vector<16x128xf32>
    %c9_i32 = arith.constant 9 : i32
    %11 = tpu.dynamic_rotate %10 by %c9_i32 dim 1 : vector<16x128xf32>, i32 -> vector<16x128xf32>
    %12 = vector.extract_strided_slice %6 {offsets = [0, 0], sizes = [1, 128], strides = [1, 1]} : vector<9x128xf32> to vector<1x128xf32>
    %13 = vector.broadcast %12 : vector<1x128xf32> to vector<16x128xf32>
    %14 = arith.mulf %11, %13 : vector<16x128xf32>
    %15 = vector.extract_strided_slice %8 {offsets = [0, 0, 0], sizes = [1, 8, 16], strides = [1, 1, 1]} : vector<9x8x16xbf16> to vector<1x8x16xbf16>
    %16 = vector.shape_cast %15 : vector<1x8x16xbf16> to vector<8x16xbf16>
    %17 = arith.truncf %14 : vector<16x128xf32> to vector<16x128xbf16>
    %cst_10 = arith.constant dense<0.000000e+00> : vector<8x128xf32>
    %18 = tpu.matmul %16, %17, %cst_10 {dimension_numbers = #tpu.dot_dimension_numbers<[1], [0], [0], [1], [0, 0, 1, 1], [], []>} : vector<8x16xbf16>, vector<16x128xbf16>, vector<8x128xf32> -> vector<8x128xf32>
    %19 = arith.addf %9, %18 : vector<8x128xf32>
    %20 = vector.shape_cast %5 : vector<1x16x128xf32> to vector<16x128xf32>
    %c8_i32 = arith.constant 8 : i32
    %21 = tpu.dynamic_rotate %20 by %c8_i32 dim 1 : vector<16x128xf32>, i32 -> vector<16x128xf32>
    %22 = vector.extract_strided_slice %6 {offsets = [1, 0], sizes = [1, 128], strides = [1, 1]} : vector<9x128xf32> to vector<1x128xf32>
    %23 = vector.broadcast %22 : vector<1x128xf32> to vector<16x128xf32>
    %24 = arith.mulf %21, %23 : vector<16x128xf32>
    %25 = vector.extract_strided_slice %8 {offsets = [1, 0, 0], sizes = [1, 8, 16], strides = [1, 1, 1]} : vector<9x8x16xbf16> to vector<1x8x16xbf16>
    %26 = vector.shape_cast %25 : vector<1x8x16xbf16> to vector<8x16xbf16>
    %27 = arith.truncf %24 : vector<16x128xf32> to vector<16x128xbf16>
    %cst_11 = arith.constant dense<0.000000e+00> : vector<8x128xf32>
    %28 = tpu.matmul %26, %27, %cst_11 {dimension_numbers = #tpu.dot_dimension_numbers<[1], [0], [0], [1], [0, 0, 1, 1], [], []>} : vector<8x16xbf16>, vector<16x128xbf16>, vector<8x128xf32> -> vector<8x128xf32>
    %29 = arith.addf %19, %28 : vector<8x128xf32>
    %30 = vector.shape_cast %5 : vector<1x16x128xf32> to vector<16x128xf32>
    %c7_i32 = arith.constant 7 : i32
    %31 = tpu.dynamic_rotate %30 by %c7_i32 dim 1 : vector<16x128xf32>, i32 -> vector<16x128xf32>
    %32 = vector.extract_strided_slice %6 {offsets = [2, 0], sizes = [1, 128], strides = [1, 1]} : vector<9x128xf32> to vector<1x128xf32>
    %33 = vector.broadcast %32 : vector<1x128xf32> to vector<16x128xf32>
    %34 = arith.mulf %31, %33 : vector<16x128xf32>
    %35 = vector.extract_strided_slice %8 {offsets = [2, 0, 0], sizes = [1, 8, 16], strides = [1, 1, 1]} : vector<9x8x16xbf16> to vector<1x8x16xbf16>
    %36 = vector.shape_cast %35 : vector<1x8x16xbf16> to vector<8x16xbf16>
    %37 = arith.truncf %34 : vector<16x128xf32> to vector<16x128xbf16>
    %cst_12 = arith.constant dense<0.000000e+00> : vector<8x128xf32>
    %38 = tpu.matmul %36, %37, %cst_12 {dimension_numbers = #tpu.dot_dimension_numbers<[1], [0], [0], [1], [0, 0, 1, 1], [], []>} : vector<8x16xbf16>, vector<16x128xbf16>, vector<8x128xf32> -> vector<8x128xf32>
    %39 = arith.addf %29, %38 : vector<8x128xf32>
    %40 = vector.shape_cast %5 : vector<1x16x128xf32> to vector<16x128xf32>
    %c1_i32 = arith.constant 1 : i32
    %41 = tpu.dynamic_rotate %40 by %c1_i32 dim 1 : vector<16x128xf32>, i32 -> vector<16x128xf32>
    %42 = vector.extract_strided_slice %6 {offsets = [3, 0], sizes = [1, 128], strides = [1, 1]} : vector<9x128xf32> to vector<1x128xf32>
    %43 = vector.broadcast %42 : vector<1x128xf32> to vector<16x128xf32>
    %44 = arith.mulf %41, %43 : vector<16x128xf32>
    %45 = vector.extract_strided_slice %8 {offsets = [3, 0, 0], sizes = [1, 8, 16], strides = [1, 1, 1]} : vector<9x8x16xbf16> to vector<1x8x16xbf16>
    %46 = vector.shape_cast %45 : vector<1x8x16xbf16> to vector<8x16xbf16>
    %47 = arith.truncf %44 : vector<16x128xf32> to vector<16x128xbf16>
    %cst_13 = arith.constant dense<0.000000e+00> : vector<8x128xf32>
    %48 = tpu.matmul %46, %47, %cst_13 {dimension_numbers = #tpu.dot_dimension_numbers<[1], [0], [0], [1], [0, 0, 1, 1], [], []>} : vector<8x16xbf16>, vector<16x128xbf16>, vector<8x128xf32> -> vector<8x128xf32>
    %49 = arith.addf %39, %48 : vector<8x128xf32>
    %50 = vector.shape_cast %5 : vector<1x16x128xf32> to vector<16x128xf32>
    %51 = vector.extract_strided_slice %6 {offsets = [4, 0], sizes = [1, 128], strides = [1, 1]} : vector<9x128xf32> to vector<1x128xf32>
    %52 = vector.broadcast %51 : vector<1x128xf32> to vector<16x128xf32>
    %53 = arith.mulf %50, %52 : vector<16x128xf32>
    %54 = vector.extract_strided_slice %8 {offsets = [4, 0, 0], sizes = [1, 8, 16], strides = [1, 1, 1]} : vector<9x8x16xbf16> to vector<1x8x16xbf16>
    %55 = vector.shape_cast %54 : vector<1x8x16xbf16> to vector<8x16xbf16>
    %56 = arith.truncf %53 : vector<16x128xf32> to vector<16x128xbf16>
    %cst_14 = arith.constant dense<0.000000e+00> : vector<8x128xf32>
    %57 = tpu.matmul %55, %56, %cst_14 {dimension_numbers = #tpu.dot_dimension_numbers<[1], [0], [0], [1], [0, 0, 1, 1], [], []>} : vector<8x16xbf16>, vector<16x128xbf16>, vector<8x128xf32> -> vector<8x128xf32>
    %58 = arith.addf %49, %57 : vector<8x128xf32>
    %59 = vector.shape_cast %5 : vector<1x16x128xf32> to vector<16x128xf32>
    %c127_i32 = arith.constant 127 : i32
    %60 = tpu.dynamic_rotate %59 by %c127_i32 dim 1 : vector<16x128xf32>, i32 -> vector<16x128xf32>
    %61 = vector.extract_strided_slice %6 {offsets = [5, 0], sizes = [1, 128], strides = [1, 1]} : vector<9x128xf32> to vector<1x128xf32>
    %62 = vector.broadcast %61 : vector<1x128xf32> to vector<16x128xf32>
    %63 = arith.mulf %60, %62 : vector<16x128xf32>
    %64 = vector.extract_strided_slice %8 {offsets = [5, 0, 0], sizes = [1, 8, 16], strides = [1, 1, 1]} : vector<9x8x16xbf16> to vector<1x8x16xbf16>
    %65 = vector.shape_cast %64 : vector<1x8x16xbf16> to vector<8x16xbf16>
    %66 = arith.truncf %63 : vector<16x128xf32> to vector<16x128xbf16>
    %cst_15 = arith.constant dense<0.000000e+00> : vector<8x128xf32>
    %67 = tpu.matmul %65, %66, %cst_15 {dimension_numbers = #tpu.dot_dimension_numbers<[1], [0], [0], [1], [0, 0, 1, 1], [], []>} : vector<8x16xbf16>, vector<16x128xbf16>, vector<8x128xf32> -> vector<8x128xf32>
    %68 = arith.addf %58, %67 : vector<8x128xf32>
    %69 = vector.shape_cast %5 : vector<1x16x128xf32> to vector<16x128xf32>
    %c121_i32 = arith.constant 121 : i32
    %70 = tpu.dynamic_rotate %69 by %c121_i32 dim 1 : vector<16x128xf32>, i32 -> vector<16x128xf32>
    %71 = vector.extract_strided_slice %6 {offsets = [6, 0], sizes = [1, 128], strides = [1, 1]} : vector<9x128xf32> to vector<1x128xf32>
    %72 = vector.broadcast %71 : vector<1x128xf32> to vector<16x128xf32>
    %73 = arith.mulf %70, %72 : vector<16x128xf32>
    %74 = vector.extract_strided_slice %8 {offsets = [6, 0, 0], sizes = [1, 8, 16], strides = [1, 1, 1]} : vector<9x8x16xbf16> to vector<1x8x16xbf16>
    %75 = vector.shape_cast %74 : vector<1x8x16xbf16> to vector<8x16xbf16>
    %76 = arith.truncf %73 : vector<16x128xf32> to vector<16x128xbf16>
    %cst_16 = arith.constant dense<0.000000e+00> : vector<8x128xf32>
    %77 = tpu.matmul %75, %76, %cst_16 {dimension_numbers = #tpu.dot_dimension_numbers<[1], [0], [0], [1], [0, 0, 1, 1], [], []>} : vector<8x16xbf16>, vector<16x128xbf16>, vector<8x128xf32> -> vector<8x128xf32>
    %78 = arith.addf %68, %77 : vector<8x128xf32>
    %79 = vector.shape_cast %5 : vector<1x16x128xf32> to vector<16x128xf32>
    %c120_i32 = arith.constant 120 : i32
    %80 = tpu.dynamic_rotate %79 by %c120_i32 dim 1 : vector<16x128xf32>, i32 -> vector<16x128xf32>
    %81 = vector.extract_strided_slice %6 {offsets = [7, 0], sizes = [1, 128], strides = [1, 1]} : vector<9x128xf32> to vector<1x128xf32>
    %82 = vector.broadcast %81 : vector<1x128xf32> to vector<16x128xf32>
    %83 = arith.mulf %80, %82 : vector<16x128xf32>
    %84 = vector.extract_strided_slice %8 {offsets = [7, 0, 0], sizes = [1, 8, 16], strides = [1, 1, 1]} : vector<9x8x16xbf16> to vector<1x8x16xbf16>
    %85 = vector.shape_cast %84 : vector<1x8x16xbf16> to vector<8x16xbf16>
    %86 = arith.truncf %83 : vector<16x128xf32> to vector<16x128xbf16>
    %cst_17 = arith.constant dense<0.000000e+00> : vector<8x128xf32>
    %87 = tpu.matmul %85, %86, %cst_17 {dimension_numbers = #tpu.dot_dimension_numbers<[1], [0], [0], [1], [0, 0, 1, 1], [], []>} : vector<8x16xbf16>, vector<16x128xbf16>, vector<8x128xf32> -> vector<8x128xf32>
    %88 = arith.addf %78, %87 : vector<8x128xf32>
    %89 = vector.shape_cast %5 : vector<1x16x128xf32> to vector<16x128xf32>
    %c119_i32 = arith.constant 119 : i32
    %90 = tpu.dynamic_rotate %89 by %c119_i32 dim 1 : vector<16x128xf32>, i32 -> vector<16x128xf32>
    %91 = vector.extract_strided_slice %6 {offsets = [8, 0], sizes = [1, 128], strides = [1, 1]} : vector<9x128xf32> to vector<1x128xf32>
    %92 = vector.broadcast %91 : vector<1x128xf32> to vector<16x128xf32>
    %93 = arith.mulf %90, %92 : vector<16x128xf32>
    %94 = vector.extract_strided_slice %8 {offsets = [8, 0, 0], sizes = [1, 8, 16], strides = [1, 1, 1]} : vector<9x8x16xbf16> to vector<1x8x16xbf16>
    %95 = vector.shape_cast %94 : vector<1x8x16xbf16> to vector<8x16xbf16>
    %96 = arith.truncf %93 : vector<16x128xf32> to vector<16x128xbf16>
    %cst_18 = arith.constant dense<0.000000e+00> : vector<8x128xf32>
    %97 = tpu.matmul %95, %96, %cst_18 {dimension_numbers = #tpu.dot_dimension_numbers<[1], [0], [0], [1], [0, 0, 1, 1], [], []>} : vector<8x16xbf16>, vector<16x128xbf16>, vector<8x128xf32> -> vector<8x128xf32>
    %98 = arith.addf %88, %97 : vector<8x128xf32>
    %c0_19 = arith.constant 0 : index
    %c0_20 = arith.constant 0 : index
    %c0_21 = arith.constant 0 : index
    %99 = vector.load %arg4[%c0_19, %c0_20, %c0_21] : memref<1x8x1xf32, #tpu.memory_space<vmem>>, vector<1x8x1xf32>
    %100 = vector.shape_cast %99 : vector<1x8x1xf32> to vector<8x1xf32>
    %101 = vector.broadcast %100 : vector<8x1xf32> to vector<8x128xf32>
    %102 = arith.addf %98, %101 : vector<8x128xf32>
    %c0_22 = arith.constant 0 : index
    %c0_23 = arith.constant 0 : index
    %c0_24 = arith.constant 0 : index
    %103 = vector.load %arg5[%c0_22, %c0_23, %c0_24] : memref<1x8x128xf32, #tpu.memory_space<vmem>>, vector<1x8x128xf32>
    %104 = vector.shape_cast %103 : vector<1x8x128xf32> to vector<8x128xf32>
    %105 = vector.shape_cast %102 : vector<8x128xf32> to vector<1x8x128xf32>
    tpu.vector_store %arg5[%c0_22, %c0_23, %c0_24], %105 {strides = array<i32>} : memref<1x8x128xf32, #tpu.memory_space<vmem>>, vector<1x8x128xf32>,
    return
  }
  func.func @transform_0(%arg0: i32) -> (i32, i32, i32) {
    %c0_i32 = arith.constant 0 : i32
    %c0_i32_0 = arith.constant 0 : i32
    %c0_i32_1 = arith.constant 0 : i32
    %c0_i32_2 = arith.constant 0 : i32
    return %c0_i32, %c0_i32_0, %c0_i32_1 : i32, i32, i32
  }
  func.func @transform_1(%arg0: i32) -> (i32, i32) {
    %c0_i32 = arith.constant 0 : i32
    %c0_i32_0 = arith.constant 0 : i32
    %c0_i32_1 = arith.constant 0 : i32
    return %c0_i32, %c0_i32_0 : i32, i32
  }
  func.func @transform_2(%arg0: i32) -> (i32, i32, i32, i32) {
    %c0_i32 = arith.constant 0 : i32
    %c0_i32_0 = arith.constant 0 : i32
    %c0_i32_1 = arith.constant 0 : i32
    %c0_i32_2 = arith.constant 0 : i32
    return %arg0, %c0_i32, %c0_i32_0, %c0_i32_1 : i32, i32, i32, i32
  }
  func.func @transform_3(%arg0: i32) -> (i32, i32, i32) {
    %c0_i32 = arith.constant 0 : i32
    %c0_i32_0 = arith.constant 0 : i32
    %c0_i32_1 = arith.constant 0 : i32
    return %arg0, %c0_i32, %c0_i32_0 : i32, i32, i32
  }
  func.func @transform_4(%arg0: i32) -> (i32, i32, i32) {
    %c0_i32 = arith.constant 0 : i32
    %c0_i32_0 = arith.constant 0 : i32
    %c0_i32_1 = arith.constant 0 : i32
    return %arg0, %c0_i32, %c0_i32_0 : i32, i32, i32
  }
}

module attributes {stable_mosaic.version = 11 : i64} {
  func.func @_upsample_add_kernel(%arg0: i32, %arg1: memref<1x2x4x128xf32, #tpu.memory_space<vmem>>, %arg2: memref<4x128xf32, #tpu.memory_space<vmem>>, %arg3: memref<5x128xf32, #tpu.memory_space<vmem>>, %arg4: memref<1x2x4x128xf32, #tpu.memory_space<vmem>>, %arg5: memref<1x2x4x1xf32, #tpu.memory_space<vmem>>, %arg6: memref<1x2x4x1xf32, #tpu.memory_space<vmem>>) attributes {dimension_semantics = [#tpu.dimension_semantics<parallel>], iteration_bounds = array<i64: 2>, scalar_prefetch = 0 : i64, scratch_operands = 0 : i64, tpu.core_type = #tpu.core_type<tc>, window_params = [{transform_indices = @transform_0, window_bounds = array<i64: 1, 2, 4, 128>}, {pipeline_mode = #tpu.pipeline_mode<synchronous>, transform_indices = @transform_1, window_bounds = array<i64: 4, 128>}, {pipeline_mode = #tpu.pipeline_mode<synchronous>, transform_indices = @transform_2, window_bounds = array<i64: 5, 128>}, {transform_indices = @transform_3, window_bounds = array<i64: 1, 2, 4, 128>}, {transform_indices = @transform_4, window_bounds = array<i64: 1, 2, 4, 1>}, {transform_indices = @transform_5, window_bounds = array<i64: 1, 2, 4, 1>}]} {
    %c0 = arith.constant 0 : index
    %c0_0 = arith.constant 0 : index
    %0 = vector.load %arg2[%c0, %c0_0] : memref<4x128xf32, #tpu.memory_space<vmem>>, vector<4x128xf32>
    %c0_1 = arith.constant 0 : index
    %c0_2 = arith.constant 0 : index
    %1 = vector.load %arg3[%c0_1, %c0_2] : memref<5x128xf32, #tpu.memory_space<vmem>>, vector<5x128xf32>
    %2 = vector.extract_strided_slice %1 {offsets = [0, 0], sizes = [1, 128], strides = [1, 1]} : vector<5x128xf32> to vector<1x128xf32>
    %3 = vector.extract_strided_slice %1 {offsets = [1, 0], sizes = [1, 128], strides = [1, 1]} : vector<5x128xf32> to vector<1x128xf32>
    %4 = vector.extract_strided_slice %1 {offsets = [2, 0], sizes = [1, 128], strides = [1, 1]} : vector<5x128xf32> to vector<1x128xf32>
    %5 = vector.extract_strided_slice %1 {offsets = [3, 0], sizes = [1, 128], strides = [1, 1]} : vector<5x128xf32> to vector<1x128xf32>
    %6 = vector.extract_strided_slice %1 {offsets = [4, 0], sizes = [1, 128], strides = [1, 1]} : vector<5x128xf32> to vector<1x128xf32>
    %c0_i32 = arith.constant 0 : i32
    %7 = arith.cmpi eq, %arg0, %c0_i32 : i32
    %8 = arith.extui %7 : i1 to i32
    %9 = arith.sitofp %8 : i32 to f32
    %c8_i32 = arith.constant 8 : i32
    %10 = tpu.dynamic_rotate %0 by %c8_i32 dim 1 : vector<4x128xf32>, i32 -> vector<4x128xf32>
    %11 = vector.broadcast %3 : vector<1x128xf32> to vector<4x128xf32>
    %12 = arith.mulf %11, %10 : vector<4x128xf32>
    %cst = arith.constant 1.000000e+00 : f32
    %13 = vector.broadcast %cst : f32 to vector<1x128xf32>
    %14 = arith.subf %13, %3 : vector<1x128xf32>
    %15 = vector.broadcast %14 : vector<1x128xf32> to vector<4x128xf32>
    %16 = arith.mulf %15, %0 : vector<4x128xf32>
    %17 = arith.addf %12, %16 : vector<4x128xf32>
    %18 = vector.broadcast %9 : f32 to vector<4x128xf32>
    %19 = arith.mulf %18, %17 : vector<4x128xf32>
    %cst_3 = arith.constant 1.000000e+00 : f32
    %20 = arith.subf %cst_3, %9 : f32
    %c120_i32 = arith.constant 120 : i32
    %21 = tpu.dynamic_rotate %0 by %c120_i32 dim 1 : vector<4x128xf32>, i32 -> vector<4x128xf32>
    %22 = vector.broadcast %4 : vector<1x128xf32> to vector<4x128xf32>
    %23 = arith.mulf %22, %21 : vector<4x128xf32>
    %cst_4 = arith.constant 1.000000e+00 : f32
    %24 = vector.broadcast %cst_4 : f32 to vector<1x128xf32>
    %25 = arith.subf %24, %4 : vector<1x128xf32>
    %26 = vector.broadcast %25 : vector<1x128xf32> to vector<4x128xf32>
    %27 = arith.mulf %26, %0 : vector<4x128xf32>
    %28 = arith.addf %23, %27 : vector<4x128xf32>
    %29 = vector.broadcast %20 : f32 to vector<4x128xf32>
    %30 = arith.mulf %29, %28 : vector<4x128xf32>
    %31 = arith.addf %19, %30 : vector<4x128xf32>
    %cst_5 = arith.constant 7.500000e-01 : f32
    %32 = vector.broadcast %cst_5 : f32 to vector<4x128xf32>
    %33 = arith.mulf %32, %0 : vector<4x128xf32>
    %cst_6 = arith.constant 2.500000e-01 : f32
    %34 = vector.broadcast %cst_6 : f32 to vector<4x128xf32>
    %35 = arith.mulf %34, %31 : vector<4x128xf32>
    %36 = arith.addf %33, %35 : vector<4x128xf32>
    %cst_7 = arith.constant 7.500000e-01 : f32
    %37 = vector.broadcast %cst_7 : f32 to vector<4x128xf32>
    %38 = arith.mulf %37, %36 : vector<4x128xf32>
    %c1_i32 = arith.constant 1 : i32
    %39 = tpu.dynamic_rotate %36 by %c1_i32 dim 1 : vector<4x128xf32>, i32 -> vector<4x128xf32>
    %40 = vector.broadcast %5 : vector<1x128xf32> to vector<4x128xf32>
    %41 = arith.mulf %40, %39 : vector<4x128xf32>
    %cst_8 = arith.constant 1.000000e+00 : f32
    %42 = vector.broadcast %cst_8 : f32 to vector<1x128xf32>
    %43 = arith.subf %42, %5 : vector<1x128xf32>
    %44 = vector.broadcast %43 : vector<1x128xf32> to vector<4x128xf32>
    %45 = arith.mulf %44, %36 : vector<4x128xf32>
    %46 = arith.addf %41, %45 : vector<4x128xf32>
    %cst_9 = arith.constant 2.500000e-01 : f32
    %47 = vector.broadcast %cst_9 : f32 to vector<4x128xf32>
    %48 = arith.mulf %47, %46 : vector<4x128xf32>
    %49 = arith.addf %38, %48 : vector<4x128xf32>
    %cst_10 = arith.constant 7.500000e-01 : f32
    %50 = vector.broadcast %cst_10 : f32 to vector<4x128xf32>
    %51 = arith.mulf %50, %36 : vector<4x128xf32>
    %c127_i32 = arith.constant 127 : i32
    %52 = tpu.dynamic_rotate %36 by %c127_i32 dim 1 : vector<4x128xf32>, i32 -> vector<4x128xf32>
    %53 = vector.broadcast %6 : vector<1x128xf32> to vector<4x128xf32>
    %54 = arith.mulf %53, %52 : vector<4x128xf32>
    %cst_11 = arith.constant 1.000000e+00 : f32
    %55 = vector.broadcast %cst_11 : f32 to vector<1x128xf32>
    %56 = arith.subf %55, %6 : vector<1x128xf32>
    %57 = vector.broadcast %56 : vector<1x128xf32> to vector<4x128xf32>
    %58 = arith.mulf %57, %36 : vector<4x128xf32>
    %59 = arith.addf %54, %58 : vector<4x128xf32>
    %cst_12 = arith.constant 2.500000e-01 : f32
    %60 = vector.broadcast %cst_12 : f32 to vector<4x128xf32>
    %61 = arith.mulf %60, %59 : vector<4x128xf32>
    %62 = arith.addf %51, %61 : vector<4x128xf32>
    %c0_13 = arith.constant 0 : index
    %c0_14 = arith.constant 0 : index
    %c0_15 = arith.constant 0 : index
    %c0_16 = arith.constant 0 : index
    %63 = vector.load %arg1[%c0_13, %c0_14, %c0_15, %c0_16] : memref<1x2x4x128xf32, #tpu.memory_space<vmem>>, vector<1x1x4x128xf32>
    %64 = vector.shape_cast %63 : vector<1x1x4x128xf32> to vector<4x128xf32>
    %65 = arith.addf %64, %49 : vector<4x128xf32>
    %66 = vector.broadcast %2 : vector<1x128xf32> to vector<4x128xf32>
    %67 = arith.mulf %65, %66 : vector<4x128xf32>
    %c0_17 = arith.constant 0 : index
    %c0_18 = arith.constant 0 : index
    %c0_19 = arith.constant 0 : index
    %c0_20 = arith.constant 0 : index
    %68 = vector.load %arg4[%c0_17, %c0_18, %c0_19, %c0_20] : memref<1x2x4x128xf32, #tpu.memory_space<vmem>>, vector<1x1x4x128xf32>
    %69 = vector.shape_cast %68 : vector<1x1x4x128xf32> to vector<4x128xf32>
    %70 = vector.shape_cast %67 : vector<4x128xf32> to vector<1x1x4x128xf32>
    tpu.vector_store %arg4[%c0_17, %c0_18, %c0_19, %c0_20], %70 {strides = array<i32>} : memref<1x2x4x128xf32, #tpu.memory_space<vmem>>, vector<1x1x4x128xf32>,
    %cst_21 = arith.constant dense<0.000000e+00> : vector<4xf32>
    %71 = vector.multi_reduction <add>, %67, %cst_21 [1] : vector<4x128xf32> to vector<4xf32>
    %72 = vector.shape_cast %71 : vector<4xf32> to vector<4x1xf32>
    %c0_22 = arith.constant 0 : index
    %c0_23 = arith.constant 0 : index
    %c0_24 = arith.constant 0 : index
    %c0_25 = arith.constant 0 : index
    %73 = vector.load %arg5[%c0_22, %c0_23, %c0_24, %c0_25] : memref<1x2x4x1xf32, #tpu.memory_space<vmem>>, vector<1x1x4x1xf32>
    %74 = vector.shape_cast %73 : vector<1x1x4x1xf32> to vector<4x1xf32>
    %75 = vector.shape_cast %72 : vector<4x1xf32> to vector<1x1x4x1xf32>
    tpu.vector_store %arg5[%c0_22, %c0_23, %c0_24, %c0_25], %75 {strides = array<i32>} : memref<1x2x4x1xf32, #tpu.memory_space<vmem>>, vector<1x1x4x1xf32>,
    %76 = arith.mulf %67, %67 : vector<4x128xf32>
    %cst_26 = arith.constant dense<0.000000e+00> : vector<4xf32>
    %77 = vector.multi_reduction <add>, %76, %cst_26 [1] : vector<4x128xf32> to vector<4xf32>
    %78 = vector.shape_cast %77 : vector<4xf32> to vector<4x1xf32>
    %c0_27 = arith.constant 0 : index
    %c0_28 = arith.constant 0 : index
    %c0_29 = arith.constant 0 : index
    %c0_30 = arith.constant 0 : index
    %79 = vector.load %arg6[%c0_27, %c0_28, %c0_29, %c0_30] : memref<1x2x4x1xf32, #tpu.memory_space<vmem>>, vector<1x1x4x1xf32>
    %80 = vector.shape_cast %79 : vector<1x1x4x1xf32> to vector<4x1xf32>
    %81 = vector.shape_cast %78 : vector<4x1xf32> to vector<1x1x4x1xf32>
    tpu.vector_store %arg6[%c0_27, %c0_28, %c0_29, %c0_30], %81 {strides = array<i32>} : memref<1x2x4x1xf32, #tpu.memory_space<vmem>>, vector<1x1x4x1xf32>,
    %c0_31 = arith.constant 0 : index
    %c1 = arith.constant 1 : index
    %c0_32 = arith.constant 0 : index
    %c0_33 = arith.constant 0 : index
    %82 = vector.load %arg1[%c0_31, %c1, %c0_32, %c0_33] : memref<1x2x4x128xf32, #tpu.memory_space<vmem>>, vector<1x1x4x128xf32>
    %83 = vector.shape_cast %82 : vector<1x1x4x128xf32> to vector<4x128xf32>
    %84 = arith.addf %83, %62 : vector<4x128xf32>
    %85 = vector.broadcast %2 : vector<1x128xf32> to vector<4x128xf32>
    %86 = arith.mulf %84, %85 : vector<4x128xf32>
    %c0_34 = arith.constant 0 : index
    %c1_35 = arith.constant 1 : index
    %c0_36 = arith.constant 0 : index
    %c0_37 = arith.constant 0 : index
    %87 = vector.load %arg4[%c0_34, %c1_35, %c0_36, %c0_37] : memref<1x2x4x128xf32, #tpu.memory_space<vmem>>, vector<1x1x4x128xf32>
    %88 = vector.shape_cast %87 : vector<1x1x4x128xf32> to vector<4x128xf32>
    %89 = vector.shape_cast %86 : vector<4x128xf32> to vector<1x1x4x128xf32>
    tpu.vector_store %arg4[%c0_34, %c1_35, %c0_36, %c0_37], %89 {strides = array<i32>} : memref<1x2x4x128xf32, #tpu.memory_space<vmem>>, vector<1x1x4x128xf32>,
    %cst_38 = arith.constant dense<0.000000e+00> : vector<4xf32>
    %90 = vector.multi_reduction <add>, %86, %cst_38 [1] : vector<4x128xf32> to vector<4xf32>
    %91 = vector.shape_cast %90 : vector<4xf32> to vector<4x1xf32>
    %c0_39 = arith.constant 0 : index
    %c1_40 = arith.constant 1 : index
    %c0_41 = arith.constant 0 : index
    %c0_42 = arith.constant 0 : index
    %92 = vector.load %arg5[%c0_39, %c1_40, %c0_41, %c0_42] : memref<1x2x4x1xf32, #tpu.memory_space<vmem>>, vector<1x1x4x1xf32>
    %93 = vector.shape_cast %92 : vector<1x1x4x1xf32> to vector<4x1xf32>
    %94 = vector.shape_cast %91 : vector<4x1xf32> to vector<1x1x4x1xf32>
    tpu.vector_store %arg5[%c0_39, %c1_40, %c0_41, %c0_42], %94 {strides = array<i32>} : memref<1x2x4x1xf32, #tpu.memory_space<vmem>>, vector<1x1x4x1xf32>,
    %95 = arith.mulf %86, %86 : vector<4x128xf32>
    %cst_43 = arith.constant dense<0.000000e+00> : vector<4xf32>
    %96 = vector.multi_reduction <add>, %95, %cst_43 [1] : vector<4x128xf32> to vector<4xf32>
    %97 = vector.shape_cast %96 : vector<4xf32> to vector<4x1xf32>
    %c0_44 = arith.constant 0 : index
    %c1_45 = arith.constant 1 : index
    %c0_46 = arith.constant 0 : index
    %c0_47 = arith.constant 0 : index
    %98 = vector.load %arg6[%c0_44, %c1_45, %c0_46, %c0_47] : memref<1x2x4x1xf32, #tpu.memory_space<vmem>>, vector<1x1x4x1xf32>
    %99 = vector.shape_cast %98 : vector<1x1x4x1xf32> to vector<4x1xf32>
    %100 = vector.shape_cast %97 : vector<4x1xf32> to vector<1x1x4x1xf32>
    tpu.vector_store %arg6[%c0_44, %c1_45, %c0_46, %c0_47], %100 {strides = array<i32>} : memref<1x2x4x1xf32, #tpu.memory_space<vmem>>, vector<1x1x4x1xf32>,
    return
  }
  func.func @transform_0(%arg0: i32) -> (i32, i32, i32, i32) {
    %c0_i32 = arith.constant 0 : i32
    %c0_i32_0 = arith.constant 0 : i32
    %c0_i32_1 = arith.constant 0 : i32
    %c0_i32_2 = arith.constant 0 : i32
    return %arg0, %c0_i32, %c0_i32_0, %c0_i32_1 : i32, i32, i32, i32
  }
  func.func @transform_1(%arg0: i32) -> (i32, i32) {
    %c0_i32 = arith.constant 0 : i32
    %c0_i32_0 = arith.constant 0 : i32
    %c0_i32_1 = arith.constant 0 : i32
    return %c0_i32, %c0_i32_0 : i32, i32
  }
  func.func @transform_2(%arg0: i32) -> (i32, i32) {
    %c0_i32 = arith.constant 0 : i32
    %c0_i32_0 = arith.constant 0 : i32
    %c0_i32_1 = arith.constant 0 : i32
    return %c0_i32, %c0_i32_0 : i32, i32
  }
  func.func @transform_3(%arg0: i32) -> (i32, i32, i32, i32) {
    %c0_i32 = arith.constant 0 : i32
    %c0_i32_0 = arith.constant 0 : i32
    %c0_i32_1 = arith.constant 0 : i32
    %c0_i32_2 = arith.constant 0 : i32
    return %arg0, %c0_i32, %c0_i32_0, %c0_i32_1 : i32, i32, i32, i32
  }
  func.func @transform_4(%arg0: i32) -> (i32, i32, i32, i32) {
    %c0_i32 = arith.constant 0 : i32
    %c0_i32_0 = arith.constant 0 : i32
    %c0_i32_1 = arith.constant 0 : i32
    %c0_i32_2 = arith.constant 0 : i32
    return %arg0, %c0_i32, %c0_i32_0, %c0_i32_1 : i32, i32, i32, i32
  }
  func.func @transform_5(%arg0: i32) -> (i32, i32, i32, i32) {
    %c0_i32 = arith.constant 0 : i32
    %c0_i32_0 = arith.constant 0 : i32
    %c0_i32_1 = arith.constant 0 : i32
    %c0_i32_2 = arith.constant 0 : i32
    return %arg0, %c0_i32, %c0_i32_0, %c0_i32_1 : i32, i32, i32, i32
  }
}

module attributes {stable_mosaic.version = 11 : i64} {
  func.func @_conv_kernel(%arg0: i32, %arg1: memref<1x6x512xf32, #tpu.memory_space<vmem>>, %arg2: memref<9x512xf32, #tpu.memory_space<vmem>>, %arg3: memref<1x9x2x6xbf16, #tpu.memory_space<vmem>>, %arg4: memref<1x2x1xf32, #tpu.memory_space<vmem>>, %arg5: memref<1x2x512xf32, #tpu.memory_space<vmem>>) attributes {dimension_semantics = [#tpu.dimension_semantics<parallel>], iteration_bounds = array<i64: 1>, scalar_prefetch = 0 : i64, scratch_operands = 0 : i64, tpu.core_type = #tpu.core_type<tc>, window_params = [{pipeline_mode = #tpu.pipeline_mode<synchronous>, transform_indices = @transform_0, window_bounds = array<i64: 1, 6, 512>}, {pipeline_mode = #tpu.pipeline_mode<synchronous>, transform_indices = @transform_1, window_bounds = array<i64: 9, 512>}, {transform_indices = @transform_2, window_bounds = array<i64: 1, 9, 2, 6>}, {transform_indices = @transform_3, window_bounds = array<i64: 1, 2, 1>}, {transform_indices = @transform_4, window_bounds = array<i64: 1, 2, 512>}]} {
    %c0 = arith.constant 0 : index
    %c0_0 = arith.constant 0 : index
    %c0_1 = arith.constant 0 : index
    %0 = vector.load %arg1[%c0, %c0_0, %c0_1] : memref<1x6x512xf32, #tpu.memory_space<vmem>>, vector<1x6x512xf32>
    %c0_2 = arith.constant 0 : index
    %c0_3 = arith.constant 0 : index
    %1 = vector.load %arg2[%c0_2, %c0_3] : memref<9x512xf32, #tpu.memory_space<vmem>>, vector<9x512xf32>
    %c0_4 = arith.constant 0 : index
    %c0_5 = arith.constant 0 : index
    %c0_6 = arith.constant 0 : index
    %c0_7 = arith.constant 0 : index
    %2 = vector.load %arg3[%c0_4, %c0_5, %c0_6, %c0_7] : memref<1x9x2x6xbf16, #tpu.memory_space<vmem>>, vector<1x9x2x6xbf16>
    %3 = vector.shape_cast %2 : vector<1x9x2x6xbf16> to vector<9x2x6xbf16>
    %cst = arith.constant 0.000000e+00 : f32
    %4 = vector.broadcast %cst : f32 to vector<2x512xf32>
    %5 = vector.shape_cast %0 : vector<1x6x512xf32> to vector<6x512xf32>
    %c17_i32 = arith.constant 17 : i32
    %6 = tpu.dynamic_rotate %5 by %c17_i32 dim 1 : vector<6x512xf32>, i32 -> vector<6x512xf32>
    %7 = vector.extract_strided_slice %1 {offsets = [0, 0], sizes = [1, 512], strides = [1, 1]} : vector<9x512xf32> to vector<1x512xf32>
    %8 = vector.broadcast %7 : vector<1x512xf32> to vector<6x512xf32>
    %9 = arith.mulf %6, %8 : vector<6x512xf32>
    %10 = vector.extract_strided_slice %3 {offsets = [0, 0, 0], sizes = [1, 2, 6], strides = [1, 1, 1]} : vector<9x2x6xbf16> to vector<1x2x6xbf16>
    %11 = vector.shape_cast %10 : vector<1x2x6xbf16> to vector<2x6xbf16>
    %12 = arith.truncf %9 : vector<6x512xf32> to vector<6x512xbf16>
    %cst_8 = arith.constant dense<0.000000e+00> : vector<2x512xf32>
    %13 = tpu.matmul %11, %12, %cst_8 {dimension_numbers = #tpu.dot_dimension_numbers<[1], [0], [0], [1], [0, 0, 1, 1], [], []>} : vector<2x6xbf16>, vector<6x512xbf16>, vector<2x512xf32> -> vector<2x512xf32>
    %14 = arith.addf %4, %13 : vector<2x512xf32>
    %15 = vector.shape_cast %0 : vector<1x6x512xf32> to vector<6x512xf32>
    %c16_i32 = arith.constant 16 : i32
    %16 = tpu.dynamic_rotate %15 by %c16_i32 dim 1 : vector<6x512xf32>, i32 -> vector<6x512xf32>
    %17 = vector.extract_strided_slice %1 {offsets = [1, 0], sizes = [1, 512], strides = [1, 1]} : vector<9x512xf32> to vector<1x512xf32>
    %18 = vector.broadcast %17 : vector<1x512xf32> to vector<6x512xf32>
    %19 = arith.mulf %16, %18 : vector<6x512xf32>
    %20 = vector.extract_strided_slice %3 {offsets = [1, 0, 0], sizes = [1, 2, 6], strides = [1, 1, 1]} : vector<9x2x6xbf16> to vector<1x2x6xbf16>
    %21 = vector.shape_cast %20 : vector<1x2x6xbf16> to vector<2x6xbf16>
    %22 = arith.truncf %19 : vector<6x512xf32> to vector<6x512xbf16>
    %cst_9 = arith.constant dense<0.000000e+00> : vector<2x512xf32>
    %23 = tpu.matmul %21, %22, %cst_9 {dimension_numbers = #tpu.dot_dimension_numbers<[1], [0], [0], [1], [0, 0, 1, 1], [], []>} : vector<2x6xbf16>, vector<6x512xbf16>, vector<2x512xf32> -> vector<2x512xf32>
    %24 = arith.addf %14, %23 : vector<2x512xf32>
    %25 = vector.shape_cast %0 : vector<1x6x512xf32> to vector<6x512xf32>
    %c15_i32 = arith.constant 15 : i32
    %26 = tpu.dynamic_rotate %25 by %c15_i32 dim 1 : vector<6x512xf32>, i32 -> vector<6x512xf32>
    %27 = vector.extract_strided_slice %1 {offsets = [2, 0], sizes = [1, 512], strides = [1, 1]} : vector<9x512xf32> to vector<1x512xf32>
    %28 = vector.broadcast %27 : vector<1x512xf32> to vector<6x512xf32>
    %29 = arith.mulf %26, %28 : vector<6x512xf32>
    %30 = vector.extract_strided_slice %3 {offsets = [2, 0, 0], sizes = [1, 2, 6], strides = [1, 1, 1]} : vector<9x2x6xbf16> to vector<1x2x6xbf16>
    %31 = vector.shape_cast %30 : vector<1x2x6xbf16> to vector<2x6xbf16>
    %32 = arith.truncf %29 : vector<6x512xf32> to vector<6x512xbf16>
    %cst_10 = arith.constant dense<0.000000e+00> : vector<2x512xf32>
    %33 = tpu.matmul %31, %32, %cst_10 {dimension_numbers = #tpu.dot_dimension_numbers<[1], [0], [0], [1], [0, 0, 1, 1], [], []>} : vector<2x6xbf16>, vector<6x512xbf16>, vector<2x512xf32> -> vector<2x512xf32>
    %34 = arith.addf %24, %33 : vector<2x512xf32>
    %35 = vector.shape_cast %0 : vector<1x6x512xf32> to vector<6x512xf32>
    %c1_i32 = arith.constant 1 : i32
    %36 = tpu.dynamic_rotate %35 by %c1_i32 dim 1 : vector<6x512xf32>, i32 -> vector<6x512xf32>
    %37 = vector.extract_strided_slice %1 {offsets = [3, 0], sizes = [1, 512], strides = [1, 1]} : vector<9x512xf32> to vector<1x512xf32>
    %38 = vector.broadcast %37 : vector<1x512xf32> to vector<6x512xf32>
    %39 = arith.mulf %36, %38 : vector<6x512xf32>
    %40 = vector.extract_strided_slice %3 {offsets = [3, 0, 0], sizes = [1, 2, 6], strides = [1, 1, 1]} : vector<9x2x6xbf16> to vector<1x2x6xbf16>
    %41 = vector.shape_cast %40 : vector<1x2x6xbf16> to vector<2x6xbf16>
    %42 = arith.truncf %39 : vector<6x512xf32> to vector<6x512xbf16>
    %cst_11 = arith.constant dense<0.000000e+00> : vector<2x512xf32>
    %43 = tpu.matmul %41, %42, %cst_11 {dimension_numbers = #tpu.dot_dimension_numbers<[1], [0], [0], [1], [0, 0, 1, 1], [], []>} : vector<2x6xbf16>, vector<6x512xbf16>, vector<2x512xf32> -> vector<2x512xf32>
    %44 = arith.addf %34, %43 : vector<2x512xf32>
    %45 = vector.shape_cast %0 : vector<1x6x512xf32> to vector<6x512xf32>
    %46 = vector.extract_strided_slice %1 {offsets = [4, 0], sizes = [1, 512], strides = [1, 1]} : vector<9x512xf32> to vector<1x512xf32>
    %47 = vector.broadcast %46 : vector<1x512xf32> to vector<6x512xf32>
    %48 = arith.mulf %45, %47 : vector<6x512xf32>
    %49 = vector.extract_strided_slice %3 {offsets = [4, 0, 0], sizes = [1, 2, 6], strides = [1, 1, 1]} : vector<9x2x6xbf16> to vector<1x2x6xbf16>
    %50 = vector.shape_cast %49 : vector<1x2x6xbf16> to vector<2x6xbf16>
    %51 = arith.truncf %48 : vector<6x512xf32> to vector<6x512xbf16>
    %cst_12 = arith.constant dense<0.000000e+00> : vector<2x512xf32>
    %52 = tpu.matmul %50, %51, %cst_12 {dimension_numbers = #tpu.dot_dimension_numbers<[1], [0], [0], [1], [0, 0, 1, 1], [], []>} : vector<2x6xbf16>, vector<6x512xbf16>, vector<2x512xf32> -> vector<2x512xf32>
    %53 = arith.addf %44, %52 : vector<2x512xf32>
    %54 = vector.shape_cast %0 : vector<1x6x512xf32> to vector<6x512xf32>
    %c511_i32 = arith.constant 511 : i32
    %55 = tpu.dynamic_rotate %54 by %c511_i32 dim 1 : vector<6x512xf32>, i32 -> vector<6x512xf32>
    %56 = vector.extract_strided_slice %1 {offsets = [5, 0], sizes = [1, 512], strides = [1, 1]} : vector<9x512xf32> to vector<1x512xf32>
    %57 = vector.broadcast %56 : vector<1x512xf32> to vector<6x512xf32>
    %58 = arith.mulf %55, %57 : vector<6x512xf32>
    %59 = vector.extract_strided_slice %3 {offsets = [5, 0, 0], sizes = [1, 2, 6], strides = [1, 1, 1]} : vector<9x2x6xbf16> to vector<1x2x6xbf16>
    %60 = vector.shape_cast %59 : vector<1x2x6xbf16> to vector<2x6xbf16>
    %61 = arith.truncf %58 : vector<6x512xf32> to vector<6x512xbf16>
    %cst_13 = arith.constant dense<0.000000e+00> : vector<2x512xf32>
    %62 = tpu.matmul %60, %61, %cst_13 {dimension_numbers = #tpu.dot_dimension_numbers<[1], [0], [0], [1], [0, 0, 1, 1], [], []>} : vector<2x6xbf16>, vector<6x512xbf16>, vector<2x512xf32> -> vector<2x512xf32>
    %63 = arith.addf %53, %62 : vector<2x512xf32>
    %64 = vector.shape_cast %0 : vector<1x6x512xf32> to vector<6x512xf32>
    %c497_i32 = arith.constant 497 : i32
    %65 = tpu.dynamic_rotate %64 by %c497_i32 dim 1 : vector<6x512xf32>, i32 -> vector<6x512xf32>
    %66 = vector.extract_strided_slice %1 {offsets = [6, 0], sizes = [1, 512], strides = [1, 1]} : vector<9x512xf32> to vector<1x512xf32>
    %67 = vector.broadcast %66 : vector<1x512xf32> to vector<6x512xf32>
    %68 = arith.mulf %65, %67 : vector<6x512xf32>
    %69 = vector.extract_strided_slice %3 {offsets = [6, 0, 0], sizes = [1, 2, 6], strides = [1, 1, 1]} : vector<9x2x6xbf16> to vector<1x2x6xbf16>
    %70 = vector.shape_cast %69 : vector<1x2x6xbf16> to vector<2x6xbf16>
    %71 = arith.truncf %68 : vector<6x512xf32> to vector<6x512xbf16>
    %cst_14 = arith.constant dense<0.000000e+00> : vector<2x512xf32>
    %72 = tpu.matmul %70, %71, %cst_14 {dimension_numbers = #tpu.dot_dimension_numbers<[1], [0], [0], [1], [0, 0, 1, 1], [], []>} : vector<2x6xbf16>, vector<6x512xbf16>, vector<2x512xf32> -> vector<2x512xf32>
    %73 = arith.addf %63, %72 : vector<2x512xf32>
    %74 = vector.shape_cast %0 : vector<1x6x512xf32> to vector<6x512xf32>
    %c496_i32 = arith.constant 496 : i32
    %75 = tpu.dynamic_rotate %74 by %c496_i32 dim 1 : vector<6x512xf32>, i32 -> vector<6x512xf32>
    %76 = vector.extract_strided_slice %1 {offsets = [7, 0], sizes = [1, 512], strides = [1, 1]} : vector<9x512xf32> to vector<1x512xf32>
    %77 = vector.broadcast %76 : vector<1x512xf32> to vector<6x512xf32>
    %78 = arith.mulf %75, %77 : vector<6x512xf32>
    %79 = vector.extract_strided_slice %3 {offsets = [7, 0, 0], sizes = [1, 2, 6], strides = [1, 1, 1]} : vector<9x2x6xbf16> to vector<1x2x6xbf16>
    %80 = vector.shape_cast %79 : vector<1x2x6xbf16> to vector<2x6xbf16>
    %81 = arith.truncf %78 : vector<6x512xf32> to vector<6x512xbf16>
    %cst_15 = arith.constant dense<0.000000e+00> : vector<2x512xf32>
    %82 = tpu.matmul %80, %81, %cst_15 {dimension_numbers = #tpu.dot_dimension_numbers<[1], [0], [0], [1], [0, 0, 1, 1], [], []>} : vector<2x6xbf16>, vector<6x512xbf16>, vector<2x512xf32> -> vector<2x512xf32>
    %83 = arith.addf %73, %82 : vector<2x512xf32>
    %84 = vector.shape_cast %0 : vector<1x6x512xf32> to vector<6x512xf32>
    %c495_i32 = arith.constant 495 : i32
    %85 = tpu.dynamic_rotate %84 by %c495_i32 dim 1 : vector<6x512xf32>, i32 -> vector<6x512xf32>
    %86 = vector.extract_strided_slice %1 {offsets = [8, 0], sizes = [1, 512], strides = [1, 1]} : vector<9x512xf32> to vector<1x512xf32>
    %87 = vector.broadcast %86 : vector<1x512xf32> to vector<6x512xf32>
    %88 = arith.mulf %85, %87 : vector<6x512xf32>
    %89 = vector.extract_strided_slice %3 {offsets = [8, 0, 0], sizes = [1, 2, 6], strides = [1, 1, 1]} : vector<9x2x6xbf16> to vector<1x2x6xbf16>
    %90 = vector.shape_cast %89 : vector<1x2x6xbf16> to vector<2x6xbf16>
    %91 = arith.truncf %88 : vector<6x512xf32> to vector<6x512xbf16>
    %cst_16 = arith.constant dense<0.000000e+00> : vector<2x512xf32>
    %92 = tpu.matmul %90, %91, %cst_16 {dimension_numbers = #tpu.dot_dimension_numbers<[1], [0], [0], [1], [0, 0, 1, 1], [], []>} : vector<2x6xbf16>, vector<6x512xbf16>, vector<2x512xf32> -> vector<2x512xf32>
    %93 = arith.addf %83, %92 : vector<2x512xf32>
    %c0_17 = arith.constant 0 : index
    %c0_18 = arith.constant 0 : index
    %c0_19 = arith.constant 0 : index
    %94 = vector.load %arg4[%c0_17, %c0_18, %c0_19] : memref<1x2x1xf32, #tpu.memory_space<vmem>>, vector<1x2x1xf32>
    %95 = vector.shape_cast %94 : vector<1x2x1xf32> to vector<2x1xf32>
    %96 = vector.broadcast %95 : vector<2x1xf32> to vector<2x512xf32>
    %97 = arith.addf %93, %96 : vector<2x512xf32>
    %cst_20 = arith.constant 1.000000e-01 : f32
    %98 = vector.broadcast %cst_20 : f32 to vector<2x512xf32>
    %99 = arith.mulf %97, %98 : vector<2x512xf32>
    %c0_21 = arith.constant 0 : index
    %c0_22 = arith.constant 0 : index
    %c0_23 = arith.constant 0 : index
    %100 = vector.load %arg5[%c0_21, %c0_22, %c0_23] : memref<1x2x512xf32, #tpu.memory_space<vmem>>, vector<1x2x512xf32>
    %101 = vector.shape_cast %100 : vector<1x2x512xf32> to vector<2x512xf32>
    %102 = vector.shape_cast %99 : vector<2x512xf32> to vector<1x2x512xf32>
    tpu.vector_store %arg5[%c0_21, %c0_22, %c0_23], %102 {strides = array<i32>} : memref<1x2x512xf32, #tpu.memory_space<vmem>>, vector<1x2x512xf32>,
    return
  }
  func.func @transform_0(%arg0: i32) -> (i32, i32, i32) {
    %c0_i32 = arith.constant 0 : i32
    %c0_i32_0 = arith.constant 0 : i32
    %c0_i32_1 = arith.constant 0 : i32
    %c0_i32_2 = arith.constant 0 : i32
    return %c0_i32, %c0_i32_0, %c0_i32_1 : i32, i32, i32
  }
  func.func @transform_1(%arg0: i32) -> (i32, i32) {
    %c0_i32 = arith.constant 0 : i32
    %c0_i32_0 = arith.constant 0 : i32
    %c0_i32_1 = arith.constant 0 : i32
    return %c0_i32, %c0_i32_0 : i32, i32
  }
  func.func @transform_2(%arg0: i32) -> (i32, i32, i32, i32) {
    %c0_i32 = arith.constant 0 : i32
    %c0_i32_0 = arith.constant 0 : i32
    %c0_i32_1 = arith.constant 0 : i32
    %c0_i32_2 = arith.constant 0 : i32
    return %arg0, %c0_i32, %c0_i32_0, %c0_i32_1 : i32, i32, i32, i32
  }
  func.func @transform_3(%arg0: i32) -> (i32, i32, i32) {
    %c0_i32 = arith.constant 0 : i32
    %c0_i32_0 = arith.constant 0 : i32
    %c0_i32_1 = arith.constant 0 : i32
    return %arg0, %c0_i32, %c0_i32_0 : i32, i32, i32
  }
  func.func @transform_4(%arg0: i32) -> (i32, i32, i32) {
    %c0_i32 = arith.constant 0 : i32
    %c0_i32_0 = arith.constant 0 : i32
    %c0_i32_1 = arith.constant 0 : i32
    return %arg0, %c0_i32, %c0_i32_0 : i32, i32, i32
  }
}

</mosaic_0001>

<bundles_post_ra>
// kernel: unet2_forward.7
= control target key start
LH: loop header
LB: loop body
LE: loop exit
PB: predicated region body
PF: predicated region fallthrough
CT: control target
= control target key end

     0   :  { %s964_s15 = smov 0   ;;  %s1100_s0 = inlined_call_operand.vmem [shape: f32[4,2,128], index: 0, kind: input, shape index: {}]   ;;  %s1101_s1 = inlined_call_operand.vmem [shape: f32[9,128], index: 1, kind: input, shape index: {}]   ;;  %s1102_s2 = inlined_call_operand.vmem [shape: bf16[2,9,4,2], index: 2, kind: input, shape index: {}]   ;;  %s1103_s3 = inlined_call_operand.vmem [shape: f32[2,4,1], index: 3, kind: input, shape index: {}]   ;;  %s1104_s4 = inlined_call_operand.vmem [shape: f32[2,4,128], index: 4, kind: output, shape index: {}]  }
   0x1 LB: > { %s970_s16 = sadd.s32 4294967295, %s931_s15   ;;  %p820_p0 = scmp.ge.s32.totalorder %s931_s15, 1  ;;  %s931_s15 = sphi %s964_s15, %s14_s15  }
   0x2   : > { %p171_p1 = scmp.lt.s32.totalorder %s931_s15, 3 }
   0x4   : > { %p172_p2 = pnand %p820_p0, %p171_p1 }
   0x5   : > { %v977_v0 = vld [vmem:[%s1100_s0 + $0x4] sm:$0x3] (!%p172_p2)  ;;  %v982_v1 = vld [vmem:[%s1100_s0 + $0x6] sm:$0x3] (!%p172_p2)  ;;  %v215_v4 = vld [vmem:[%s1100_s0 + $0x2] sm:$0x3] (!%p172_p2)  ;;  %v243_v14 = vlaneseq (!%p172_p2) }
   0x6   : > { %175 = sbr.rel (%p172_p2) target bundleno = 384 (0x180), region = 36  ;;  %vm220_vm0 = vcmp.gt.f32.partialorder (!%p172_p2), %v977_v0, 0.0  ;;  %v224_v2 = vmul.f32 (!%p172_p2), 0.01, %v977_v0  ;;  %vm221_vm1 = vcmp.gt.f32.partialorder (!%p172_p2), %v982_v1, 0.0  ;;  %vm219_vm2 = vcmp.gt.f32.partialorder (!%p172_p2), %v215_v4, 0.0 }
   0x7   : > { %v225_v3 = vmul.f32 (!%p172_p2), 0.01, %v982_v1  ;;  %v223_v7 = vmul.f32 (!%p172_p2), 0.01, %v215_v4  ;;  %v214_v8 = vld [vmem:[%s1100_s0] sm:$0x3] (!%p172_p2) }
   0x8   : > { %v992_v5 = vsel (!%p172_p2), %vm220_vm0, %v977_v0, %v224_v2  ;;  %s933_s25 = smov (!%p172_p2), 8   ;;  %v1002_v9 = vadd.f32 (!%p172_p2), %v215_v4, %v214_v8  ;;  %v934_v11 = vmov (!%p172_p2), 0.0   ;;  %vm935_vm3 = vmmov (!%p172_p2), 0   ;;  %s936_s26 = smov (!%p172_p2), 9   ;;  %v230_v18 = vld [vmem:[%s1101_s1] sm:$0xff] (!%p172_p2) }
   0x9   : > { %v995_v6 = vsel (!%p172_p2), %vm221_vm1, %v982_v1, %v225_v3  ;;  %249 = vrot.lane.b32.xlu0 (!%p172_p2), %v992_v5, %s933_s25  ;;  %v1004_v10 = vsel (!%p172_p2), %vm219_vm2, %v215_v4, %v223_v7  ;;  %854 = vmatprep.subr.bf16.mxu0 (!%p172_p2), %v934_v11  ;;  %s937_s27 = smov (!%p172_p2), 1   ;;  %p200_p3 = scmp.lt.s32.totalorder (!%p172_p2), %s970_s16, 1  ;;  %v938_v12 = vmov (!%p172_p2), 0   ;;  %v244_v15 = vshrl.u32 (!%p172_p2), %v243_v14, 7  ;;  %v832_v3 = vld [vmem:[%s1101_s1 + $0x8] ss:$0 sm:$0xff] (!%p172_p2) }
   0xa   : > { %351 = vrot.lane.b32.xlu1 (!%p172_p2), %v995_v6, %s933_s25  ;;  %860 = vmatprep.subr.bf16.mxu1 (!%p172_p2), %v934_v11  ;;  %v222_v27 = vmul.f32 (!%p172_p2), 0.01, %v214_v8  ;;  %vm218_vm4 = vcmp.gt.f32.partialorder (!%p172_p2), %v214_v8, 0.0  ;;  %vm261_vm5 = vcmask (!%p172_p2), 1040384   ;;  %vm257_vm6 = vcmask (!%p172_p2), 15360   ;;  %p739_p4 = scmp.eq.s32.totalorder (!%p172_p2), %s970_s16, 1 }
   0xb   : > { %856 = vmatprep.mubr.msk.bf16.mxu0 (!%p172_p2), %vm935_vm3, %v934_v11  ;;  %862 = vmatprep.mubr.msk.bf16.mxu1 (!%p172_p2), %vm935_vm3, %v934_v11  ;;  %v253_v16 = vsub.s32 (!%p172_p2), 1, %v244_v15  ;;  %v355_v17 = vsub.s32 (!%p172_p2), 2, %v244_v15  ;;  %v245_v19 = vsub.s32 (!%p172_p2), 0, %v244_v15  ;;  %v410_v22 = vsub.s32 (!%p172_p2), 3, %v244_v15 }
   0xc   : > { %923 = vset.pattern.permute.xlu1 (!%p172_p2), %v938_v12  ;;  %924 = vset.pattern.permute.xlu0 (!%p172_p2), %v938_v12  ;;  %v463_v23 = vsub.s32 (!%p172_p2), 4, %v244_v15  ;;  %v516_v31 = vsub.s32 (!%p172_p2), 5, %v244_v15  ;;  %v226_v37 = vsel (!%p172_p2), %vm218_vm4, %v214_v8, %v222_v27  ;;  %v571_v43 = vsub.s32 (!%p172_p2), 6, %v244_v15 }
   0xd   : > { %241 = vrot.lane.b32.xlu0 %v995_v6, %s936_s26  ;;  %s1017_s28 = scalar_select %p200_p3, %s970_s16, 1  ;;  %v254_v20 = vrot.slane %v230_v18, %v253_v16  ;;  %v356_v21 = vrot.slane %v230_v18, %v355_v17  ;;  %v246_v26 = vrot.slane %v230_v18, %v245_v19  ;;  %v411_v30 = vrot.slane %v230_v18, %v410_v22 }
   0xe   : > { %406 = vrot.lane.b32.xlu1 %v1004_v10, %s937_s27  ;;  %v464_v34 = vrot.slane %v230_v18, %v463_v23  ;;  %v517_v41 = vrot.slane %v230_v18, %v516_v31  ;;  %v624_v49 = vsub.s32 7, %v244_v15  ;;  %v572_v54 = vrot.slane %v230_v18, %v571_v43  ;;  %s740_s17 = scalar_select %p739_p4, 1, 0 }
   0xf   : > { %s822_s29 = sshll.u32 %s1017_s28, 2  ;;  %s908_s9 = smul.u32 18, %s1017_s28  ;;  %v679_v8 = vmul.f32 %v832_v3, %v995_v6  ;;  %vm748_vm7 = vcmask 1041408  }
  0x10   : > { %s208_s6 = scalar_lea.vmem %s1103_s3, %s822_s29  ;;  %v465_v47 = vmul.f32 %v464_v34, %v226_v37  ;;  %v518_v51 = vmul.f32 %v517_v41, %v1004_v10  ;;  %v625_v57 = vrot.slane %v230_v18, %v624_v49  ;;  %s741_s18 = scvt.s32.f32 %s740_s17 }
  0x11   : > { %567 = vrot.lane.b32.xlu0 %v995_v6, %s937_s27  ;;  %v728_v13 = vld [vmem:[%s208_s6] sm:$0xf]  ;;  %s1032_s12 = scalar_lea.vmem %s1102_s2, %s908_s9  ;;  %s212_s20 = scalar_lea.vmem %s1104_s4, %s822_s29 }
  0x12   : > { %731 = vperm.xlu1 %923, %v728_v13   ;;  %v233_v42 = vld [vmem:[%s1032_s12 + $0x2] sm:$0x3]  ;;  %v232_v50 = vld [vmem:[%s1032_s12] sm:$0x3]  ;;  %v466_v53 = vpack.c.bf16 %v465_v47, %v465_v47  ;;  %v234_v56 = vld [vmem:[%s1032_s12 + $0x4] sm:$0x3]  ;;  %v519_v58 = vpack.c.bf16 %v518_v51, %v518_v51  ;;  %v626_v62 = vmul.f32 %v625_v57, %v992_v5  ;;  %v680_v13 = vpack.c.bf16 %v679_v8, %v679_v8 }
  0x13   : > { %v235_v61 = vld [vmem:[%s1032_s12 + $0x6] sm:$0x3]  ;;  %v236_v4 = vld [vmem:[%s1032_s12 + $0x8] sm:$0x3]  ;;  %v237_v10 = vld [vmem:[%s1032_s12 + $0xa] sm:$0x3] }
  0x14   : > { %v471_v59 = vsel %vm261_vm5, %v466_v53, 0  ;;  %v524_v2 = vsel %vm261_vm5, %v519_v58, 0  ;;  %v627_v7 = vpack.c.bf16 %v626_v62, %v626_v62  ;;  %v238_v14 = vld [vmem:[%s1032_s12 + $0xc] sm:$0x3]  ;;  %v685_v6 = vsel %vm261_vm5, %v680_v13, 0 }
  0x15   : > { %v239_v15 = vld [vmem:[%s1032_s12 + $0xe] sm:$0x3]  ;;  %v240_v16 = vld [vmem:[%s1032_s12 + $0x10] sm:$0x3] }
  0x16   : > { %v632_v12 = vsel %vm261_vm5, %v627_v7, 0 }
  0x7b   : > { %v250_v24 = vpop.permute.xlu0 %249 }
  0x7c   : > { %v352_v25 = vpop.permute.xlu1 %351  ;;  %v255_v28 = vmul.f32 %v254_v20, %v250_v24 }
  0x7d   : > { %v357_v29 = vmul.f32 %v356_v21, %v352_v25 }
  0x7e   : > { %v256_v32 = vpack.c.bf16 %v255_v28, %v255_v28 }
  0x7f   : > { %v358_v33 = vpack.c.bf16 %v357_v29, %v357_v29  ;;  %v242_v35 = vpop.permute.xlu0 %241 }
  0x80   : > { %v407_v36 = vpop.permute.xlu1 %406  ;;  %v247_v38 = vmul.f32 %v246_v26, %v242_v35  ;;  %v263_v39 = vsel %vm261_vm5, %v256_v32, 0 }
  0x81   : > { %v412_v40 = vmul.f32 %v411_v30, %v407_v36  ;;  %855 = vmatpush3.bf16.msra.mxu0 %v263_v39  ;;  %v363_v44 = vsel %vm261_vm5, %v358_v33, 0 }
  0x82   : > { %v248_v45 = vpack.c.bf16 %v247_v38, %v247_v38  ;;  %866 = vmatprep.subr.bf16.mxu0 %v934_v11  ;;  %v736_v38 = vadd.f32 %v1002_v9, %v977_v0 }
  0x83   : > { %v413_v46 = vpack.c.bf16 %v412_v40, %v412_v40  ;;  %v568_v55 = vpop.permute.xlu0 %567 }
  0x84   : > { %857 = vmatmul.mubr.msk.bf16.vlgmr.msra.gmra.mrb[0].mxu0 %vm257_vm6, %v233_v42  ;;  %v309_v48 = vsel %vm261_vm5, %v248_v45, 0  ;;  %v573_v60 = vmul.f32 %v572_v54, %v568_v55 }
  0x85   : > { %861 = vmatpush3.bf16.msra.mxu1 %v309_v48  ;;  %867 = vmatpush3.bf16.msra.mxu0 %v363_v44  ;;  %v418_v52 = vsel %vm261_vm5, %v413_v46, 0  ;;  %v737_v44 = vadd.f32 %v736_v38, %v982_v1 }
  0x86   : > { %872 = vmatprep.subr.bf16.mxu1 %v934_v11  ;;  %868 = vmatprep.mubr.msk.bf16.mxu0 %vm935_vm3, %v934_v11  ;;  %v574_v63 = vpack.c.bf16 %v573_v60, %v573_v60 }
  0x87   : > { %878 = vmatprep.subr.bf16.mxu0 %v934_v11 }
  0x88   : > { %863 = vmatmul.mubr.msk.bf16.vlgmr.msra.gmra.mrb[0].mxu1 %vm257_vm6, %v232_v50  ;;  %v579_v5 = vsel %vm261_vm5, %v574_v63, 0  ;;  %v738_v50 = vmul.f32 0.25, %v737_v44 }
  0x89   : > { %873 = vmatpush3.bf16.msra.mxu1 %v418_v52  ;;  %874 = vmatprep.mubr.msk.bf16.mxu1 %vm935_vm3, %v934_v11  ;;  %v742_v52 = vstv %s741_s18 }
  0x8a   : > { %884 = vmatprep.subr.bf16.mxu1 %v934_v11  ;;  %v743_v55 = vmul.f32 %v742_v52, %v738_v50 }
  0x8c   : > { %869 = vmatmul.mubr.msk.bf16.vlgmr.msra.gmra.mrb[4].mxu0 %vm257_vm6, %v234_v56 }
  0x8d   : > { %879 = vmatpush3.bf16.msra.mxu0 %v471_v59  ;;  %880 = vmatprep.mubr.msk.bf16.mxu0 %vm935_vm3, %v934_v11 }
  0x8e   : > { %890 = vmatprep.subr.bf16.mxu0 %v934_v11 }
  0x90   : > { %875 = vmatmul.mubr.msk.bf16.vlgmr.msra.gmra.mrb[4].mxu1 %vm257_vm6, %v235_v61  ;;  %v745_v61 = vrot.slane %v743_v55, 6 }
  0x91   : > { %885 = vmatpush3.bf16.msra.mxu1 %v524_v2  ;;  %886 = vmatprep.mubr.msk.bf16.mxu1 %vm935_vm3, %v934_v11  ;;  %v732_v59 = vpop.permute.xlu1 %731 }
  0x92   : > { %896 = vmatprep.subr.bf16.mxu1 %v934_v11 }
  0x94   : > { %881 = vmatmul.mubr.msk.bf16.vlgmr.msra.gmra.mrb[8].mxu0 %vm257_vm6, %v236_v4 }
  0x95   : > { %891 = vmatpush3.bf16.msra.mxu0 %v579_v5  ;;  %892 = vmatprep.mubr.msk.bf16.mxu0 %vm935_vm3, %v934_v11 }
  0x96   : > { %902 = vmatprep.subr.bf16.mxu0 %v934_v11 }
  0x98   : > { %887 = vmatmul.mubr.msk.bf16.vlgmr.msra.gmra.mrb[8].mxu1 %vm257_vm6, %v237_v10 }
  0x99   : > { %897 = vmatpush3.bf16.msra.mxu1 %v632_v12  ;;  %898 = vmatprep.mubr.msk.bf16.mxu1 %vm935_vm3, %v934_v11 }
  0x9c   : > { %893 = vmatmul.mubr.msk.bf16.vlgmr.msra.gmra.mrb[12].mxu0 %vm257_vm6, %v238_v14 }
  0x9d   : > { %903 = vmatpush3.bf16.msra.mxu0 %v685_v6  ;;  %904 = vmatprep.mubr.msk.bf16.mxu0 %vm935_vm3, %v934_v11 }
  0xa0   : > { %899 = vmatmul.mubr.msk.bf16.vlgmr.msra.gmra.mrb[12].mxu1 %vm257_vm6, %v239_v15 }
  0xa4   : > { %905 = vmatmul.mubr.msk.bf16.vlgmr.msra.gmra.mrb[16].mxu0 %vm257_vm6, %v240_v16 }
 0x157   : > { %v299_v17 = vpop.f32.mrb[0].mxu0 }
 0x158   : > { %v858_v18 = vpop.f32.mrb[1].mxu0 }
 0x159   : > { %v302_v19 = vpop.f32.mrb[2].mxu0 }
 0x15a   : > { %v859_v20 = vpop.f32.mrb[3].mxu0 }
 0x15b   : > { %v345_v21 = vpop.f32.mrb[0].mxu1 }
 0x15c   : > { %v346_v22 = vadd.f32 %v345_v21, %v299_v17  ;;  %v864_v23 = vpop.f32.mrb[1].mxu1 }
 0x15d   : > { %v348_v24 = vpop.f32.mrb[2].mxu1 }
 0x15e   : > { %v865_v25 = vpop.f32.mrb[3].mxu1 }
 0x15f   : > { %v399_v26 = vpop.f32.mrb[4].mxu0 }
 0x160   : > { %v405_v27 = vadd.f32 %v399_v26, %v346_v22  ;;  %v870_v28 = vpop.f32.mrb[5].mxu0 }
 0x161   : > { %v402_v29 = vpop.f32.mrb[6].mxu0 }
 0x162   : > { %v871_v11 = vpop.f32.mrb[7].mxu0 }
 0x163   : > { %v454_v30 = vpop.f32.mrb[4].mxu1 }
 0x164   : > { %v460_v31 = vadd.f32 %v454_v30, %v405_v27  ;;  %v876_v32 = vpop.f32.mrb[5].mxu1 }
 0x165   : > { %v457_v33 = vpop.f32.mrb[6].mxu1 }
 0x166   : > { %v877_v34 = vpop.f32.mrb[7].mxu1 }
 0x167   : > { %v507_v35 = vpop.f32.mrb[8].mxu0 }
 0x168   : > { %v513_v36 = vadd.f32 %v507_v35, %v460_v31  ;;  %v882_v37 = vpop.f32.mrb[9].mxu0 }
 0x169   : > { %v510_v39 = vpop.f32.mrb[10].mxu0 }
 0x16a   : > { %v883_v40 = vpop.f32.mrb[11].mxu0 }
 0x16b   : > { %v560_v41 = vpop.f32.mrb[8].mxu1 }
 0x16c   : > { %v566_v42 = vadd.f32 %v560_v41, %v513_v36  ;;  %v888_v43 = vpop.f32.mrb[9].mxu1 }
 0x16d   : > { %v563_v45 = vpop.f32.mrb[10].mxu1 }
 0x16e   : > { %v889_v46 = vpop.f32.mrb[11].mxu1 }
 0x16f   : > { %v615_v47 = vpop.f32.mrb[12].mxu0 }
 0x170   : > { %v621_v48 = vadd.f32 %v615_v47, %v566_v42  ;;  %v894_v49 = vpop.f32.mrb[13].mxu0 }
 0x171   : > { %v618_v51 = vpop.f32.mrb[14].mxu0 }
 0x172   : > { %v895_v53 = vpop.f32.mrb[15].mxu0 }
 0x173   : > { %v668_v0 = vpop.f32.mrb[12].mxu1 }
 0x174   : > { %v674_v9 = vadd.f32 %v668_v0, %v621_v48  ;;  %v900_v54 = vpop.f32.mrb[13].mxu1 }
 0x175   : > { %v671_v56 = vpop.f32.mrb[14].mxu1 }
 0x176   : > { %v901_v57 = vpop.f32.mrb[15].mxu1 }
 0x177   : > { %v721_v58 = vpop.f32.mrb[16].mxu0 }
 0x178   : > { %v727_v1 = vadd.f32 %v721_v58, %v674_v9  ;;  %v906_v60 = vpop.f32.mrb[17].mxu0 }
 0x179   : > { %v724_v62 = vpop.f32.mrb[18].mxu0 }
 0x17a   : > { %v734_v63 = vadd.f32 %v732_v59, %v727_v1  ;;  %v907_v2 = vpop.f32.mrb[19].mxu0 }
 0x17c   : > { %v747_v3 = vadd.f32 %v745_v61, %v734_v63 }
 0x17e   : > { %v749_v4 = vsel %vm748_vm7, %v734_v63, %v747_v3 }
 0x17f   : > { %750 = vst [vmem:[%s212_s20] sm:$0xf] %v749_v4 }
 0x180 PF: > { %s14_s15 = sadd.s32 1, %s931_s15  }
 0x181   : > { %p11_p5 = scmp.ge.s32.totalorder %s14_s15, 4  }
 0x183   :  { %13 = sbr.rel (!%p11_p5) target bundleno = 1 (0x1), region = 69 }

// kernel: unet2_forward.8
= control target key start
LH: loop header
LB: loop body
LE: loop exit
PB: predicated region body
PF: predicated region fallthrough
CT: control target
= control target key end

     0   :  { %s959_s15 = smov 0   ;;  %s1095_s0 = inlined_call_operand.vmem [shape: f32[4,8,128], index: 0, kind: input, shape index: {}]   ;;  %s1096_s1 = inlined_call_operand.vmem [shape: f32[9,128], index: 1, kind: input, shape index: {}]   ;;  %s1097_s2 = inlined_call_operand.vmem [shape: bf16[2,9,8,8], index: 2, kind: input, shape index: {}]   ;;  %s1098_s3 = inlined_call_operand.vmem [shape: f32[2,8,1], index: 3, kind: input, shape index: {}]   ;;  %s1099_s4 = inlined_call_operand.vmem [shape: f32[2,8,128], index: 4, kind: output, shape index: {}]  }
   0x1 LB: > { %s965_s16 = sadd.s32 4294967295, %s926_s15   ;;  %p815_p0 = scmp.ge.s32.totalorder %s926_s15, 1  ;;  %s926_s15 = sphi %s959_s15, %s14_s15  }
   0x2   : > { %p171_p1 = scmp.lt.s32.totalorder %s926_s15, 3 }
   0x4   : > { %p172_p2 = pnand %p815_p0, %p171_p1 }
   0x5   : > { %v972_v0 = vld [vmem:[%s1095_s0 + $0x10] sm:$0xff] (!%p172_p2)  ;;  %v977_v1 = vld [vmem:[%s1095_s0 + $0x18] sm:$0xff] (!%p172_p2)  ;;  %v215_v4 = vld [vmem:[%s1095_s0 + $0x8] sm:$0xff] (!%p172_p2)  ;;  %v928_v9 = vmov (!%p172_p2), 0.0   ;;  %vm929_vm3 = vmmov (!%p172_p2), 0   ;;  %s930_s25 = smov (!%p172_p2), 4   ;;  %v243_v14 = vlaneseq (!%p172_p2) }
   0x6   : > { %175 = sbr.rel (%p172_p2) target bundleno = 383 (0x17f), region = 36  ;;  %vm220_vm0 = vcmp.gt.f32.partialorder (!%p172_p2), %v972_v0, 0.0  ;;  %v224_v2 = vmul.f32 (!%p172_p2), 0.01, %v972_v0  ;;  %vm221_vm1 = vcmp.gt.f32.partialorder (!%p172_p2), %v977_v1, 0.0  ;;  %vm219_vm2 = vcmp.gt.f32.partialorder (!%p172_p2), %v215_v4, 0.0  ;;  %849 = vmatprep.subr.bf16.mxu0 (!%p172_p2), %v928_v9  ;;  %851 = vmatprep.mubr.msk.bf16.mxu0 (!%p172_p2), %vm929_vm3, %v928_v9 }
   0x7   : > { %v225_v3 = vmul.f32 (!%p172_p2), 0.01, %v977_v1  ;;  %v223_v7 = vmul.f32 (!%p172_p2), 0.01, %v215_v4  ;;  %v214_v8 = vld [vmem:[%s1095_s0] sm:$0xff] (!%p172_p2)  ;;  %855 = vmatprep.subr.bf16.mxu1 (!%p172_p2), %v928_v9  ;;  %857 = vmatprep.mubr.msk.bf16.mxu1 (!%p172_p2), %vm929_vm3, %v928_v9  ;;  %s931_s26 = smov (!%p172_p2), 5  }
   0x8   : > { %v987_v5 = vsel (!%p172_p2), %vm220_vm0, %v972_v0, %v224_v2  ;;  %v1000_v10 = vadd.f32 (!%p172_p2), %v215_v4, %v214_v8  ;;  %s932_s27 = smov (!%p172_p2), 1   ;;  %p200_p3 = scmp.lt.s32.totalorder (!%p172_p2), %s965_s16, 1  ;;  %v933_v12 = vmov (!%p172_p2), 0   ;;  %v244_v15 = vshrl.u32 (!%p172_p2), %v243_v14, 7  ;;  %v230_v18 = vld [vmem:[%s1096_s1] sm:$0xff] (!%p172_p2) }
   0x9   : > { %v990_v6 = vsel (!%p172_p2), %vm221_vm1, %v977_v1, %v225_v3  ;;  %249 = vrot.lane.b32.xlu0 (!%p172_p2), %v987_v5, %s930_s25  ;;  %v1002_v11 = vsel (!%p172_p2), %vm219_vm2, %v215_v4, %v223_v7  ;;  %918 = vset.pattern.permute.xlu1 (!%p172_p2), %v933_v12  ;;  %v222_v27 = vmul.f32 (!%p172_p2), 0.01, %v214_v8  ;;  %vm218_vm4 = vcmp.gt.f32.partialorder (!%p172_p2), %v214_v8, 0.0  ;;  %v827_v3 = vld [vmem:[%s1096_s1 + $0x8] ss:$0 sm:$0xff] (!%p172_p2)  ;;  %p739_p4 = scmp.eq.s32.totalorder (!%p172_p2), %s965_s16, 1 }
   0xa   : > { %351 = vrot.lane.b32.xlu1 (!%p172_p2), %v990_v6, %s930_s25  ;;  %919 = vset.pattern.permute.xlu0 (!%p172_p2), %v933_v12  ;;  %v253_v16 = vsub.s32 (!%p172_p2), 1, %v244_v15  ;;  %v355_v17 = vsub.s32 (!%p172_p2), 2, %v244_v15  ;;  %v245_v19 = vsub.s32 (!%p172_p2), 0, %v244_v15  ;;  %v410_v22 = vsub.s32 (!%p172_p2), 3, %v244_v15 }
   0xb   : > { %v463_v23 = vsub.s32 (!%p172_p2), 4, %v244_v15  ;;  %v516_v31 = vsub.s32 (!%p172_p2), 5, %v244_v15  ;;  %vm261_vm5 = vcmask (!%p172_p2), 1043456   ;;  %v226_v37 = vsel (!%p172_p2), %vm218_vm4, %v214_v8, %v222_v27 }
   0xc   : > { %v254_v20 = vrot.slane (!%p172_p2), %v230_v18, %v253_v16  ;;  %v356_v21 = vrot.slane (!%p172_p2), %v230_v18, %v355_v17  ;;  %v246_v26 = vrot.slane (!%p172_p2), %v230_v18, %v245_v19  ;;  %v411_v30 = vrot.slane (!%p172_p2), %v230_v18, %v410_v22 }
   0xd   : > { %241 = vrot.lane.b32.xlu0 %v990_v6, %s931_s26  ;;  %s1012_s28 = scalar_select %p200_p3, %s965_s16, 1  ;;  %v464_v34 = vrot.slane %v230_v18, %v463_v23  ;;  %v517_v41 = vrot.slane %v230_v18, %v516_v31  ;;  %vm257_vm6 = vcmask 64512   ;;  %v571_v43 = vsub.s32 6, %v244_v15 }
   0xe   : > { %406 = vrot.lane.b32.xlu1 %v1002_v11, %s932_s27  ;;  %v624_v49 = vsub.s32 7, %v244_v15  ;;  %v679_v8 = vmul.f32 %v827_v3, %v990_v6  ;;  %s740_s17 = scalar_select %p739_p4, 1, 0 }
   0xf   : > { %s817_s29 = sshll.u32 %s1012_s28, 3  ;;  %s903_s9 = smul.u32 36, %s1012_s28  ;;  %v465_v47 = vmul.f32 %v464_v34, %v226_v37  ;;  %v518_v51 = vmul.f32 %v517_v41, %v1002_v11  ;;  %v572_v54 = vrot.slane %v230_v18, %v571_v43  ;;  %v736_v43 = vadd.f32 %v1000_v10, %v972_v0 }
  0x10   : > { %s208_s6 = scalar_lea.vmem %s1098_s3, %s817_s29  ;;  %v625_v57 = vrot.slane %v230_v18, %v624_v49  ;;  %s741_s18 = scvt.s32.f32 %s740_s17 }
  0x11   : > { %567 = vrot.lane.b32.xlu0 %v990_v6, %s932_s27  ;;  %v728_v13 = vld [vmem:[%s208_s6] sm:$0xff]  ;;  %s1027_s12 = scalar_lea.vmem %s1097_s2, %s903_s9  ;;  %v466_v53 = vpack.c.bf16 %v465_v47, %v465_v47  ;;  %v519_v58 = vpack.c.bf16 %v518_v51, %v518_v51  ;;  %v737_v49 = vadd.f32 %v736_v43, %v977_v1  ;;  %s212_s20 = scalar_lea.vmem %s1099_s4, %s817_s29 }
  0x12   : > { %731 = vperm.xlu1 %918, %v728_v13   ;;  %v233_v42 = vld [vmem:[%s1027_s12 + $0x4] sm:$0xf]  ;;  %v232_v50 = vld [vmem:[%s1027_s12] sm:$0xf]  ;;  %v234_v56 = vld [vmem:[%s1027_s12 + $0x8] sm:$0xf]  ;;  %v626_v62 = vmul.f32 %v625_v57, %v987_v5  ;;  %v680_v13 = vpack.c.bf16 %v679_v8, %v679_v8  ;;  %v742_v57 = vstv %s741_s18 }
  0x13   : > { %v471_v59 = vsel %vm261_vm5, %v466_v53, 0  ;;  %v235_v61 = vld [vmem:[%s1027_s12 + $0xc] sm:$0xf]  ;;  %v524_v2 = vsel %vm261_vm5, %v519_v58, 0  ;;  %v236_v4 = vld [vmem:[%s1027_s12 + $0x10] sm:$0xf] }
  0x14   : > { %v627_v7 = vpack.c.bf16 %v626_v62, %v626_v62  ;;  %v237_v11 = vld [vmem:[%s1027_s12 + $0x14] sm:$0xf]  ;;  %v238_v14 = vld [vmem:[%s1027_s12 + $0x18] sm:$0xf]  ;;  %v685_v6 = vsel %vm261_vm5, %v680_v13, 0 }
  0x15   : > { %v239_v15 = vld [vmem:[%s1027_s12 + $0x1c] sm:$0xf]  ;;  %v240_v16 = vld [vmem:[%s1027_s12 + $0x20] sm:$0xf] }
  0x16   : > { %v632_v12 = vsel %vm261_vm5, %v627_v7, 0 }
  0x7b   : > { %v250_v24 = vpop.permute.xlu0 %249 }
  0x7c   : > { %v352_v25 = vpop.permute.xlu1 %351  ;;  %v255_v28 = vmul.f32 %v254_v20, %v250_v24 }
  0x7d   : > { %v357_v29 = vmul.f32 %v356_v21, %v352_v25 }
  0x7e   : > { %v256_v32 = vpack.c.bf16 %v255_v28, %v255_v28 }
  0x7f   : > { %v358_v33 = vpack.c.bf16 %v357_v29, %v357_v29  ;;  %v242_v35 = vpop.permute.xlu0 %241 }
  0x80   : > { %v407_v36 = vpop.permute.xlu1 %406  ;;  %v247_v38 = vmul.f32 %v246_v26, %v242_v35  ;;  %v263_v39 = vsel %vm261_vm5, %v256_v32, 0 }
  0x81   : > { %v412_v40 = vmul.f32 %v411_v30, %v407_v36  ;;  %850 = vmatpush3.bf16.msra.mxu0 %v263_v39  ;;  %v363_v44 = vsel %vm261_vm5, %v358_v33, 0 }
  0x82   : > { %v248_v45 = vpack.c.bf16 %v247_v38, %v247_v38  ;;  %861 = vmatprep.subr.bf16.mxu0 %v928_v9 }
  0x83   : > { %v413_v46 = vpack.c.bf16 %v412_v40, %v412_v40  ;;  %v568_v55 = vpop.permute.xlu0 %567 }
  0x84   : > { %852 = vmatmul.mubr.msk.bf16.vlgmr.msra.gmra.mrb[0].mxu0 %vm257_vm6, %v233_v42  ;;  %v309_v48 = vsel %vm261_vm5, %v248_v45, 0  ;;  %v573_v60 = vmul.f32 %v572_v54, %v568_v55  ;;  %v738_v55 = vmul.f32 0.25, %v737_v49 }
  0x85   : > { %856 = vmatpush3.bf16.msra.mxu1 %v309_v48  ;;  %862 = vmatpush3.bf16.msra.mxu0 %v363_v44  ;;  %v418_v52 = vsel %vm261_vm5, %v413_v46, 0 }
  0x86   : > { %867 = vmatprep.subr.bf16.mxu1 %v928_v9  ;;  %863 = vmatprep.mubr.msk.bf16.mxu0 %vm929_vm3, %v928_v9  ;;  %v574_v63 = vpack.c.bf16 %v573_v60, %v573_v60 }
  0x87   : > { %873 = vmatprep.subr.bf16.mxu0 %v928_v9 }
  0x88   : > { %858 = vmatmul.mubr.msk.bf16.vlgmr.msra.gmra.mrb[0].mxu1 %vm257_vm6, %v232_v50  ;;  %v579_v5 = vsel %vm261_vm5, %v574_v63, 0 }
  0x89   : > { %868 = vmatpush3.bf16.msra.mxu1 %v418_v52  ;;  %869 = vmatprep.mubr.msk.bf16.mxu1 %vm929_vm3, %v928_v9 }
  0x8a   : > { %879 = vmatprep.subr.bf16.mxu1 %v928_v9 }
  0x8c   : > { %864 = vmatmul.mubr.msk.bf16.vlgmr.msra.gmra.mrb[4].mxu0 %vm257_vm6, %v234_v56 }
  0x8d   : > { %874 = vmatpush3.bf16.msra.mxu0 %v471_v59  ;;  %875 = vmatprep.mubr.msk.bf16.mxu0 %vm929_vm3, %v928_v9 }
  0x8e   : > { %885 = vmatprep.subr.bf16.mxu0 %v928_v9 }
  0x90   : > { %870 = vmatmul.mubr.msk.bf16.vlgmr.msra.gmra.mrb[4].mxu1 %vm257_vm6, %v235_v61  ;;  %v743_v61 = vmul.f32 %v742_v57, %v738_v55 }
  0x91   : > { %880 = vmatpush3.bf16.msra.mxu1 %v524_v2  ;;  %881 = vmatprep.mubr.msk.bf16.mxu1 %vm929_vm3, %v928_v9  ;;  %v732_v10 = vpop.permute.xlu1 %731 }
  0x92   : > { %891 = vmatprep.subr.bf16.mxu1 %v928_v9 }
  0x94   : > { %876 = vmatmul.mubr.msk.bf16.vlgmr.msra.gmra.mrb[8].mxu0 %vm257_vm6, %v236_v4 }
  0x95   : > { %886 = vmatpush3.bf16.msra.mxu0 %v579_v5  ;;  %887 = vmatprep.mubr.msk.bf16.mxu0 %vm929_vm3, %v928_v9 }
  0x96   : > { %897 = vmatprep.subr.bf16.mxu0 %v928_v9 }
  0x98   : > { %882 = vmatmul.mubr.msk.bf16.vlgmr.msra.gmra.mrb[8].mxu1 %vm257_vm6, %v237_v11 }
  0x99   : > { %892 = vmatpush3.bf16.msra.mxu1 %v632_v12  ;;  %893 = vmatprep.mubr.msk.bf16.mxu1 %vm929_vm3, %v928_v9 }
  0x9c   : > { %888 = vmatmul.mubr.msk.bf16.vlgmr.msra.gmra.mrb[12].mxu0 %vm257_vm6, %v238_v14 }
  0x9d   : > { %898 = vmatpush3.bf16.msra.mxu0 %v685_v6  ;;  %899 = vmatprep.mubr.msk.bf16.mxu0 %vm929_vm3, %v928_v9 }
  0xa0   : > { %894 = vmatmul.mubr.msk.bf16.vlgmr.msra.gmra.mrb[12].mxu1 %vm257_vm6, %v239_v15 }
  0xa4   : > { %900 = vmatmul.mubr.msk.bf16.vlgmr.msra.gmra.mrb[16].mxu0 %vm257_vm6, %v240_v16 }
 0x157   : > { %v299_v17 = vpop.f32.mrb[0].mxu0 }
 0x158   : > { %v853_v18 = vpop.f32.mrb[1].mxu0 }
 0x159   : > { %v302_v19 = vpop.f32.mrb[2].mxu0 }
 0x15a   : > { %v854_v20 = vpop.f32.mrb[3].mxu0 }
 0x15b   : > { %v345_v21 = vpop.f32.mrb[0].mxu1 }
 0x15c   : > { %v346_v22 = vadd.f32 %v345_v21, %v299_v17  ;;  %v859_v23 = vpop.f32.mrb[1].mxu1 }
 0x15d   : > { %v348_v24 = vpop.f32.mrb[2].mxu1 }
 0x15e   : > { %v860_v25 = vpop.f32.mrb[3].mxu1 }
 0x15f   : > { %v399_v26 = vpop.f32.mrb[4].mxu0 }
 0x160   : > { %v405_v27 = vadd.f32 %v399_v26, %v346_v22  ;;  %v865_v28 = vpop.f32.mrb[5].mxu0 }
 0x161   : > { %v402_v29 = vpop.f32.mrb[6].mxu0 }
 0x162   : > { %v866_v9 = vpop.f32.mrb[7].mxu0 }
 0x163   : > { %v454_v30 = vpop.f32.mrb[4].mxu1 }
 0x164   : > { %v460_v31 = vadd.f32 %v454_v30, %v405_v27  ;;  %v871_v32 = vpop.f32.mrb[5].mxu1 }
 0x165   : > { %v457_v33 = vpop.f32.mrb[6].mxu1 }
 0x166   : > { %v872_v34 = vpop.f32.mrb[7].mxu1 }
 0x167   : > { %v507_v35 = vpop.f32.mrb[8].mxu0 }
 0x168   : > { %v513_v36 = vadd.f32 %v507_v35, %v460_v31  ;;  %v877_v37 = vpop.f32.mrb[9].mxu0 }
 0x169   : > { %v510_v38 = vpop.f32.mrb[10].mxu0 }
 0x16a   : > { %v878_v39 = vpop.f32.mrb[11].mxu0 }
 0x16b   : > { %v560_v40 = vpop.f32.mrb[8].mxu1 }
 0x16c   : > { %v566_v41 = vadd.f32 %v560_v40, %v513_v36  ;;  %v883_v42 = vpop.f32.mrb[9].mxu1 }
 0x16d   : > { %v563_v44 = vpop.f32.mrb[10].mxu1 }
 0x16e   : > { %v884_v45 = vpop.f32.mrb[11].mxu1 }
 0x16f   : > { %v615_v46 = vpop.f32.mrb[12].mxu0 }
 0x170   : > { %v621_v47 = vadd.f32 %v615_v46, %v566_v41  ;;  %v889_v48 = vpop.f32.mrb[13].mxu0 }
 0x171   : > { %v618_v50 = vpop.f32.mrb[14].mxu0 }
 0x172   : > { %v890_v51 = vpop.f32.mrb[15].mxu0 }
 0x173   : > { %v668_v52 = vpop.f32.mrb[12].mxu1 }
 0x174   : > { %v674_v53 = vadd.f32 %v668_v52, %v621_v47  ;;  %v895_v54 = vpop.f32.mrb[13].mxu1 }
 0x175   : > { %v671_v56 = vpop.f32.mrb[14].mxu1 }
 0x176   : > { %v896_v58 = vpop.f32.mrb[15].mxu1 }
 0x177   : > { %v721_v0 = vpop.f32.mrb[16].mxu0 }
 0x178   : > { %v727_v59 = vadd.f32 %v721_v0, %v674_v53  ;;  %v901_v60 = vpop.f32.mrb[17].mxu0 }
 0x179   : > { %v724_v62 = vpop.f32.mrb[18].mxu0 }
 0x17a   : > { %v734_v63 = vadd.f32 %v732_v10, %v727_v59  ;;  %v902_v2 = vpop.f32.mrb[19].mxu0 }
 0x17c   : > { %v744_v1 = vadd.f32 %v743_v61, %v734_v63 }
 0x17e   : > { %745 = vst [vmem:[%s212_s20] sm:$0xff] %v744_v1 }
 0x17f PF: > { %s14_s15 = sadd.s32 1, %s926_s15  }
 0x180   : > { %p11_p5 = scmp.ge.s32.totalorder %s14_s15, 4  }
 0x182   :  { %13 = sbr.rel (!%p11_p5) target bundleno = 1 (0x1), region = 69 }

// kernel: unet2_forward.10
= control target key start
LH: loop header
LB: loop body
LE: loop exit
PB: predicated region body
PF: predicated region fallthrough
CT: control target
= control target key end

     0   :  { %s551_s18 = smov 0   ;;  %s591_s0 = inlined_call_operand.vmem [shape: f32[2,2,8,128], index: 0, kind: input, shape index: {}]   ;;  %s592_s1 = inlined_call_operand.vmem [shape: f32[8,128], index: 1, kind: input, shape index: {}]   ;;  %s593_s2 = inlined_call_operand.vmem [shape: f32[5,128], index: 2, kind: input, shape index: {}]   ;;  %s594_s3 = inlined_call_operand.vmem [shape: f32[2,2,8,128], index: 3, kind: output, shape index: {0}]   ;;  %s595_s4 = inlined_call_operand.vmem [shape: f32[2,2,8,1], index: 4, kind: output, shape index: {1}]   ;;  %s596_s5 = inlined_call_operand.vmem [shape: f32[2,2,8,1], index: 5, kind: output, shape index: {2}]  }
   0x1 LB: > { %s557_s19 = sadd.s32 4294967295, %s515_s18   ;;  %p478_p0 = scmp.ge.s32.totalorder %s515_s18, 1  ;;  %s515_s18 = sphi %s551_s18, %s16_s18  }
   0x2   : > { %p192_p1 = scmp.lt.s32.totalorder %s515_s18, 3 }
   0x4   : > { %p193_p2 = pnand %p478_p0, %p192_p1 }
   0x5   : > { %v250_v0 = vld [vmem:[%s592_s1] sm:$0xff] (!%p193_p2)  ;;  %s517_s22 = smov (!%p193_p2), 4   ;;  %s518_s23 = smov (!%p193_p2), 124   ;;  %v257_v1 = vlaneseq (!%p193_p2)  ;;  %vm332_vm0 = vcmask (!%p193_p2), 7168  }
   0x6   : > { %196 = sbr.rel (%p193_p2) target bundleno = 415 (0x19f), region = 32  ;;  %255 = vrot.lane.b32.xlu0 (!%p193_p2), %v250_v0, %s517_s22  ;;  %v251_v3 = vld [vmem:[%s593_s2] sm:$0x1f] (!%p193_p2)  ;;  %p252_p3 = scmp.eq.s32.totalorder (!%p193_p2), %s557_s19, 0  ;;  %v288_v26 = vmul.f32 (!%p193_p2), 0.75, %v250_v0 }
   0x7   : > { %v258_v2 = vshrl.u32 (!%p193_p2), %v257_v1, 7  ;;  %v262_v5 = vsub.f32 (!%p193_p2), 1.0, %v251_v3  ;;  %s519_s29 = smov (!%p193_p2), 1   ;;  %s520_s30 = smov (!%p193_p2), 127  }
   0x8   : > { %p230_p4 = scmp.lt.s32.totalorder (!%p193_p2), %s557_s19, 1 }
   0x9   : > { %v259_v4 = vsub.s32 (!%p193_p2), 1, %v258_v2  ;;  %v276_v6 = vsub.s32 (!%p193_p2), 2, %v258_v2  ;;  %v296_v23 = vsub.s32 (!%p193_p2), 3, %v258_v2  ;;  %v311_v24 = vsub.s32 (!%p193_p2), 4, %v258_v2 }
   0xa   : > { %272 = vrot.lane.b32.xlu0 (!%p193_p2), %v250_v0, %s518_s23  ;;  %v326_v38 = vsub.s32 (!%p193_p2), 0, %v258_v2 }
   0xb   : > { %v260_v7 = vrot.slane (!%p193_p2), %v251_v3, %v259_v4  ;;  %v266_v8 = vrot.slane (!%p193_p2), %v262_v5, %v259_v4  ;;  %v282_v9 = vrot.slane (!%p193_p2), %v262_v5, %v276_v6  ;;  %v277_v13 = vrot.slane (!%p193_p2), %v251_v3, %v276_v6 }
   0xc   : > { %v302_v28 = vrot.slane (!%p193_p2), %v262_v5, %v296_v23  ;;  %v317_v29 = vrot.slane (!%p193_p2), %v262_v5, %v311_v24  ;;  %v297_v33 = vrot.slane (!%p193_p2), %v251_v3, %v296_v23  ;;  %v312_v36 = vrot.slane (!%p193_p2), %v251_v3, %v311_v24 }
   0xd   : > { %s253_s26 = scalar_select %p252_p3, 1, 0  ;;  %v267_v12 = vmul.f32 %v266_v8, %v250_v0  ;;  %v283_v14 = vmul.f32 %v282_v9, %v250_v0  ;;  %v327_v46 = vrot.slane %v251_v3, %v326_v38 }
   0xe   : > { %s598_s19 = smov (!%p230_p4, %s557_s19), 1 }
   0xf   : > { %s254_s27 = scvt.s32.f32 %s253_s26  ;;  %s570_s6 = sshll.u32 %s598_s19, 4 }
  0x10   : > { %s234_s9 = scalar_lea.vmem %s591_s0, %s570_s6  ;;  %s239_s12 = scalar_lea.vmem %s594_s3, %s570_s6 }
  0x11   : > { %s271_s28 = ssub.f32 1.0, %s254_s27  ;;  %v269_v18 = vstv %s254_s27  ;;  %v322_v43 = vld [vmem:[%s234_s9] sm:$0xff]  ;;  %v487_v49 = vld [vmem:[%s234_s9 + $0x8] sm:$0xff]  ;;  %s244_s15 = scalar_lea.vmem %s595_s4, %s570_s6 }
  0x12   : > { %s249_s19 = scalar_lea.vmem %s596_s5, %s570_s6 }
  0x13   : > { %v285_v19 = vstv %s271_s28 }
  0x78   : > { %v256_v10 = vpop.permute.xlu0 %255 }
  0x79   : > { %v261_v11 = vmul.f32 %v260_v7, %v256_v10 }
  0x7b   : > { %v268_v16 = vadd.f32 %v267_v12, %v261_v11 }
  0x7c   : > { %v273_v15 = vpop.permute.xlu0 %272 }
  0x7d   : > { %v278_v17 = vmul.f32 %v277_v13, %v273_v15  ;;  %v270_v21 = vmul.f32 %v269_v18, %v268_v16 }
  0x7f   : > { %v284_v20 = vadd.f32 %v283_v14, %v278_v17 }
  0x81   : > { %v286_v22 = vmul.f32 %v285_v19, %v284_v20 }
  0x83   : > { %v287_v25 = vadd.f32 %v286_v22, %v270_v21 }
  0x85   : > { %v289_v27 = vmul.f32 0.25, %v287_v25 }
  0x87   : > { %v290_v30 = vadd.f32 %v289_v27, %v288_v26 }
  0x89   : > { %292 = vrot.lane.b32.xlu1 %v290_v30, %s519_s29  ;;  %v303_v31 = vmul.f32 %v302_v28, %v290_v30  ;;  %v318_v32 = vmul.f32 %v317_v29, %v290_v30  ;;  %v291_v40 = vmul.f32 0.75, %v290_v30 }
  0x8d   : > { %307 = vrot.lane.b32.xlu1 %v290_v30, %s520_s30 }
  0xfb   : > { %v293_v34 = vpop.permute.xlu1 %292 }
  0xfc   : > { %v298_v35 = vmul.f32 %v297_v33, %v293_v34 }
  0xfe   : > { %v304_v37 = vadd.f32 %v303_v31, %v298_v35 }
  0xff   : > { %v308_v39 = vpop.permute.xlu1 %307 }
 0x100   : > { %v305_v41 = vmul.f32 0.25, %v304_v37  ;;  %v313_v42 = vmul.f32 %v312_v36, %v308_v39 }
 0x102   : > { %v306_v44 = vadd.f32 %v305_v41, %v291_v40  ;;  %v319_v45 = vadd.f32 %v318_v32, %v313_v42 }
 0x104   : > { %v320_v47 = vmul.f32 0.25, %v319_v45  ;;  %v323_v48 = vadd.f32 %v322_v43, %v306_v44 }
 0x106   : > { %v321_v50 = vadd.f32 %v320_v47, %v291_v40  ;;  %v328_v51 = vmul.f32 %v327_v46, %v323_v48 }
 0x108   : > { %330 = vadd.xlane.f32.xlu0 %v328_v51  ;;  %329 = vst [vmem:[%s239_s12] sm:$0xff] %v328_v51  ;;  %v334_v52 = vmul.f32 %v328_v51, %v328_v51  ;;  %v340_v53 = vadd.f32 %v487_v49, %v321_v50 }
 0x10a   : > { %335 = vadd.xlane.f32.xlu1 %v334_v52  ;;  %v341_v54 = vmul.f32 %v340_v53, %v327_v46 }
 0x10c   : > { %488 = vst [vmem:[%s239_s12 + $0x8] sm:$0xff] %v341_v54  ;;  %344 = vadd.xlane.f32.xlu0 %v341_v54  ;;  %v348_v55 = vmul.f32 %v341_v54, %v341_v54 }
 0x110   : > { %349 = vadd.xlane.f32.xlu0 %v348_v55 }
 0x195   : > { %v331_v56 = vpop.xlane.xlu0 %330 }
 0x196   : > { %333 = vst.msk [vmem:[%s244_s15] sm:$0xff] %vm332_vm0, %v331_v56 }
 0x197   : > { %v336_v57 = vpop.xlane.xlu1 %335 }
 0x198   : > { %337 = vst.msk [vmem:[%s249_s19] sm:$0xff] %vm332_vm0, %v336_v57 }
 0x199   : > { %v345_v58 = vpop.xlane.xlu0 %344 }
 0x19a   : > { %489 = vst.msk [vmem:[%s244_s15 + $0x8] sm:$0xff] %vm332_vm0, %v345_v58 }
 0x19d   : > { %v350_v59 = vpop.xlane.xlu0 %349 }
 0x19e   : > { %490 = vst.msk [vmem:[%s249_s19 + $0x8] sm:$0xff] %vm332_vm0, %v350_v59 }
 0x19f PF: > { %s16_s18 = sadd.s32 1, %s515_s18  }
 0x1a0   : > { %p13_p5 = scmp.ge.s32.totalorder %s16_s18, 4  }
 0x1a2   :  { %15 = sbr.rel (!%p13_p5) target bundleno = 1 (0x1), region = 90 }

// kernel: unet2_forward.9
= control target key start
LH: loop header
LB: loop body
LE: loop exit
PB: predicated region body
PF: predicated region fallthrough
CT: control target
= control target key end

     0   :  { %s1061_s15 = smov 0   ;;  %s1177_s0 = inlined_call_operand.vmem [shape: f32[1,16,128], index: 0, kind: input, shape index: {}]   ;;  %s1178_s1 = inlined_call_operand.vmem [shape: f32[9,128], index: 1, kind: input, shape index: {}]   ;;  %s1179_s2 = inlined_call_operand.vmem [shape: bf16[2,9,16,16], index: 2, kind: input, shape index: {}]   ;;  %s1180_s3 = inlined_call_operand.vmem [shape: f32[2,16,1], index: 3, kind: input, shape index: {}]   ;;  %s1181_s4 = inlined_call_operand.vmem [shape: f32[2,16,128], index: 4, kind: output, shape index: {}]  }
   0x1 LB: > { %s881_s16 = sadd.s32 4294967295, %s1023_s15   ;;  %p885_p0 = scmp.ge.s32.totalorder %s1023_s15, 1  ;;  %s1023_s15 = sphi %s1061_s15, %s14_s15  }
   0x2   : > { %p172_p1 = scmp.lt.s32.totalorder %s1023_s15, 3 }
   0x4   : > { %p173_p2 = pnand %p885_p0, %p172_p1 }
   0x5   : > { %v219_v0 = vld [vmem:[%s1177_s0] sm:$0xff] (!%p173_p2)  ;;  %v220_v1 = vld [vmem:[%s1177_s0 + $0x8] sm:$0xff] (!%p173_p2)  ;;  %v251_v4 = vlaneseq (!%p173_p2)  ;;  %v1025_v5 = vmov (!%p173_p2), 0.0   ;;  %vm1026_vm2 = vmmov (!%p173_p2), 0   ;;  %s1027_s21 = smov (!%p173_p2), 5   ;;  %s1028_s22 = smov (!%p173_p2), 4  }
   0x6   : > { %176 = sbr.rel (%p173_p2) target bundleno = 386 (0x182), region = 36  ;;  %vm221_vm0 = vcmp.gt.f32.partialorder (!%p173_p2), %v219_v0, 0.0  ;;  %v223_v2 = vmul.f32 (!%p173_p2), 0.01, %v219_v0  ;;  %v224_v3 = vmul.f32 (!%p173_p2), 0.01, %v220_v1  ;;  %932 = vmatprep.subr.bf16.mxu0 (!%p173_p2), %v1025_v5  ;;  %938 = vmatprep.subr.bf16.mxu1 (!%p173_p2), %v1025_v5 }
   0x7   : > { %vm222_vm1 = vcmp.gt.f32.partialorder (!%p173_p2), %v220_v1, 0.0  ;;  %934 = vmatprep.mubr.msk.bf16.mxu0 (!%p173_p2), %vm1026_vm2, %v1025_v5  ;;  %940 = vmatprep.mubr.msk.bf16.mxu1 (!%p173_p2), %vm1026_vm2, %v1025_v5  ;;  %v1081_v8 = vshrl.u32 (!%p173_p2), %v251_v4, 7  ;;  %p203_p3 = scmp.lt.s32.totalorder (!%p173_p2), %s881_s16, 1  ;;  %v1089_v10 = vld [vmem:[%s1178_s1] sm:$0xff] (!%p173_p2)  ;;  %s1029_s29 = smov (!%p173_p2), 3   ;;  %v1035_v15 = vmov (!%p173_p2), 0  }
   0x8   : > { %v225_v6 = vsel (!%p173_p2), %vm221_vm0, %v219_v0, %v223_v2  ;;  %v226_v7 = vsel (!%p173_p2), %vm222_vm1, %v220_v1, %v224_v3  ;;  %s1030_s30 = smov (!%p173_p2), 1   ;;  %s1031_s5 = smov (!%p173_p2), 127   ;;  %1006 = vset.pattern.permute.xlu0 (!%p173_p2), %v1035_v15  ;;  %1007 = vset.pattern.permute.xlu1 (!%p173_p2), %v1035_v15  ;;  %vm274_vm3 = vcmask (!%p173_p2), 130048  }
   0x9   : > { %247 = vrot.lane.b32.xlu1 (!%p173_p2), %v225_v6, %s1027_s21  ;;  %258 = vrot.lane.b32.xlu0 (!%p173_p2), %v225_v6, %s1028_s22  ;;  %v494_v9 = vsub.s32 (!%p173_p2), 4, %v1081_v8  ;;  %s1032_s6 = smov (!%p173_p2), 125   ;;  %s1033_s7 = smov (!%p173_p2), 124   ;;  %v253_v18 = vsub.s32 (!%p173_p2), 0, %v1081_v8  ;;  %v264_v19 = vsub.s32 (!%p173_p2), 1, %v1081_v8  ;;  %v374_v24 = vsub.s32 (!%p173_p2), 2, %v1081_v8 }
   0xa   : > { %s1034_s8 = smov (!%p173_p2), 123   ;;  %v436_v28 = vsub.s32 (!%p173_p2), 3, %v1081_v8  ;;  %v556_v42 = vsub.s32 (!%p173_p2), 5, %v1081_v8  ;;  %v618_v49 = vsub.s32 (!%p173_p2), 6, %v1081_v8  ;;  %v680_v58 = vsub.s32 (!%p173_p2), 7, %v1081_v8 }
   0xb   : > { %v495_v11 = vrot.slane (!%p173_p2), %v1089_v10, %v494_v9  ;;  %v254_v20 = vrot.slane (!%p173_p2), %v1089_v10, %v253_v18  ;;  %v265_v23 = vrot.slane (!%p173_p2), %v1089_v10, %v264_v19  ;;  %v375_v32 = vrot.slane (!%p173_p2), %v1089_v10, %v374_v24  ;;  %v907_v9 = vld [vmem:[%s1178_s1 + $0x8] ss:$0 sm:$0xff] (!%p173_p2) }
   0xc   : > { %v437_v41 = vrot.slane (!%p173_p2), %v1089_v10, %v436_v28  ;;  %v557_v48 = vrot.slane (!%p173_p2), %v1089_v10, %v556_v42  ;;  %v619_v57 = vrot.slane (!%p173_p2), %v1089_v10, %v618_v49  ;;  %v681_v0 = vrot.slane (!%p173_p2), %v1089_v10, %v680_v58 }
   0xd   : > { %s1183_s16 = smov (!%p203_p3, %s881_s16), 1  ;;  %249 = vrot.lane.b32.xlu1 %v226_v7, %s1027_s21  ;;  %260 = vrot.lane.b32.xlu0 %v226_v7, %s1028_s22  ;;  %v1098_v12 = vmul.f32 %v495_v11, %v225_v6  ;;  %v1100_v13 = vmul.f32 %v495_v11, %v226_v7 }
   0xe   : > { %s986_s25 = smul.u32 72, %s1183_s16  ;;  %s912_s9 = sshll.u32 %s1183_s16, 4 }
   0xf   : > { %v498_v14 = vpack.c.bf16 %v1100_v13, %v1098_v12  ;;  %s212_s12 = scalar_lea.vmem %s1180_s3, %s912_s9  ;;  %s217_s19 = scalar_lea.vmem %s1181_s4, %s912_s9 }
  0x10   : > { %s1096_s28 = scalar_lea.vmem %s1179_s2, %s986_s25  ;;  %v798_v16 = vld [vmem:[%s212_s12] sm:$0xff]  ;;  %v799_v17 = vld [vmem:[%s212_s12 + $0x8] sm:$0xff] }
  0x11   : > { %370 = vrot.lane.b32.xlu1 %v226_v7, %s1029_s29  ;;  %368 = vrot.lane.b32.xlu0 %v225_v6, %s1029_s29  ;;  %v1008_v37 = vld [vmem:[%s1096_s28 + $0x8] sm:$0xff]   ;;  %v1009_v38 = vld [vmem:[%s1096_s28] sm:$0xff]  }
  0x12   : > { %v1010_v53 = vld [vmem:[%s1096_s28 + $0x10] sm:$0xff]   ;;  %v1011_v54 = vld [vmem:[%s1096_s28 + $0x18] sm:$0xff]   ;;  %v1012_v3 = vld [vmem:[%s1096_s28 + $0x20] sm:$0xff]  }
  0x13   : > { %v1013_v4 = vld [vmem:[%s1096_s28 + $0x28] sm:$0xff]   ;;  %v1014_v15 = vld [vmem:[%s1096_s28 + $0x30] sm:$0xff]   ;;  %v1016_v18 = vld [vmem:[%s1096_s28 + $0x40] sm:$0xff]  }
  0x15   : > { %432 = vrot.lane.b32.xlu1 %v226_v7, %s1030_s30  ;;  %430 = vrot.lane.b32.xlu0 %v225_v6, %s1030_s30 }
  0x19   : > { %552 = vrot.lane.b32.xlu1 %v226_v7, %s1031_s5  ;;  %550 = vrot.lane.b32.xlu0 %v225_v6, %s1031_s5 }
  0x1d   : > { %614 = vrot.lane.b32.xlu1 %v226_v7, %s1032_s6  ;;  %612 = vrot.lane.b32.xlu0 %v225_v6, %s1032_s6 }
  0x21   : > { %676 = vrot.lane.b32.xlu1 %v226_v7, %s1033_s7  ;;  %674 = vrot.lane.b32.xlu0 %v225_v6, %s1033_s7 }
  0x25   : > { %738 = vrot.lane.b32.xlu1 %v226_v7, %s1034_s8  ;;  %736 = vrot.lane.b32.xlu0 %v225_v6, %s1034_s8 }
  0x29   : > { %802 = vperm.xlu0 %1006, %v798_v16   ;;  %807 = vperm.xlu1 %1007, %v799_v17   ;;  %v1015_v16 = vld [vmem:[%s1096_s28 + $0x38] sm:$0xff]  }
  0x7b   : > { %v248_v21 = vpop.permute.xlu1 %247  ;;  %v259_v22 = vpop.permute.xlu0 %258 }
  0x7c   : > { %v255_v25 = vmul.f32 %v254_v20, %v248_v21  ;;  %v266_v29 = vmul.f32 %v265_v23, %v259_v22 }
  0x7f   : > { %v250_v26 = vpop.permute.xlu1 %249  ;;  %v261_v27 = vpop.permute.xlu0 %260 }
  0x80   : > { %v256_v30 = vmul.f32 %v254_v20, %v250_v26  ;;  %v267_v31 = vmul.f32 %v265_v23, %v261_v27 }
  0x82   : > { %v268_v33 = vpack.c.bf16 %v267_v31, %v266_v29  ;;  %v257_v34 = vpack.c.bf16 %v256_v30, %v255_v25 }
  0x83   : > { %v371_v35 = vpop.permute.xlu1 %370  ;;  %v369_v36 = vpop.permute.xlu0 %368 }
  0x84   : > { %v377_v39 = vmul.f32 %v375_v32, %v371_v35  ;;  %v376_v40 = vmul.f32 %v375_v32, %v369_v36  ;;  %933 = vmatpush3.bf16.msra.mxu0 %v268_v33  ;;  %939 = vmatpush3.bf16.msra.mxu1 %v257_v34 }
  0x85   : > { %944 = vmatprep.subr.bf16.mxu0 %v1025_v5  ;;  %950 = vmatprep.subr.bf16.mxu1 %v1025_v5 }
  0x86   : > { %v378_v43 = vpack.c.bf16 %v377_v39, %v376_v40 }
  0x87   : > { %935 = vmatmul.mubr.msk.bf16.vlgmr.msra.gmra.mrb[0].mxu0 %vm274_vm3, %v1008_v37  ;;  %941 = vmatmul.mubr.msk.bf16.vlgmr.msra.gmra.mrb[0].mxu1 %vm274_vm3, %v1009_v38  ;;  %v433_v44 = vpop.permute.xlu1 %432  ;;  %v431_v45 = vpop.permute.xlu0 %430 }
  0x88   : > { %945 = vmatpush3.bf16.msra.mxu0 %v378_v43  ;;  %v439_v46 = vmul.f32 %v437_v41, %v433_v44  ;;  %v438_v47 = vmul.f32 %v437_v41, %v431_v45  ;;  %946 = vmatprep.mubr.msk.bf16.mxu0 %vm1026_vm2, %v1025_v5 }
  0x89   : > { %956 = vmatprep.subr.bf16.mxu0 %v1025_v5  ;;  %952 = vmatprep.mubr.msk.bf16.mxu1 %vm1026_vm2, %v1025_v5 }
  0x8a   : > { %v440_v50 = vpack.c.bf16 %v439_v46, %v438_v47 }
  0x8b   : > { %v553_v51 = vpop.permute.xlu1 %552  ;;  %v551_v52 = vpop.permute.xlu0 %550 }
  0x8c   : > { %951 = vmatpush3.bf16.msra.mxu1 %v440_v50  ;;  %v559_v55 = vmul.f32 %v557_v48, %v553_v51  ;;  %v558_v56 = vmul.f32 %v557_v48, %v551_v52 }
  0x8d   : > { %962 = vmatprep.subr.bf16.mxu1 %v1025_v5 }
  0x8e   : > { %v560_v59 = vpack.c.bf16 %v559_v55, %v558_v56 }
  0x8f   : > { %947 = vmatmul.mubr.msk.bf16.vlgmr.msra.gmra.mrb[4].mxu0 %vm274_vm3, %v1010_v53  ;;  %953 = vmatmul.mubr.msk.bf16.vlgmr.msra.gmra.mrb[4].mxu1 %vm274_vm3, %v1011_v54  ;;  %v615_v60 = vpop.permute.xlu1 %614  ;;  %v613_v61 = vpop.permute.xlu0 %612 }
  0x90   : > { %957 = vmatpush3.bf16.msra.mxu0 %v498_v14  ;;  %v621_v62 = vmul.f32 %v619_v57, %v615_v60  ;;  %v620_v63 = vmul.f32 %v619_v57, %v613_v61  ;;  %963 = vmatpush3.bf16.msra.mxu1 %v560_v59 }
  0x91   : > { %958 = vmatprep.mubr.msk.bf16.mxu0 %vm1026_vm2, %v1025_v5  ;;  %968 = vmatprep.subr.bf16.mxu0 %v1025_v5 }
  0x92   : > { %964 = vmatprep.mubr.msk.bf16.mxu1 %vm1026_vm2, %v1025_v5  ;;  %974 = vmatprep.subr.bf16.mxu1 %v1025_v5  ;;  %v622_v6 = vpack.c.bf16 %v621_v62, %v620_v63 }
  0x93   : > { %v677_v1 = vpop.permute.xlu1 %676  ;;  %v675_v2 = vpop.permute.xlu0 %674 }
  0x94   : > { %v683_v7 = vmul.f32 %v681_v0, %v677_v1  ;;  %v682_v8 = vmul.f32 %v681_v0, %v675_v2 }
  0x96   : > { %v684_v10 = vpack.c.bf16 %v683_v7, %v682_v8 }
  0x97   : > { %959 = vmatmul.mubr.msk.bf16.vlgmr.msra.gmra.mrb[8].mxu0 %vm274_vm3, %v1012_v3  ;;  %965 = vmatmul.mubr.msk.bf16.vlgmr.msra.gmra.mrb[8].mxu1 %vm274_vm3, %v1013_v4  ;;  %v739_v11 = vpop.permute.xlu1 %738  ;;  %v737_v12 = vpop.permute.xlu0 %736 }
  0x98   : > { %969 = vmatpush3.bf16.msra.mxu0 %v622_v6  ;;  %v745_v13 = vmul.f32 %v907_v9, %v739_v11  ;;  %v744_v14 = vmul.f32 %v907_v9, %v737_v12  ;;  %975 = vmatpush3.bf16.msra.mxu1 %v684_v10 }
  0x99   : > { %970 = vmatprep.mubr.msk.bf16.mxu0 %vm1026_vm2, %v1025_v5  ;;  %980 = vmatprep.subr.bf16.mxu0 %v1025_v5 }
  0x9a   : > { %976 = vmatprep.mubr.msk.bf16.mxu1 %vm1026_vm2, %v1025_v5  ;;  %v746_v17 = vpack.c.bf16 %v745_v13, %v744_v14 }
  0x9f   : > { %971 = vmatmul.mubr.msk.bf16.vlgmr.msra.gmra.mrb[12].mxu0 %vm274_vm3, %v1014_v15  ;;  %977 = vmatmul.mubr.msk.bf16.vlgmr.msra.gmra.mrb[12].mxu1 %vm274_vm3, %v1015_v16 }
  0xa0   : > { %981 = vmatpush3.bf16.msra.mxu0 %v746_v17  ;;  %982 = vmatprep.mubr.msk.bf16.mxu0 %vm1026_vm2, %v1025_v5 }
  0xa7   : > { %983 = vmatmul.mubr.msk.bf16.vlgmr.msra.gmra.mrb[16].mxu0 %vm274_vm3, %v1016_v18 }
  0xa8   : > { %v803_v1 = vpop.permute.xlu0 %802  ;;  %v808_v6 = vpop.permute.xlu1 %807 }
 0x15a   : > { %v312_v19 = vpop.f32.mrb[0].mxu0  ;;  %v361_v20 = vpop.f32.mrb[0].mxu1 }
 0x15b   : > { %v362_v21 = vadd.f32 %v361_v20, %v312_v19  ;;  %v936_v22 = vpop.f32.mrb[1].mxu0  ;;  %v942_v23 = vpop.f32.mrb[1].mxu1 }
 0x15c   : > { %v315_v24 = vpop.f32.mrb[2].mxu0  ;;  %v364_v25 = vpop.f32.mrb[2].mxu1 }
 0x15d   : > { %v365_v26 = vadd.f32 %v364_v25, %v315_v24  ;;  %v937_v27 = vpop.f32.mrb[3].mxu0  ;;  %v943_v28 = vpop.f32.mrb[3].mxu1 }
 0x162   : > { %v421_v29 = vpop.f32.mrb[4].mxu0  ;;  %v483_v30 = vpop.f32.mrb[4].mxu1 }
 0x163   : > { %v428_v31 = vadd.f32 %v421_v29, %v362_v21  ;;  %v948_v32 = vpop.f32.mrb[5].mxu0  ;;  %v954_v33 = vpop.f32.mrb[5].mxu1 }
 0x164   : > { %v424_v34 = vpop.f32.mrb[6].mxu0  ;;  %v486_v5 = vpop.f32.mrb[6].mxu1 }
 0x165   : > { %v429_v35 = vadd.f32 %v424_v34, %v365_v26  ;;  %v490_v36 = vadd.f32 %v483_v30, %v428_v31  ;;  %v949_v37 = vpop.f32.mrb[7].mxu0  ;;  %v955_v38 = vpop.f32.mrb[7].mxu1 }
 0x167   : > { %v491_v39 = vadd.f32 %v486_v5, %v429_v35 }
 0x16a   : > { %v541_v40 = vpop.f32.mrb[8].mxu0  ;;  %v603_v41 = vpop.f32.mrb[8].mxu1 }
 0x16b   : > { %v548_v42 = vadd.f32 %v541_v40, %v490_v36  ;;  %v960_v43 = vpop.f32.mrb[9].mxu0  ;;  %v966_v44 = vpop.f32.mrb[9].mxu1 }
 0x16c   : > { %v544_v45 = vpop.f32.mrb[10].mxu0  ;;  %v606_v46 = vpop.f32.mrb[10].mxu1 }
 0x16d   : > { %v549_v47 = vadd.f32 %v544_v45, %v491_v39  ;;  %v610_v48 = vadd.f32 %v603_v41, %v548_v42  ;;  %v961_v49 = vpop.f32.mrb[11].mxu0  ;;  %v967_v50 = vpop.f32.mrb[11].mxu1 }
 0x16f   : > { %v611_v51 = vadd.f32 %v606_v46, %v549_v47 }
 0x172   : > { %v665_v52 = vpop.f32.mrb[12].mxu0  ;;  %v727_v53 = vpop.f32.mrb[12].mxu1 }
 0x173   : > { %v672_v54 = vadd.f32 %v665_v52, %v610_v48  ;;  %v972_v55 = vpop.f32.mrb[13].mxu0  ;;  %v978_v56 = vpop.f32.mrb[13].mxu1 }
 0x174   : > { %v668_v57 = vpop.f32.mrb[14].mxu0  ;;  %v730_v58 = vpop.f32.mrb[14].mxu1 }
 0x175   : > { %v673_v59 = vadd.f32 %v668_v57, %v611_v51  ;;  %v734_v60 = vadd.f32 %v727_v53, %v672_v54  ;;  %v973_v61 = vpop.f32.mrb[15].mxu0  ;;  %v979_v62 = vpop.f32.mrb[15].mxu1 }
 0x177   : > { %v735_v63 = vadd.f32 %v730_v58, %v673_v59 }
 0x17a   : > { %v789_v0 = vpop.f32.mrb[16].mxu0 }
 0x17b   : > { %v796_v2 = vadd.f32 %v789_v0, %v734_v60  ;;  %v984_v3 = vpop.f32.mrb[17].mxu0 }
 0x17c   : > { %v792_v4 = vpop.f32.mrb[18].mxu0 }
 0x17d   : > { %v810_v7 = vadd.f32 %v803_v1, %v796_v2  ;;  %v797_v8 = vadd.f32 %v792_v4, %v735_v63  ;;  %v985_v9 = vpop.f32.mrb[19].mxu0 }
 0x17f   : > { %812 = vst [vmem:[%s217_s19] sm:$0xff] %v810_v7  ;;  %v811_v10 = vadd.f32 %v808_v6, %v797_v8 }
 0x181   : > { %813 = vst [vmem:[%s217_s19 + $0x8] sm:$0xff] %v811_v10 }
 0x182 PF: > { %s14_s15 = sadd.s32 1, %s1023_s15  }
 0x183   : > { %p11_p4 = scmp.ge.s32.totalorder %s14_s15, 4  }
 0x185   :  { %13 = sbr.rel (!%p11_p4) target bundleno = 1 (0x1), region = 69 }

// kernel: unet2_forward.12
= control target key start
LH: loop header
LB: loop body
LE: loop exit
PB: predicated region body
PF: predicated region fallthrough
CT: control target
= control target key end

     0   :  { %s556_s18 = smov 0   ;;  %s600_s0 = inlined_call_operand.vmem [shape: f32[2,2,4,128], index: 0, kind: input, shape index: {}]   ;;  %s601_s1 = inlined_call_operand.vmem [shape: f32[4,128], index: 1, kind: input, shape index: {}]   ;;  %s602_s2 = inlined_call_operand.vmem [shape: f32[5,128], index: 2, kind: input, shape index: {}]   ;;  %s603_s3 = inlined_call_operand.vmem [shape: f32[2,2,4,128], index: 3, kind: output, shape index: {0}]   ;;  %s604_s4 = inlined_call_operand.vmem [shape: f32[2,2,4,1], index: 4, kind: output, shape index: {1}]   ;;  %s605_s5 = inlined_call_operand.vmem [shape: f32[2,2,4,1], index: 5, kind: output, shape index: {2}]  }
   0x1 LB: > { %s562_s19 = sadd.s32 4294967295, %s520_s18   ;;  %p483_p0 = scmp.ge.s32.totalorder %s520_s18, 1  ;;  %s520_s18 = sphi %s556_s18, %s16_s18  }
   0x2   : > { %p192_p1 = scmp.lt.s32.totalorder %s520_s18, 3 }
   0x4   : > { %p193_p2 = pnand %p483_p0, %p192_p1 }
   0x5   : > { %v250_v0 = vld [vmem:[%s601_s1] sm:$0xf] (!%p193_p2)  ;;  %s522_s22 = smov (!%p193_p2), 8   ;;  %s523_s23 = smov (!%p193_p2), 120   ;;  %v257_v1 = vlaneseq (!%p193_p2)  ;;  %vm330_vm0 = vcmask (!%p193_p2), 1043456   ;;  %vm334_vm1 = vcmask (!%p193_p2), 3072  }
   0x6   : > { %196 = sbr.rel (%p193_p2) target bundleno = 416 (0x1a0), region = 32  ;;  %255 = vrot.lane.b32.xlu0 (!%p193_p2), %v250_v0, %s522_s22  ;;  %v251_v3 = vld [vmem:[%s602_s2] sm:$0x1f] (!%p193_p2)  ;;  %p252_p3 = scmp.eq.s32.totalorder (!%p193_p2), %s562_s19, 0  ;;  %v288_v26 = vmul.f32 (!%p193_p2), 0.75, %v250_v0 }
   0x7   : > { %v258_v2 = vshrl.u32 (!%p193_p2), %v257_v1, 7  ;;  %v262_v5 = vsub.f32 (!%p193_p2), 1.0, %v251_v3  ;;  %s524_s29 = smov (!%p193_p2), 1   ;;  %s525_s30 = smov (!%p193_p2), 127  }
   0x8   : > { %p230_p4 = scmp.lt.s32.totalorder (!%p193_p2), %s562_s19, 1 }
   0x9   : > { %v259_v4 = vsub.s32 (!%p193_p2), 1, %v258_v2  ;;  %v276_v6 = vsub.s32 (!%p193_p2), 2, %v258_v2  ;;  %v296_v23 = vsub.s32 (!%p193_p2), 3, %v258_v2  ;;  %v311_v24 = vsub.s32 (!%p193_p2), 4, %v258_v2 }
   0xa   : > { %272 = vrot.lane.b32.xlu0 (!%p193_p2), %v250_v0, %s523_s23  ;;  %v326_v38 = vsub.s32 (!%p193_p2), 0, %v258_v2 }
   0xb   : > { %v260_v7 = vrot.slane (!%p193_p2), %v251_v3, %v259_v4  ;;  %v266_v8 = vrot.slane (!%p193_p2), %v262_v5, %v259_v4  ;;  %v282_v9 = vrot.slane (!%p193_p2), %v262_v5, %v276_v6  ;;  %v277_v13 = vrot.slane (!%p193_p2), %v251_v3, %v276_v6 }
   0xc   : > { %v302_v28 = vrot.slane (!%p193_p2), %v262_v5, %v296_v23  ;;  %v317_v29 = vrot.slane (!%p193_p2), %v262_v5, %v311_v24  ;;  %v297_v33 = vrot.slane (!%p193_p2), %v251_v3, %v296_v23  ;;  %v312_v36 = vrot.slane (!%p193_p2), %v251_v3, %v311_v24 }
   0xd   : > { %s253_s26 = scalar_select %p252_p3, 1, 0  ;;  %v267_v12 = vmul.f32 %v266_v8, %v250_v0  ;;  %v283_v14 = vmul.f32 %v282_v9, %v250_v0  ;;  %v327_v46 = vrot.slane %v251_v3, %v326_v38 }
   0xe   : > { %s607_s19 = smov (!%p230_p4, %s562_s19), 1 }
   0xf   : > { %s254_s27 = scvt.s32.f32 %s253_s26  ;;  %s575_s6 = sshll.u32 %s607_s19, 3 }
  0x10   : > { %s234_s9 = scalar_lea.vmem %s600_s0, %s575_s6  ;;  %s239_s12 = scalar_lea.vmem %s603_s3, %s575_s6 }
  0x11   : > { %s271_s28 = ssub.f32 1.0, %s254_s27  ;;  %v269_v18 = vstv %s254_s27  ;;  %v322_v43 = vld [vmem:[%s234_s9] sm:$0xf]  ;;  %v492_v49 = vld [vmem:[%s234_s9 + $0x4] sm:$0xf]  ;;  %s244_s15 = scalar_lea.vmem %s604_s4, %s575_s6 }
  0x12   : > { %s249_s19 = scalar_lea.vmem %s605_s5, %s575_s6 }
  0x13   : > { %v285_v19 = vstv %s271_s28 }
  0x78   : > { %v256_v10 = vpop.permute.xlu0 %255 }
  0x79   : > { %v261_v11 = vmul.f32 %v260_v7, %v256_v10 }
  0x7b   : > { %v268_v16 = vadd.f32 %v267_v12, %v261_v11 }
  0x7c   : > { %v273_v15 = vpop.permute.xlu0 %272 }
  0x7d   : > { %v278_v17 = vmul.f32 %v277_v13, %v273_v15  ;;  %v270_v21 = vmul.f32 %v269_v18, %v268_v16 }
  0x7f   : > { %v284_v20 = vadd.f32 %v283_v14, %v278_v17 }
  0x81   : > { %v286_v22 = vmul.f32 %v285_v19, %v284_v20 }
  0x83   : > { %v287_v25 = vadd.f32 %v286_v22, %v270_v21 }
  0x85   : > { %v289_v27 = vmul.f32 0.25, %v287_v25 }
  0x87   : > { %v290_v30 = vadd.f32 %v289_v27, %v288_v26 }
  0x89   : > { %292 = vrot.lane.b32.xlu1 %v290_v30, %s524_s29  ;;  %v303_v31 = vmul.f32 %v302_v28, %v290_v30  ;;  %v318_v32 = vmul.f32 %v317_v29, %v290_v30  ;;  %v291_v40 = vmul.f32 0.75, %v290_v30 }
  0x8d   : > { %307 = vrot.lane.b32.xlu1 %v290_v30, %s525_s30 }
  0xfb   : > { %v293_v34 = vpop.permute.xlu1 %292 }
  0xfc   : > { %v298_v35 = vmul.f32 %v297_v33, %v293_v34 }
  0xfe   : > { %v304_v37 = vadd.f32 %v303_v31, %v298_v35 }
  0xff   : > { %v308_v39 = vpop.permute.xlu1 %307 }
 0x100   : > { %v305_v41 = vmul.f32 0.25, %v304_v37  ;;  %v313_v42 = vmul.f32 %v312_v36, %v308_v39 }
 0x102   : > { %v306_v44 = vadd.f32 %v305_v41, %v291_v40  ;;  %v319_v45 = vadd.f32 %v318_v32, %v313_v42 }
 0x104   : > { %v320_v47 = vmul.f32 0.25, %v319_v45  ;;  %v323_v48 = vadd.f32 %v322_v43, %v306_v44 }
 0x106   : > { %v321_v50 = vadd.f32 %v320_v47, %v291_v40  ;;  %v328_v51 = vmul.f32 %v327_v46, %v323_v48 }
 0x108   : > { %v331_v52 = vsel %vm330_vm0, %v328_v51, 0.0  ;;  %329 = vst [vmem:[%s239_s12] sm:$0xf] %v328_v51  ;;  %v336_v53 = vmul.f32 %v328_v51, %v328_v51  ;;  %v343_v54 = vadd.f32 %v492_v49, %v321_v50 }
 0x109   : > { %332 = vadd.xlane.f32.xlu0 %v331_v52 }
 0x10a   : > { %v337_v55 = vsel %vm330_vm0, %v336_v53, 0.0  ;;  %v344_v56 = vmul.f32 %v343_v54, %v327_v46 }
 0x10b   : > { %338 = vadd.xlane.f32.xlu1 %v337_v55 }
 0x10c   : > { %493 = vst [vmem:[%s239_s12 + $0x4] sm:$0xf] %v344_v56  ;;  %v347_v57 = vsel %vm330_vm0, %v344_v56, 0.0  ;;  %v352_v58 = vmul.f32 %v344_v56, %v344_v56 }
 0x10d   : > { %348 = vadd.xlane.f32.xlu0 %v347_v57 }
 0x10e   : > { %v353_v59 = vsel %vm330_vm0, %v352_v58, 0.0 }
 0x111   : > { %354 = vadd.xlane.f32.xlu0 %v353_v59 }
 0x196   : > { %v333_v60 = vpop.xlane.xlu0 %332 }
 0x197   : > { %335 = vst.msk [vmem:[%s244_s15] sm:$0xf] %vm334_vm1, %v333_v60 }
 0x198   : > { %v339_v61 = vpop.xlane.xlu1 %338 }
 0x199   : > { %340 = vst.msk [vmem:[%s249_s19] sm:$0xf] %vm334_vm1, %v339_v61 }
 0x19a   : > { %v349_v62 = vpop.xlane.xlu0 %348 }
 0x19b   : > { %494 = vst.msk [vmem:[%s244_s15 + $0x4] sm:$0xf] %vm334_vm1, %v349_v62 }
 0x19e   : > { %v355_v63 = vpop.xlane.xlu0 %354 }
 0x19f   : > { %495 = vst.msk [vmem:[%s249_s19 + $0x4] sm:$0xf] %vm334_vm1, %v355_v63 }
 0x1a0 PF: > { %s16_s18 = sadd.s32 1, %s520_s18  }
 0x1a1   : > { %p13_p5 = scmp.ge.s32.totalorder %s16_s18, 4  }
 0x1a3   :  { %15 = sbr.rel (!%p13_p5) target bundleno = 1 (0x1), region = 90 }

// kernel: unet2_forward.11
= control target key start
LH: loop header
LB: loop body
LE: loop exit
PB: predicated region body
PF: predicated region fallthrough
CT: control target
= control target key end

     0   :  { %s953_s15 = smov 0   ;;  %s1073_s0 = inlined_call_operand.vmem [shape: f32[1,16,128], index: 0, kind: input, shape index: {}]   ;;  %s1074_s1 = inlined_call_operand.vmem [shape: f32[9,128], index: 1, kind: input, shape index: {}]   ;;  %s1075_s2 = inlined_call_operand.vmem [shape: bf16[2,9,8,16], index: 2, kind: input, shape index: {}]   ;;  %s1076_s3 = inlined_call_operand.vmem [shape: f32[2,8,1], index: 3, kind: input, shape index: {}]   ;;  %s1077_s4 = inlined_call_operand.vmem [shape: f32[2,8,128], index: 4, kind: output, shape index: {}]  }
   0x1 LB: > { %s796_s16 = sadd.s32 4294967295, %s915_s15   ;;  %p800_p0 = scmp.ge.s32.totalorder %s915_s15, 1  ;;  %s915_s15 = sphi %s953_s15, %s14_s15  }
   0x2   : > { %p171_p1 = scmp.lt.s32.totalorder %s915_s15, 3 }
   0x4   : > { %p172_p2 = pnand %p800_p0, %p171_p1 }
   0x5   : > { %v214_v0 = vld [vmem:[%s1073_s0] sm:$0xff] (!%p172_p2)  ;;  %v215_v1 = vld [vmem:[%s1073_s0 + $0x8] sm:$0xff] (!%p172_p2)  ;;  %v237_v4 = vlaneseq (!%p172_p2)  ;;  %v917_v5 = vmov (!%p172_p2), 0.0   ;;  %vm918_vm2 = vmmov (!%p172_p2), 0   ;;  %s919_s21 = smov (!%p172_p2), 9   ;;  %s920_s22 = smov (!%p172_p2), 8  }
   0x6   : > { %175 = sbr.rel (%p172_p2) target bundleno = 384 (0x180), region = 36  ;;  %vm216_vm0 = vcmp.gt.f32.partialorder (!%p172_p2), %v214_v0, 0.0  ;;  %v218_v2 = vmul.f32 (!%p172_p2), 0.01, %v214_v0  ;;  %v219_v3 = vmul.f32 (!%p172_p2), 0.01, %v215_v1  ;;  %834 = vmatprep.subr.bf16.mxu0 (!%p172_p2), %v917_v5  ;;  %840 = vmatprep.subr.bf16.mxu1 (!%p172_p2), %v917_v5 }
   0x7   : > { %vm217_vm1 = vcmp.gt.f32.partialorder (!%p172_p2), %v215_v1, 0.0  ;;  %836 = vmatprep.mubr.msk.bf16.mxu0 (!%p172_p2), %vm918_vm2, %v917_v5  ;;  %842 = vmatprep.mubr.msk.bf16.mxu1 (!%p172_p2), %vm918_vm2, %v917_v5  ;;  %v973_v8 = vshrl.u32 (!%p172_p2), %v237_v4, 7  ;;  %v979_v10 = vld [vmem:[%s1074_s1] sm:$0xff] (!%p172_p2)  ;;  %s921_s25 = smov (!%p172_p2), 7   ;;  %s922_s26 = smov (!%p172_p2), 1   ;;  %v927_v15 = vmov (!%p172_p2), 0  }
   0x8   : > { %v220_v6 = vsel (!%p172_p2), %vm216_vm0, %v214_v0, %v218_v2  ;;  %v221_v7 = vsel (!%p172_p2), %vm217_vm1, %v215_v1, %v219_v3  ;;  %s923_s27 = smov (!%p172_p2), 127   ;;  %s924_s28 = smov (!%p172_p2), 121   ;;  %908 = vset.pattern.permute.xlu0 (!%p172_p2), %v927_v15  ;;  %vm255_vm3 = vcmask (!%p172_p2), 130048  }
   0x9   : > { %233 = vrot.lane.b32.xlu1 (!%p172_p2), %v220_v6, %s919_s21  ;;  %244 = vrot.lane.b32.xlu0 (!%p172_p2), %v220_v6, %s920_s22  ;;  %v454_v9 = vsub.s32 (!%p172_p2), 4, %v973_v8  ;;  %s925_s29 = smov (!%p172_p2), 120   ;;  %p200_p3 = scmp.lt.s32.totalorder (!%p172_p2), %s796_s16, 1  ;;  %v239_v17 = vsub.s32 (!%p172_p2), 0, %v973_v8  ;;  %v250_v18 = vsub.s32 (!%p172_p2), 1, %v973_v8  ;;  %v348_v23 = vsub.s32 (!%p172_p2), 2, %v973_v8 }
   0xa   : > { %s926_s30 = smov (!%p172_p2), 119   ;;  %v403_v27 = vsub.s32 (!%p172_p2), 3, %v973_v8  ;;  %v509_v41 = vsub.s32 (!%p172_p2), 5, %v973_v8  ;;  %v564_v48 = vsub.s32 (!%p172_p2), 6, %v973_v8  ;;  %v619_v57 = vsub.s32 (!%p172_p2), 7, %v973_v8 }
   0xb   : > { %v455_v11 = vrot.slane (!%p172_p2), %v979_v10, %v454_v9  ;;  %v240_v19 = vrot.slane (!%p172_p2), %v979_v10, %v239_v17  ;;  %v251_v22 = vrot.slane (!%p172_p2), %v979_v10, %v250_v18  ;;  %v349_v31 = vrot.slane (!%p172_p2), %v979_v10, %v348_v23  ;;  %v812_v8 = vld [vmem:[%s1074_s1 + $0x8] ss:$0 sm:$0xff] (!%p172_p2) }
   0xc   : > { %v404_v40 = vrot.slane (!%p172_p2), %v979_v10, %v403_v27  ;;  %v510_v47 = vrot.slane (!%p172_p2), %v979_v10, %v509_v41  ;;  %v565_v56 = vrot.slane (!%p172_p2), %v979_v10, %v564_v48  ;;  %v620_v63 = vrot.slane (!%p172_p2), %v979_v10, %v619_v57 }
   0xd   : > { %235 = vrot.lane.b32.xlu1 %v221_v7, %s919_s21  ;;  %246 = vrot.lane.b32.xlu0 %v221_v7, %s920_s22  ;;  %v982_v12 = vmul.f32 %v455_v11, %v220_v6  ;;  %v984_v13 = vmul.f32 %v455_v11, %v221_v7  ;;  %s1079_s16 = smov (!%p200_p3, %s796_s16), 1 }
   0xe   : > { %s802_s5 = sshll.u32 %s1079_s16, 3  ;;  %s888_s9 = smul.u32 36, %s1079_s16 }
   0xf   : > { %v458_v14 = vpack.c.bf16 %v984_v13, %v982_v12  ;;  %s208_s8 = scalar_lea.vmem %s1076_s3, %s802_s5  ;;  %s212_s19 = scalar_lea.vmem %s1077_s4, %s802_s5 }
  0x10   : > { %v723_v16 = vld [vmem:[%s208_s8] sm:$0xff]  ;;  %s1011_s12 = scalar_lea.vmem %s1075_s2, %s888_s9 }
  0x11   : > { %344 = vrot.lane.b32.xlu1 %v221_v7, %s921_s25  ;;  %342 = vrot.lane.b32.xlu0 %v220_v6, %s921_s25  ;;  %v225_v38 = vld [vmem:[%s1011_s12 + $0x4] sm:$0xf]  ;;  %v224_v39 = vld [vmem:[%s1011_s12] sm:$0xf] }
  0x12   : > { %v226_v54 = vld [vmem:[%s1011_s12 + $0x8] sm:$0xf]  ;;  %v227_v55 = vld [vmem:[%s1011_s12 + $0xc] sm:$0xf]  ;;  %v230_v15 = vld [vmem:[%s1011_s12 + $0x18] sm:$0xf] }
  0x13   : > { %v232_v17 = vld [vmem:[%s1011_s12 + $0x20] sm:$0xf] }
  0x15   : > { %399 = vrot.lane.b32.xlu1 %v221_v7, %s922_s26  ;;  %397 = vrot.lane.b32.xlu0 %v220_v6, %s922_s26 }
  0x19   : > { %505 = vrot.lane.b32.xlu1 %v221_v7, %s923_s27  ;;  %503 = vrot.lane.b32.xlu0 %v220_v6, %s923_s27 }
  0x1d   : > { %560 = vrot.lane.b32.xlu1 %v221_v7, %s924_s28  ;;  %558 = vrot.lane.b32.xlu0 %v220_v6, %s924_s28 }
  0x21   : > { %615 = vrot.lane.b32.xlu1 %v221_v7, %s925_s29  ;;  %613 = vrot.lane.b32.xlu0 %v220_v6, %s925_s29 }
  0x25   : > { %670 = vrot.lane.b32.xlu1 %v221_v7, %s926_s30  ;;  %668 = vrot.lane.b32.xlu0 %v220_v6, %s926_s30  ;;  %v228_v6 = vld [vmem:[%s1011_s12 + $0x10] sm:$0xf]  ;;  %v229_v7 = vld [vmem:[%s1011_s12 + $0x14] sm:$0xf] }
  0x29   : > { %726 = vperm.xlu0 %908, %v723_v16   ;;  %v231_v16 = vld [vmem:[%s1011_s12 + $0x1c] sm:$0xf] }
  0x7b   : > { %v234_v20 = vpop.permute.xlu1 %233  ;;  %v245_v21 = vpop.permute.xlu0 %244 }
  0x7c   : > { %v241_v24 = vmul.f32 %v240_v19, %v234_v20  ;;  %v252_v28 = vmul.f32 %v251_v22, %v245_v21 }
  0x7f   : > { %v236_v25 = vpop.permute.xlu1 %235  ;;  %v247_v26 = vpop.permute.xlu0 %246 }
  0x80   : > { %v242_v29 = vmul.f32 %v240_v19, %v236_v25  ;;  %v253_v30 = vmul.f32 %v251_v22, %v247_v26 }
  0x82   : > { %v254_v32 = vpack.c.bf16 %v253_v30, %v252_v28  ;;  %v243_v33 = vpack.c.bf16 %v242_v29, %v241_v24 }
  0x83   : > { %v345_v34 = vpop.permute.xlu1 %344  ;;  %v343_v35 = vpop.permute.xlu0 %342 }
  0x84   : > { %v351_v36 = vmul.f32 %v349_v31, %v345_v34  ;;  %v350_v37 = vmul.f32 %v349_v31, %v343_v35  ;;  %835 = vmatpush3.bf16.msra.mxu0 %v254_v32  ;;  %841 = vmatpush3.bf16.msra.mxu1 %v243_v33 }
  0x85   : > { %846 = vmatprep.subr.bf16.mxu0 %v917_v5  ;;  %852 = vmatprep.subr.bf16.mxu1 %v917_v5 }
  0x86   : > { %v352_v42 = vpack.c.bf16 %v351_v36, %v350_v37 }
  0x87   : > { %837 = vmatmul.mubr.msk.bf16.vlgmr.msra.gmra.mrb[0].mxu0 %vm255_vm3, %v225_v38  ;;  %843 = vmatmul.mubr.msk.bf16.vlgmr.msra.gmra.mrb[0].mxu1 %vm255_vm3, %v224_v39  ;;  %v400_v43 = vpop.permute.xlu1 %399  ;;  %v398_v44 = vpop.permute.xlu0 %397 }
  0x88   : > { %847 = vmatpush3.bf16.msra.mxu0 %v352_v42  ;;  %v406_v45 = vmul.f32 %v404_v40, %v400_v43  ;;  %v405_v46 = vmul.f32 %v404_v40, %v398_v44  ;;  %848 = vmatprep.mubr.msk.bf16.mxu0 %vm918_vm2, %v917_v5 }
  0x89   : > { %858 = vmatprep.subr.bf16.mxu0 %v917_v5  ;;  %854 = vmatprep.mubr.msk.bf16.mxu1 %vm918_vm2, %v917_v5 }
  0x8a   : > { %v407_v49 = vpack.c.bf16 %v406_v45, %v405_v46 }
  0x8b   : > { %v506_v50 = vpop.permute.xlu1 %505  ;;  %v504_v51 = vpop.permute.xlu0 %503 }
  0x8c   : > { %853 = vmatpush3.bf16.msra.mxu1 %v407_v49  ;;  %v512_v52 = vmul.f32 %v510_v47, %v506_v50  ;;  %v511_v53 = vmul.f32 %v510_v47, %v504_v51 }
  0x8d   : > { %864 = vmatprep.subr.bf16.mxu1 %v917_v5 }
  0x8e   : > { %v513_v58 = vpack.c.bf16 %v512_v52, %v511_v53 }
  0x8f   : > { %849 = vmatmul.mubr.msk.bf16.vlgmr.msra.gmra.mrb[4].mxu0 %vm255_vm3, %v226_v54  ;;  %855 = vmatmul.mubr.msk.bf16.vlgmr.msra.gmra.mrb[4].mxu1 %vm255_vm3, %v227_v55  ;;  %v561_v59 = vpop.permute.xlu1 %560  ;;  %v559_v60 = vpop.permute.xlu0 %558 }
  0x90   : > { %859 = vmatpush3.bf16.msra.mxu0 %v458_v14  ;;  %v567_v61 = vmul.f32 %v565_v56, %v561_v59  ;;  %v566_v62 = vmul.f32 %v565_v56, %v559_v60  ;;  %865 = vmatpush3.bf16.msra.mxu1 %v513_v58 }
  0x91   : > { %860 = vmatprep.mubr.msk.bf16.mxu0 %vm918_vm2, %v917_v5  ;;  %870 = vmatprep.subr.bf16.mxu0 %v917_v5 }
  0x92   : > { %866 = vmatprep.mubr.msk.bf16.mxu1 %vm918_vm2, %v917_v5  ;;  %876 = vmatprep.subr.bf16.mxu1 %v917_v5  ;;  %v568_v2 = vpack.c.bf16 %v567_v61, %v566_v62 }
  0x93   : > { %v616_v0 = vpop.permute.xlu1 %615  ;;  %v614_v1 = vpop.permute.xlu0 %613 }
  0x94   : > { %v622_v3 = vmul.f32 %v620_v63, %v616_v0  ;;  %v621_v4 = vmul.f32 %v620_v63, %v614_v1 }
  0x96   : > { %v623_v9 = vpack.c.bf16 %v622_v3, %v621_v4 }
  0x97   : > { %861 = vmatmul.mubr.msk.bf16.vlgmr.msra.gmra.mrb[8].mxu0 %vm255_vm3, %v228_v6  ;;  %867 = vmatmul.mubr.msk.bf16.vlgmr.msra.gmra.mrb[8].mxu1 %vm255_vm3, %v229_v7  ;;  %v671_v10 = vpop.permute.xlu1 %670  ;;  %v669_v11 = vpop.permute.xlu0 %668 }
  0x98   : > { %871 = vmatpush3.bf16.msra.mxu0 %v568_v2  ;;  %v677_v12 = vmul.f32 %v812_v8, %v671_v10  ;;  %v676_v13 = vmul.f32 %v812_v8, %v669_v11  ;;  %877 = vmatpush3.bf16.msra.mxu1 %v623_v9 }
  0x99   : > { %872 = vmatprep.mubr.msk.bf16.mxu0 %vm918_vm2, %v917_v5  ;;  %882 = vmatprep.subr.bf16.mxu0 %v917_v5 }
  0x9a   : > { %878 = vmatprep.mubr.msk.bf16.mxu1 %vm918_vm2, %v917_v5  ;;  %v678_v14 = vpack.c.bf16 %v677_v12, %v676_v13 }
  0x9f   : > { %873 = vmatmul.mubr.msk.bf16.vlgmr.msra.gmra.mrb[12].mxu0 %vm255_vm3, %v230_v15  ;;  %879 = vmatmul.mubr.msk.bf16.vlgmr.msra.gmra.mrb[12].mxu1 %vm255_vm3, %v231_v16 }
  0xa0   : > { %883 = vmatpush3.bf16.msra.mxu0 %v678_v14  ;;  %884 = vmatprep.mubr.msk.bf16.mxu0 %vm918_vm2, %v917_v5 }
  0xa7   : > { %885 = vmatmul.mubr.msk.bf16.vlgmr.msra.gmra.mrb[16].mxu0 %vm255_vm3, %v232_v17 }
  0xa8   : > { %v727_v57 = vpop.permute.xlu0 %726 }
 0x15a   : > { %v293_v18 = vpop.f32.mrb[0].mxu0  ;;  %v336_v19 = vpop.f32.mrb[0].mxu1 }
 0x15b   : > { %v838_v20 = vpop.f32.mrb[1].mxu0  ;;  %v337_v21 = vadd.f32 %v336_v19, %v293_v18  ;;  %v844_v22 = vpop.f32.mrb[1].mxu1 }
 0x15c   : > { %v296_v23 = vpop.f32.mrb[2].mxu0  ;;  %v339_v24 = vpop.f32.mrb[2].mxu1 }
 0x15d   : > { %v839_v25 = vpop.f32.mrb[3].mxu0  ;;  %v845_v26 = vpop.f32.mrb[3].mxu1 }
 0x162   : > { %v390_v27 = vpop.f32.mrb[4].mxu0  ;;  %v445_v28 = vpop.f32.mrb[4].mxu1 }
 0x163   : > { %v396_v29 = vadd.f32 %v390_v27, %v337_v21  ;;  %v850_v30 = vpop.f32.mrb[5].mxu0  ;;  %v856_v31 = vpop.f32.mrb[5].mxu1 }
 0x164   : > { %v393_v32 = vpop.f32.mrb[6].mxu0  ;;  %v448_v33 = vpop.f32.mrb[6].mxu1 }
 0x165   : > { %v451_v5 = vadd.f32 %v445_v28, %v396_v29  ;;  %v851_v34 = vpop.f32.mrb[7].mxu0  ;;  %v857_v35 = vpop.f32.mrb[7].mxu1 }
 0x16a   : > { %v496_v36 = vpop.f32.mrb[8].mxu0  ;;  %v551_v37 = vpop.f32.mrb[8].mxu1 }
 0x16b   : > { %v502_v38 = vadd.f32 %v496_v36, %v451_v5  ;;  %v862_v39 = vpop.f32.mrb[9].mxu0  ;;  %v868_v40 = vpop.f32.mrb[9].mxu1 }
 0x16c   : > { %v499_v41 = vpop.f32.mrb[10].mxu0  ;;  %v554_v42 = vpop.f32.mrb[10].mxu1 }
 0x16d   : > { %v557_v43 = vadd.f32 %v551_v37, %v502_v38  ;;  %v863_v44 = vpop.f32.mrb[11].mxu0  ;;  %v869_v45 = vpop.f32.mrb[11].mxu1 }
 0x172   : > { %v606_v46 = vpop.f32.mrb[12].mxu0  ;;  %v661_v47 = vpop.f32.mrb[12].mxu1 }
 0x173   : > { %v612_v48 = vadd.f32 %v606_v46, %v557_v43  ;;  %v874_v49 = vpop.f32.mrb[13].mxu0  ;;  %v880_v50 = vpop.f32.mrb[13].mxu1 }
 0x174   : > { %v609_v51 = vpop.f32.mrb[14].mxu0  ;;  %v664_v52 = vpop.f32.mrb[14].mxu1 }
 0x175   : > { %v667_v53 = vadd.f32 %v661_v47, %v612_v48  ;;  %v875_v54 = vpop.f32.mrb[15].mxu0  ;;  %v881_v55 = vpop.f32.mrb[15].mxu1 }
 0x17a   : > { %v716_v56 = vpop.f32.mrb[16].mxu0 }
 0x17b   : > { %v722_v58 = vadd.f32 %v716_v56, %v667_v53  ;;  %v886_v59 = vpop.f32.mrb[17].mxu0 }
 0x17c   : > { %v719_v60 = vpop.f32.mrb[18].mxu0 }
 0x17d   : > { %v729_v61 = vadd.f32 %v727_v57, %v722_v58  ;;  %v887_v62 = vpop.f32.mrb[19].mxu0 }
 0x17f   : > { %730 = vst [vmem:[%s212_s19] sm:$0xff] %v729_v61 }
 0x180 PF: > { %s14_s15 = sadd.s32 1, %s915_s15  }
 0x181   : > { %p11_p4 = scmp.ge.s32.totalorder %s14_s15, 4  }
 0x183   :  { %13 = sbr.rel (!%p11_p4) target bundleno = 1 (0x1), region = 69 }

// kernel: unet2_forward.13
= control target key start
LH: loop header
LB: loop body
LE: loop exit
PB: predicated region body
PF: predicated region fallthrough
CT: control target
= control target key end

     0   :  { %v1356_v2 = vmov 0   ;;  %s1357_s19 = smov 16   ;;  %s1358_s24 = smov 17   ;;  %v47_v6 = vlaneseq  ;;  %vm119_vm2 = vcmask 1042432   ;;  %vm115_vm3 = vcmask 48128   ;;  %s1700_s0 = inlined_call_operand.vmem [shape: f32[1,6,512], index: 0, kind: input, shape index: {}]   ;;  %s1701_s3 = inlined_call_operand.vmem [shape: f32[1,2,1], index: 3, kind: input, shape index: {}]   ;;  %s1702_s1 = inlined_call_operand.vmem [shape: f32[9,512], index: 1, kind: input, shape index: {}]   ;;  %s1703_s2 = inlined_call_operand.vmem [shape: bf16[1,9,2,6], index: 2, kind: input, shape index: {}]   ;;  %s1704_s4 = inlined_call_operand.vmem [shape: f32[1,2,512], index: 4, kind: output, shape index: {}]  }
   0x1   :  { %v1394_v0 = vld [vmem:[%s1700_s0 + $0x10] sm:$0x3f]  ;;  %v1399_v1 = vld [vmem:[%s1700_s0] sm:$0x3f]  ;;  %164 = vmatprep.mubr.bf16.mxu0 %v1356_v2  ;;  %205 = vmatprep.mubr.bf16.mxu1 %v1356_v2  ;;  %v1408_v3 = vld [vmem:[%s1700_s0 + $0x18] sm:$0x3f] }
   0x2   :  { %82 = vrot.lane.b32.xlu1 %v1394_v0, %s1357_s19  ;;  %78 = vrot.lane.b32.xlu0 %v1399_v1, %s1357_s19  ;;  %v1413_v4 = vld [vmem:[%s1700_s0 + $0x8] sm:$0x3f]  ;;  %s1359_s25 = smov 15   ;;  %s1360_s0 = smov 1   ;;  %v1264_v5 = vld [vmem:[%s1701_s3] sm:$0x3] }
   0x3   :  { %1355 = vset.pattern.permute.xlu0 %v1356_v2  ;;  %s1361_s26 = smov 127   ;;  %s1362_s27 = smov 113   ;;  %v1449_v7 = vshrl.u32 %v47_v6, 7  ;;  %v1451_v8 = vand.u32 127, %v47_v6  ;;  %v1456_v9 = vld [vmem:[%s1702_s1] sm:$0xff]  ;;  %v1462_v11 = vld [vmem:[%s1702_s1 + $0x10] sm:$0xff] }
   0x4   :  { %s1363_s28 = smov 112   ;;  %s1364_s29 = smov 111   ;;  %v1467_v12 = vld [vmem:[%s1702_s1 + $0x8] sm:$0xff]  ;;  %v1472_v13 = vld [vmem:[%s1702_s1 + $0x18] sm:$0xff]  ;;  %v31_v46 = vld [vmem:[%s1703_s2 + $0x1] sm:$0x1] }
   0x5   :  { %v93_v10 = vsub.s32 1, %v1449_v7  ;;  %v56_v16 = vsub.s32 0, %v1449_v7  ;;  %vm86_vm0 = vcmp.lt.s32.totalorder %v1451_v8, 16  ;;  %vm49_vm1 = vcmp.lt.s32.totalorder %v1451_v8, 17 }
   0x6   :  { %84 = vrot.lane.b32.xlu1 %v1408_v3, %s1357_s19  ;;  %80 = vrot.lane.b32.xlu0 %v1413_v4, %s1357_s19  ;;  %v326_v41 = vsub.s32 2, %v1449_v7  ;;  %vm319_vm4 = vcmp.lt.s32.totalorder %v1451_v8, 15  ;;  %v464_v6 = vsub.s32 3, %v1449_v7  ;;  %vm457_vm5 = vcmp.lt.s32.totalorder %v1451_v8, 1 }
   0x7   :  { %v94_v17 = vrot.slane %v1456_v9, %v93_v10  ;;  %v102_v18 = vrot.slane %v1462_v11, %v93_v10  ;;  %v98_v19 = vrot.slane %v1467_v12, %v93_v10  ;;  %v106_v20 = vrot.slane %v1472_v13, %v93_v10 }
   0x8   :  { %v61_v23 = vrot.slane %v1467_v12, %v56_v16  ;;  %v57_v39 = vrot.slane %v1456_v9, %v56_v16  ;;  %v65_v40 = vrot.slane %v1462_v11, %v56_v16  ;;  %v69_v45 = vrot.slane %v1472_v13, %v56_v16 }
   0x9   :  { %v331_v53 = vrot.slane %v1467_v12, %v326_v41  ;;  %v327_v63 = vrot.slane %v1456_v9, %v326_v41  ;;  %v339_v16 = vrot.slane %v1472_v13, %v326_v41  ;;  %vm720_vm6 = vcmp.lt.s32.totalorder %v1451_v8, 127 }
   0xa   :  { %41 = vrot.lane.b32.xlu1 %v1413_v4, %s1358_s24  ;;  %39 = vrot.lane.b32.xlu0 %v1399_v1, %s1358_s24  ;;  %vm858_vm7 = vcmp.lt.s32.totalorder %v1451_v8, 113  ;;  %vm996_vm8 = vcmp.lt.s32.totalorder %v1451_v8, 112  ;;  %vm1134_vm9 = vcmp.lt.s32.totalorder %v1451_v8, 111  ;;  %v37_v8 = vld [vmem:[%s1703_s2 + $0x7] sm:$0x1] }
   0xe   :  { %45 = vrot.lane.b32.xlu1 %v1408_v3, %s1358_s24  ;;  %43 = vrot.lane.b32.xlu0 %v1394_v0, %s1358_s24 }
  0x12   :  { %313 = vrot.lane.b32.xlu1 %v1413_v4, %s1359_s25  ;;  %311 = vrot.lane.b32.xlu0 %v1399_v1, %s1359_s25 }
  0x16   :  { %317 = vrot.lane.b32.xlu1 %v1408_v3, %s1359_s25  ;;  %315 = vrot.lane.b32.xlu0 %v1394_v0, %s1359_s25 }
  0x1a   :  { %451 = vrot.lane.b32.xlu1 %v1413_v4, %s1360_s0  ;;  %449 = vrot.lane.b32.xlu0 %v1399_v1, %s1360_s0 }
  0x1e   :  { %455 = vrot.lane.b32.xlu1 %v1408_v3, %s1360_s0  ;;  %453 = vrot.lane.b32.xlu0 %v1394_v0, %s1360_s0 }
  0x22   :  { %714 = vrot.lane.b32.xlu1 %v1413_v4, %s1361_s26  ;;  %712 = vrot.lane.b32.xlu0 %v1399_v1, %s1361_s26 }
  0x26   :  { %718 = vrot.lane.b32.xlu1 %v1408_v3, %s1361_s26  ;;  %716 = vrot.lane.b32.xlu0 %v1394_v0, %s1361_s26 }
  0x2a   :  { %852 = vrot.lane.b32.xlu1 %v1413_v4, %s1362_s27  ;;  %850 = vrot.lane.b32.xlu0 %v1399_v1, %s1362_s27 }
  0x2e   :  { %856 = vrot.lane.b32.xlu1 %v1408_v3, %s1362_s27  ;;  %854 = vrot.lane.b32.xlu0 %v1394_v0, %s1362_s27 }
  0x32   :  { %990 = vrot.lane.b32.xlu1 %v1413_v4, %s1363_s28  ;;  %988 = vrot.lane.b32.xlu0 %v1399_v1, %s1363_s28 }
  0x36   :  { %994 = vrot.lane.b32.xlu1 %v1408_v3, %s1363_s28  ;;  %992 = vrot.lane.b32.xlu0 %v1394_v0, %s1363_s28 }
  0x3a   :  { %1128 = vrot.lane.b32.xlu1 %v1413_v4, %s1364_s29  ;;  %1126 = vrot.lane.b32.xlu0 %v1399_v1, %s1364_s29 }
  0x3e   :  { %1132 = vrot.lane.b32.xlu1 %v1408_v3, %s1364_s29  ;;  %1130 = vrot.lane.b32.xlu0 %v1394_v0, %s1364_s29 }
  0x42   :  { %1267 = vperm.xlu0 %1355, %v1264_v5   ;;  %v335_v5 = vrot.slane %v1462_v11, %v326_v41  ;;  %v1543_v41 = vsub.s32 5, %v1449_v7 }
  0x74   :  { %v83_v14 = vpop.permute.xlu1 %82  ;;  %v79_v15 = vpop.permute.xlu0 %78 }
  0x78   :  { %v85_v21 = vpop.permute.xlu1 %84  ;;  %v81_v22 = vpop.permute.xlu0 %80 }
  0x79   :  { %v87_v24 = vsel %vm86_vm0, %v83_v14, %v85_v21  ;;  %v90_v25 = vsel %vm86_vm0, %v85_v21, %v79_v15  ;;  %v88_v26 = vsel %vm86_vm0, %v81_v22, %v83_v14  ;;  %v89_v27 = vsel %vm86_vm0, %v79_v15, %v81_v22 }
  0x7a   :  { %v107_v28 = vmul.f32 %v94_v17, %v90_v25  ;;  %v109_v29 = vmul.f32 %v102_v18, %v88_v26  ;;  %v108_v30 = vmul.f32 %v98_v19, %v89_v27  ;;  %v110_v31 = vmul.f32 %v106_v20, %v87_v24  ;;  %v30_v17 = vld [vmem:[%s1703_s2] sm:$0x1] }
  0x7b   :  { %v589_v18 = vsub.s32 4, %v1449_v7  ;;  %v469_v25 = vrot.slane %v1467_v12, %v464_v6 }
  0x7c   :  { %v42_v32 = vpop.permute.xlu1 %41  ;;  %v40_v33 = vpop.permute.xlu0 %39  ;;  %v112_v34 = vpack.c.bf16 %v108_v30, %v108_v30  ;;  %v114_v35 = vpack.c.bf16 %v110_v31, %v110_v31  ;;  %v111_v36 = vpack.c.bf16 %v107_v28, %v107_v28  ;;  %v113_v37 = vpack.c.bf16 %v109_v29, %v109_v29 }
  0x7d   :  { %v52_v38 = vsel %vm49_vm1, %v40_v33, %v42_v32  ;;  %v594_v29 = vrot.slane %v1467_v12, %v589_v18  ;;  %v602_v30 = vrot.slane %v1472_v13, %v589_v18  ;;  %v590_v31 = vrot.slane %v1456_v9, %v589_v18 }
  0x7e   :  { %v71_v42 = vmul.f32 %v61_v23, %v52_v38  ;;  %1305 = vmatprep.subr.msk.bf16.mxu0 %vm119_vm2, %v112_v34  ;;  %1307 = vmatprep.subr.msk.bf16.mxu1 %vm119_vm2, %v114_v35  ;;  %v121_v43 = vsel %vm119_vm2, %v111_v36, 0  ;;  %v127_v44 = vsel %vm119_vm2, %v113_v37, 0  ;;  %v598_v37 = vrot.slane %v1462_v11, %v589_v18 }
  0x7f   :  { %133 = vmatpush1.bf16.msra.mxu0 %v121_v43  ;;  %174 = vmatpush1.bf16.msra.mxu1 %v127_v44  ;;  %v736_v18 = vrot.slane %v1462_v11, %v1543_v41 }
  0x80   :  { %v75_v47 = vpack.c.bf16 %v71_v42, %v71_v42  ;;  %v46_v48 = vpop.permute.xlu1 %45  ;;  %v44_v49 = vpop.permute.xlu0 %43 }
  0x81   :  { %v53_v50 = vsel %vm49_vm1, %v46_v48, %v40_v33  ;;  %v50_v51 = vsel %vm49_vm1, %v44_v49, %v46_v48  ;;  %v51_v52 = vsel %vm49_vm1, %v42_v32, %v44_v49  ;;  %v606_v48 = vmul.f32 %v602_v30, %v1408_v3 }
  0x82   :  { %v70_v54 = vmul.f32 %v57_v39, %v53_v50  ;;  %v72_v55 = vmul.f32 %v65_v40, %v51_v52  ;;  %v73_v56 = vmul.f32 %v69_v45, %v50_v51  ;;  %1306 = vmatmul.mubr.msk.bf16.vlgmr.msra.gmra.mrb[0].mxu0 %vm115_vm3, %v31_v46  ;;  %1308 = vmatmul.mubr.msk.bf16.vlgmr.msra.gmra.mrb[0].mxu1 %vm115_vm3, %v31_v46  ;;  %v32_v46 = vld [vmem:[%s1703_s2 + $0x2] sm:$0x1] }
  0x83   :  { %1309 = vmatprep.subr.msk.bf16.mxu0 %vm119_vm2, %v75_v47  ;;  %261 = vmatprep.mubr.bf16.mxu0 %v1356_v2  ;;  %v465_v39 = vrot.slane %v1456_v9, %v464_v6  ;;  %v473_v40 = vrot.slane %v1462_v11, %v464_v6  ;;  %v477_v45 = vrot.slane %v1472_v13, %v464_v6 }
  0x84   :  { %v74_v57 = vpack.c.bf16 %v70_v54, %v70_v54  ;;  %v76_v58 = vpack.c.bf16 %v72_v55, %v72_v55  ;;  %v77_v59 = vpack.c.bf16 %v73_v56, %v73_v56  ;;  %v314_v60 = vpop.permute.xlu1 %313  ;;  %v312_v61 = vpop.permute.xlu0 %311  ;;  %302 = vmatprep.mubr.bf16.mxu1 %v1356_v2  ;;  %v604_v47 = vmul.f32 %v594_v29, %v1413_v4 }
  0x85   :  { %v322_v62 = vsel %vm319_vm4, %v312_v61, %v314_v60  ;;  %v603_v49 = vmul.f32 %v590_v31, %v1399_v1  ;;  %v728_v4 = vrot.slane %v1456_v9, %v1543_v41 }
  0x86   :  { %v341_v10 = vmul.f32 %v331_v53, %v322_v62  ;;  %1311 = vmatprep.subr.msk.bf16.mxu1 %vm119_vm2, %v77_v59  ;;  %v218_v14 = vsel %vm119_vm2, %v74_v57, 0  ;;  %v224_v15 = vsel %vm119_vm2, %v76_v58, 0  ;;  %v605_v53 = vmul.f32 %v598_v37, %v1394_v0 }
  0x87   :  { %230 = vmatpush1.bf16.msra.mxu0 %v218_v14  ;;  %271 = vmatpush1.bf16.msra.mxu1 %v224_v15  ;;  %v608_v0 = vpack.c.bf16 %v604_v47, %v604_v47  ;;  %v610_v58 = vpack.c.bf16 %v606_v48, %v606_v48  ;;  %v607_v59 = vpack.c.bf16 %v603_v49, %v603_v49 }
  0x88   :  { %v345_v19 = vpack.c.bf16 %v341_v10, %v341_v10  ;;  %v318_v20 = vpop.permute.xlu1 %317  ;;  %v316_v21 = vpop.permute.xlu0 %315  ;;  %v609_v6 = vpack.c.bf16 %v605_v53, %v605_v53  ;;  %v740_v14 = vrot.slane %v1472_v13, %v1543_v41 }
  0x89   :  { %v323_v22 = vsel %vm319_vm4, %v318_v20, %v312_v61  ;;  %v320_v23 = vsel %vm319_vm4, %v316_v21, %v318_v20  ;;  %v321_v24 = vsel %vm319_vm4, %v314_v60, %v316_v21  ;;  %v33_v20 = vld [vmem:[%s1703_s2 + $0x3] sm:$0x1]  ;;  %v865_v21 = vsub.s32 6, %v1449_v7 }
  0x8a   :  { %v340_v26 = vmul.f32 %v327_v63, %v323_v22  ;;  %v342_v27 = vmul.f32 %v335_v5, %v321_v24  ;;  %v343_v28 = vmul.f32 %v339_v16, %v320_v23  ;;  %1310 = vmatmul.mubr.msk.bf16.vlgmr.msra.gmra.mrb[4].mxu0 %vm115_vm3, %v30_v17  ;;  %1312 = vmatmul.mubr.msk.bf16.vlgmr.msra.gmra.mrb[4].mxu1 %vm115_vm3, %v30_v17  ;;  %v615_v24 = vsel %vm119_vm2, %v607_v59, 0 }
  0x8b   :  { %1313 = vmatprep.subr.msk.bf16.mxu0 %vm119_vm2, %v345_v19  ;;  %395 = vmatprep.mubr.bf16.mxu0 %v1356_v2  ;;  %v732_v17 = vrot.slane %v1467_v12, %v1543_v41  ;;  %v870_v41 = vrot.slane %v1467_v12, %v865_v21 }
  0x8c   :  { %v344_v32 = vpack.c.bf16 %v340_v26, %v340_v26  ;;  %v346_v33 = vpack.c.bf16 %v342_v27, %v342_v27  ;;  %v347_v34 = vpack.c.bf16 %v343_v28, %v343_v28  ;;  %v452_v35 = vpop.permute.xlu1 %451  ;;  %v450_v36 = vpop.permute.xlu0 %449  ;;  %436 = vmatprep.mubr.bf16.mxu1 %v1356_v2 }
  0x8d   :  { %v460_v38 = vsel %vm457_vm5, %v450_v36, %v452_v35 }
  0x8e   :  { %v479_v42 = vmul.f32 %v469_v25, %v460_v38  ;;  %1315 = vmatprep.subr.msk.bf16.mxu1 %vm119_vm2, %v347_v34  ;;  %v352_v43 = vsel %vm119_vm2, %v344_v32, 0  ;;  %v358_v44 = vsel %vm119_vm2, %v346_v33, 0  ;;  %v621_v25 = vsel %vm119_vm2, %v609_v6, 0 }
  0x8f   :  { %364 = vmatpush1.bf16.msra.mxu0 %v352_v43  ;;  %405 = vmatpush1.bf16.msra.mxu1 %v358_v44  ;;  %v866_v33 = vrot.slane %v1456_v9, %v865_v21  ;;  %v34_v44 = vld [vmem:[%s1703_s2 + $0x4] sm:$0x1] }
  0x90   :  { %v483_v50 = vpack.c.bf16 %v479_v42, %v479_v42  ;;  %v456_v51 = vpop.permute.xlu1 %455  ;;  %v454_v52 = vpop.permute.xlu0 %453  ;;  %v874_v42 = vrot.slane %v1462_v11, %v865_v21 }
  0x91   :  { %v461_v54 = vsel %vm457_vm5, %v456_v51, %v450_v36  ;;  %v458_v55 = vsel %vm457_vm5, %v454_v52, %v456_v51  ;;  %v459_v56 = vsel %vm457_vm5, %v452_v35, %v454_v52 }
  0x92   :  { %v478_v3 = vmul.f32 %v465_v39, %v461_v54  ;;  %v480_v57 = vmul.f32 %v473_v40, %v459_v56  ;;  %v481_v1 = vmul.f32 %v477_v45, %v458_v55  ;;  %1314 = vmatmul.mubr.msk.bf16.vlgmr.msra.gmra.mrb[8].mxu0 %vm115_vm3, %v32_v46  ;;  %1316 = vmatmul.mubr.msk.bf16.vlgmr.msra.gmra.mrb[8].mxu1 %vm115_vm3, %v32_v46  ;;  %v1003_v45 = vsub.s32 7, %v1449_v7 }
  0x93   :  { %1317 = vmatprep.subr.msk.bf16.mxu0 %vm119_vm2, %v483_v50  ;;  %533 = vmatprep.mubr.bf16.mxu0 %v1356_v2  ;;  %v878_v40 = vrot.slane %v1472_v13, %v865_v21 }
  0x94   :  { %v482_v60 = vpack.c.bf16 %v478_v3, %v478_v3  ;;  %v484_v61 = vpack.c.bf16 %v480_v57, %v480_v57  ;;  %v485_v62 = vpack.c.bf16 %v481_v1, %v481_v1  ;;  %v715_v63 = vpop.permute.xlu1 %714  ;;  %v713_v5 = vpop.permute.xlu0 %712  ;;  %574 = vmatprep.mubr.bf16.mxu1 %v1356_v2 }
  0x95   :  { %v723_v10 = vsel %vm720_vm6, %v713_v5, %v715_v63 }
  0x96   :  { %1319 = vmatprep.subr.msk.bf16.mxu1 %vm119_vm2, %v485_v62  ;;  %v490_v15 = vsel %vm119_vm2, %v482_v60, 0  ;;  %v496_v16 = vsel %vm119_vm2, %v484_v61, 0  ;;  %v741_v19 = vmul.f32 %v728_v4, %v723_v10  ;;  %v1004_v4 = vrot.slane %v1456_v9, %v1003_v45 }
  0x97   :  { %502 = vmatpush1.bf16.msra.mxu0 %v490_v15  ;;  %543 = vmatpush1.bf16.msra.mxu1 %v496_v16  ;;  %v1016_v60 = vrot.slane %v1472_v13, %v1003_v45  ;;  %v1008_v9 = vrot.slane %v1467_v12, %v1003_v45  ;;  %v1012_v61 = vrot.slane %v1462_v11, %v1003_v45 }
  0x98   :  { %v719_v22 = vpop.permute.xlu1 %718  ;;  %v717_v23 = vpop.permute.xlu0 %716  ;;  %1321 = vmatprep.subr.msk.bf16.mxu0 %vm119_vm2, %v608_v0  ;;  %1323 = vmatprep.subr.msk.bf16.mxu1 %vm119_vm2, %v610_v58  ;;  %v745_v32 = vpack.c.bf16 %v741_v19, %v741_v19 }
  0x99   :  { %v724_v26 = vsel %vm720_vm6, %v719_v22, %v713_v5  ;;  %v721_v27 = vsel %vm720_vm6, %v717_v23, %v719_v22  ;;  %v722_v28 = vsel %vm720_vm6, %v715_v63, %v717_v23  ;;  %v35_v63 = vld [vmem:[%s1703_s2 + $0x5] sm:$0x1]  ;;  %v1337_v23 = vld [vmem:[%s1702_s1 + $0x20] ss:$0 sm:$0xff] }
  0x9a   :  { %1318 = vmatmul.mubr.msk.bf16.vlgmr.msra.gmra.mrb[12].mxu0 %vm115_vm3, %v33_v20  ;;  %1320 = vmatmul.mubr.msk.bf16.vlgmr.msra.gmra.mrb[12].mxu1 %vm115_vm3, %v33_v20  ;;  %v744_v29 = vmul.f32 %v740_v14, %v724_v26  ;;  %v742_v30 = vmul.f32 %v732_v17, %v722_v28  ;;  %v743_v31 = vmul.f32 %v736_v18, %v721_v27  ;;  %v753_v46 = vsel %vm119_vm2, %v745_v32, 0  ;;  %v36_v26 = vld [vmem:[%s1703_s2 + $0x6] sm:$0x1]  ;;  %v1340_v28 = vld [vmem:[%s1702_s1 + $0x38] ss:$0 sm:$0xff] }
  0x9b   :  { %627 = vmatpush1.bf16.msra.mxu0 %v615_v24  ;;  %668 = vmatpush1.bf16.msra.mxu1 %v621_v25 }
  0x9c   :  { %v748_v34 = vpack.c.bf16 %v744_v29, %v744_v29  ;;  %v746_v35 = vpack.c.bf16 %v742_v30, %v742_v30  ;;  %v747_v36 = vpack.c.bf16 %v743_v31, %v743_v31  ;;  %v853_v37 = vpop.permute.xlu1 %852  ;;  %v851_v38 = vpop.permute.xlu0 %850  ;;  %658 = vmatprep.mubr.bf16.mxu0 %v1356_v2  ;;  %699 = vmatprep.mubr.bf16.mxu1 %v1356_v2  ;;  %v1338_v29 = vld [vmem:[%s1702_s1 + $0x28] ss:$0 sm:$0xff]  ;;  %v1339_v30 = vld [vmem:[%s1702_s1 + $0x30] ss:$0 sm:$0xff] }
  0x9d   :  { %v861_v39 = vsel %vm858_vm7, %v851_v38, %v853_v37 }
  0x9e   :  { %1325 = vmatprep.subr.msk.bf16.mxu0 %vm119_vm2, %v746_v35  ;;  %1327 = vmatprep.subr.msk.bf16.mxu1 %vm119_vm2, %v748_v34  ;;  %v879_v43 = vmul.f32 %v866_v33, %v861_v39  ;;  %v759_v49 = vsel %vm119_vm2, %v747_v36, 0 }
  0xa0   :  { %v857_v47 = vpop.permute.xlu1 %856  ;;  %v855_v48 = vpop.permute.xlu0 %854  ;;  %v883_v56 = vpack.c.bf16 %v879_v43, %v879_v43 }
  0xa1   :  { %v862_v50 = vsel %vm858_vm7, %v857_v47, %v851_v38  ;;  %v859_v51 = vsel %vm858_vm7, %v855_v48, %v857_v47  ;;  %v860_v52 = vsel %vm858_vm7, %v853_v37, %v855_v48  ;;  %v38_v47 = vld [vmem:[%s1703_s2 + $0x8] sm:$0x1] }
  0xa2   :  { %1322 = vmatmul.mubr.msk.bf16.vlgmr.msra.gmra.mrb[16].mxu0 %vm115_vm3, %v34_v44  ;;  %1324 = vmatmul.mubr.msk.bf16.vlgmr.msra.gmra.mrb[16].mxu1 %vm115_vm3, %v34_v44  ;;  %v882_v53 = vmul.f32 %v878_v40, %v862_v50  ;;  %v880_v54 = vmul.f32 %v870_v41, %v860_v52  ;;  %v881_v55 = vmul.f32 %v874_v42, %v859_v51  ;;  %v891_v5 = vsel %vm119_vm2, %v883_v56, 0 }
  0xa3   :  { %765 = vmatpush1.bf16.msra.mxu0 %v753_v46  ;;  %806 = vmatpush1.bf16.msra.mxu1 %v759_v49 }
  0xa4   :  { %v886_v3 = vpack.c.bf16 %v882_v53, %v882_v53  ;;  %v884_v57 = vpack.c.bf16 %v880_v54, %v880_v54  ;;  %v885_v1 = vpack.c.bf16 %v881_v55, %v881_v55  ;;  %v991_v0 = vpop.permute.xlu1 %990  ;;  %v989_v58 = vpop.permute.xlu0 %988  ;;  %796 = vmatprep.mubr.bf16.mxu0 %v1356_v2  ;;  %837 = vmatprep.mubr.bf16.mxu1 %v1356_v2 }
  0xa5   :  { %v999_v59 = vsel %vm996_vm8, %v989_v58, %v991_v0 }
  0xa6   :  { %1329 = vmatprep.subr.msk.bf16.mxu0 %vm119_vm2, %v884_v57  ;;  %1331 = vmatprep.subr.msk.bf16.mxu1 %vm119_vm2, %v886_v3  ;;  %v1017_v62 = vmul.f32 %v1004_v4, %v999_v59  ;;  %v897_v14 = vsel %vm119_vm2, %v885_v1, 0 }
  0xa8   :  { %v995_v6 = vpop.permute.xlu1 %994  ;;  %v993_v10 = vpop.permute.xlu0 %992  ;;  %v1021_v18 = vpack.c.bf16 %v1017_v62, %v1017_v62 }
  0xa9   :  { %v1000_v15 = vsel %vm996_vm8, %v995_v6, %v989_v58  ;;  %v997_v13 = vsel %vm996_vm8, %v993_v10, %v995_v6  ;;  %v998_v11 = vsel %vm996_vm8, %v991_v0, %v993_v10 }
  0xaa   :  { %1326 = vmatmul.mubr.msk.bf16.vlgmr.msra.gmra.mrb[20].mxu0 %vm115_vm3, %v35_v63  ;;  %1328 = vmatmul.mubr.msk.bf16.vlgmr.msra.gmra.mrb[20].mxu1 %vm115_vm3, %v35_v63  ;;  %v1020_v12 = vmul.f32 %v1016_v60, %v1000_v15  ;;  %v1018_v16 = vmul.f32 %v1008_v9, %v998_v11  ;;  %v1019_v17 = vmul.f32 %v1012_v61, %v997_v13  ;;  %v1029_v31 = vsel %vm119_vm2, %v1021_v18, 0 }
  0xab   :  { %903 = vmatpush1.bf16.msra.mxu0 %v891_v5  ;;  %944 = vmatpush1.bf16.msra.mxu1 %v897_v14 }
  0xac   :  { %v1024_v19 = vpack.c.bf16 %v1020_v12, %v1020_v12  ;;  %v1022_v20 = vpack.c.bf16 %v1018_v16, %v1018_v16  ;;  %v1023_v21 = vpack.c.bf16 %v1019_v17, %v1019_v17  ;;  %v1129_v22 = vpop.permute.xlu1 %1128  ;;  %v1127_v24 = vpop.permute.xlu0 %1126  ;;  %934 = vmatprep.mubr.bf16.mxu0 %v1356_v2  ;;  %975 = vmatprep.mubr.bf16.mxu1 %v1356_v2 }
  0xad   :  { %v1137_v25 = vsel %vm1134_vm9, %v1127_v24, %v1129_v22 }
  0xae   :  { %1333 = vmatprep.subr.msk.bf16.mxu0 %vm119_vm2, %v1022_v20  ;;  %1335 = vmatprep.subr.msk.bf16.mxu1 %vm119_vm2, %v1024_v19  ;;  %v1155_v27 = vmul.f32 %v1337_v23, %v1137_v25  ;;  %v1035_v34 = vsel %vm119_vm2, %v1023_v21, 0 }
  0xb0   :  { %v1133_v32 = vpop.permute.xlu1 %1132  ;;  %v1131_v33 = vpop.permute.xlu0 %1130  ;;  %v1159_v41 = vpack.c.bf16 %v1155_v27, %v1155_v27 }
  0xb1   :  { %v1138_v35 = vsel %vm1134_vm9, %v1133_v32, %v1127_v24  ;;  %v1135_v36 = vsel %vm1134_vm9, %v1131_v33, %v1133_v32  ;;  %v1136_v37 = vsel %vm1134_vm9, %v1129_v22, %v1131_v33 }
  0xb2   :  { %1330 = vmatmul.mubr.msk.bf16.vlgmr.msra.gmra.mrb[24].mxu0 %vm115_vm3, %v36_v26  ;;  %1332 = vmatmul.mubr.msk.bf16.vlgmr.msra.gmra.mrb[24].mxu1 %vm115_vm3, %v36_v26  ;;  %v1158_v38 = vmul.f32 %v1340_v28, %v1138_v35  ;;  %v1156_v39 = vmul.f32 %v1338_v29, %v1136_v37  ;;  %v1157_v40 = vmul.f32 %v1339_v30, %v1135_v36  ;;  %v1167_v45 = vsel %vm119_vm2, %v1159_v41, 0 }
  0xb3   :  { %1041 = vmatpush1.bf16.msra.mxu0 %v1029_v31  ;;  %1082 = vmatpush1.bf16.msra.mxu1 %v1035_v34 }
  0xb4   :  { %v1162_v42 = vpack.c.bf16 %v1158_v38, %v1158_v38  ;;  %v1160_v43 = vpack.c.bf16 %v1156_v39, %v1156_v39  ;;  %v1161_v44 = vpack.c.bf16 %v1157_v40, %v1157_v40  ;;  %1072 = vmatprep.mubr.bf16.mxu0 %v1356_v2  ;;  %1113 = vmatprep.mubr.bf16.mxu1 %v1356_v2 }
  0xb6   :  { %1341 = vmatprep.subr.msk.bf16.mxu0 %vm119_vm2, %v1160_v43  ;;  %1343 = vmatprep.subr.msk.bf16.mxu1 %vm119_vm2, %v1162_v42  ;;  %v1173_v46 = vsel %vm119_vm2, %v1161_v44, 0 }
  0xba   :  { %1334 = vmatmul.mubr.msk.bf16.vlgmr.msra.gmra.mrb[28].mxu0 %vm115_vm3, %v37_v8  ;;  %1336 = vmatmul.mubr.msk.bf16.vlgmr.msra.gmra.mrb[28].mxu1 %vm115_vm3, %v37_v8 }
  0xbb   :  { %1179 = vmatpush1.bf16.msra.mxu0 %v1167_v45  ;;  %1220 = vmatpush1.bf16.msra.mxu1 %v1173_v46 }
  0xbc   :  { %1210 = vmatprep.mubr.bf16.mxu0 %v1356_v2  ;;  %1251 = vmatprep.mubr.bf16.mxu1 %v1356_v2 }
  0xc2   :  { %1342 = vmatmul.mubr.msk.bf16.vlgmr.msra.gmra.mrb[32].mxu0 %vm115_vm3, %v38_v47  ;;  %1344 = vmatmul.mubr.msk.bf16.vlgmr.msra.gmra.mrb[32].mxu1 %vm115_vm3, %v38_v47 }
 0x155   :  { %v166_v48 = vpop.f32.mrb[0].mxu0  ;;  %v207_v49 = vpop.f32.mrb[0].mxu1 }
 0x156   :  { %v168_v50 = vpop.f32.mrb[1].mxu0  ;;  %v209_v51 = vpop.f32.mrb[1].mxu1 }
 0x157   :  { %v170_v52 = vpop.f32.mrb[2].mxu0  ;;  %v211_v53 = vpop.f32.mrb[2].mxu1 }
 0x158   :  { %v171_v54 = vpop.f32.mrb[3].mxu0  ;;  %v212_v55 = vpop.f32.mrb[3].mxu1 }
 0x15d   :  { %v263_v56 = vpop.f32.mrb[4].mxu0  ;;  %v304_v4 = vpop.f32.mrb[4].mxu1 }
 0x15e   :  { %v264_v3 = vadd.f32 %v263_v56, %v166_v48  ;;  %v305_v2 = vadd.f32 %v304_v4, %v207_v49  ;;  %v265_v57 = vpop.f32.mrb[5].mxu0  ;;  %v306_v1 = vpop.f32.mrb[5].mxu1 }
 0x15f   :  { %v266_v0 = vadd.f32 %v265_v57, %v168_v50  ;;  %v307_v58 = vadd.f32 %v306_v1, %v209_v51  ;;  %v267_v59 = vpop.f32.mrb[6].mxu0  ;;  %v308_v60 = vpop.f32.mrb[6].mxu1 }
 0x160   :  { %v268_v9 = vpop.f32.mrb[7].mxu0  ;;  %v309_v61 = vpop.f32.mrb[7].mxu1 }
 0x165   :  { %v397_v62 = vpop.f32.mrb[8].mxu0  ;;  %v438_v63 = vpop.f32.mrb[8].mxu1 }
 0x166   :  { %v445_v5 = vadd.f32 %v397_v62, %v264_v3  ;;  %v447_v6 = vadd.f32 %v438_v63, %v305_v2  ;;  %v399_v10 = vpop.f32.mrb[9].mxu0  ;;  %v440_v14 = vpop.f32.mrb[9].mxu1 }
 0x167   :  { %v446_v15 = vadd.f32 %v399_v10, %v266_v0  ;;  %v448_v13 = vadd.f32 %v440_v14, %v307_v58  ;;  %v401_v11 = vpop.f32.mrb[10].mxu0  ;;  %v442_v12 = vpop.f32.mrb[10].mxu1 }
 0x168   :  { %v402_v16 = vpop.f32.mrb[11].mxu0  ;;  %v443_v17 = vpop.f32.mrb[11].mxu1  ;;  %v1365_v12 = vmov 1983009808  }
 0x169   :  { %v1285_v16 = vunpack.c.l.s4 %v1365_v12  ;;  %v1268_v17 = vpop.permute.xlu0 %1267 }
 0x16d   :  { %v535_v18 = vpop.f32.mrb[12].mxu0  ;;  %v576_v19 = vpop.f32.mrb[12].mxu1 }
 0x16e   :  { %v583_v20 = vadd.f32 %v535_v18, %v445_v5  ;;  %v585_v21 = vadd.f32 %v576_v19, %v447_v6  ;;  %v537_v22 = vpop.f32.mrb[13].mxu0  ;;  %v578_v23 = vpop.f32.mrb[13].mxu1 }
 0x16f   :  { %v584_v24 = vadd.f32 %v537_v22, %v446_v15  ;;  %v586_v25 = vadd.f32 %v578_v23, %v448_v13  ;;  %v539_v26 = vpop.f32.mrb[14].mxu0  ;;  %v580_v27 = vpop.f32.mrb[14].mxu1 }
 0x170   :  { %v540_v28 = vpop.f32.mrb[15].mxu0  ;;  %v581_v29 = vpop.f32.mrb[15].mxu1  ;;  %v1286_v26 = vunpack.c.0.s8 %v1285_v16 }
 0x175   :  { %v660_v30 = vpop.f32.mrb[16].mxu0  ;;  %v701_v31 = vpop.f32.mrb[16].mxu1 }
 0x176   :  { %v708_v32 = vadd.f32 %v660_v30, %v583_v20  ;;  %v710_v33 = vadd.f32 %v701_v31, %v585_v21  ;;  %v662_v34 = vpop.f32.mrb[17].mxu0  ;;  %v703_v35 = vpop.f32.mrb[17].mxu1 }
 0x177   :  { %v709_v36 = vadd.f32 %v662_v34, %v584_v24  ;;  %v711_v37 = vadd.f32 %v703_v35, %v586_v25  ;;  %v664_v38 = vpop.f32.mrb[18].mxu0  ;;  %v705_v39 = vpop.f32.mrb[18].mxu1 }
 0x178   :  { %v665_v40 = vpop.f32.mrb[19].mxu0  ;;  %v706_v41 = vpop.f32.mrb[19].mxu1 }
 0x17d   :  { %v798_v42 = vpop.f32.mrb[20].mxu0  ;;  %v839_v43 = vpop.f32.mrb[20].mxu1 }
 0x17e   :  { %v846_v44 = vadd.f32 %v798_v42, %v708_v32  ;;  %v848_v8 = vadd.f32 %v839_v43, %v710_v33  ;;  %v800_v45 = vpop.f32.mrb[21].mxu0  ;;  %v841_v46 = vpop.f32.mrb[21].mxu1 }
 0x17f   :  { %v847_v47 = vadd.f32 %v800_v45, %v709_v36  ;;  %v849_v48 = vadd.f32 %v841_v46, %v711_v37  ;;  %v802_v49 = vpop.f32.mrb[22].mxu0  ;;  %v843_v50 = vpop.f32.mrb[22].mxu1  ;;  %v1289_v37 = vsub.s32 %v1286_v26, %v1449_v7 }
 0x180   :  { %v803_v51 = vpop.f32.mrb[23].mxu0  ;;  %v844_v52 = vpop.f32.mrb[23].mxu1 }
 0x185   :  { %v936_v53 = vpop.f32.mrb[24].mxu0  ;;  %v977_v54 = vpop.f32.mrb[24].mxu1 }
 0x186   :  { %v984_v55 = vadd.f32 %v936_v53, %v846_v44  ;;  %v986_v56 = vadd.f32 %v977_v54, %v848_v8  ;;  %v938_v4 = vpop.f32.mrb[25].mxu0  ;;  %v979_v3 = vpop.f32.mrb[25].mxu1 }
 0x187   :  { %v985_v2 = vadd.f32 %v938_v4, %v847_v47  ;;  %v987_v57 = vadd.f32 %v979_v3, %v849_v48  ;;  %v940_v1 = vpop.f32.mrb[26].mxu0  ;;  %v981_v0 = vpop.f32.mrb[26].mxu1 }
 0x188   :  { %v941_v58 = vpop.f32.mrb[27].mxu0  ;;  %v982_v59 = vpop.f32.mrb[27].mxu1 }
 0x18d   :  { %v1074_v60 = vpop.f32.mrb[28].mxu0  ;;  %v1115_v9 = vpop.f32.mrb[28].mxu1 }
 0x18e   :  { %v1122_v61 = vadd.f32 %v1074_v60, %v984_v55  ;;  %v1124_v62 = vadd.f32 %v1115_v9, %v986_v56  ;;  %v1076_v63 = vpop.f32.mrb[29].mxu0  ;;  %v1117_v5 = vpop.f32.mrb[29].mxu1 }
 0x18f   :  { %v1123_v6 = vadd.f32 %v1076_v63, %v985_v2  ;;  %v1125_v10 = vadd.f32 %v1117_v5, %v987_v57  ;;  %v1078_v14 = vpop.f32.mrb[30].mxu0  ;;  %v1119_v15 = vpop.f32.mrb[30].mxu1 }
 0x190   :  { %v1079_v13 = vpop.f32.mrb[31].mxu0  ;;  %v1120_v11 = vpop.f32.mrb[31].mxu1 }
 0x195   :  { %v1212_v18 = vpop.f32.mrb[32].mxu0  ;;  %v1253_v19 = vpop.f32.mrb[32].mxu1 }
 0x196   :  { %v1260_v20 = vadd.f32 %v1212_v18, %v1122_v61  ;;  %v1262_v21 = vadd.f32 %v1253_v19, %v1124_v62  ;;  %v1214_v22 = vpop.f32.mrb[33].mxu0  ;;  %v1255_v23 = vpop.f32.mrb[33].mxu1 }
 0x197   :  { %v1261_v24 = vadd.f32 %v1214_v22, %v1123_v6  ;;  %v1263_v25 = vadd.f32 %v1255_v23, %v1125_v10  ;;  %v1216_v27 = vpop.f32.mrb[34].mxu0  ;;  %v1257_v28 = vpop.f32.mrb[34].mxu1 }
 0x198   :  { %v1270_v29 = vadd.f32 %v1268_v17, %v1260_v20  ;;  %v1272_v30 = vadd.f32 %v1268_v17, %v1262_v21  ;;  %v1217_v31 = vpop.f32.mrb[35].mxu0  ;;  %v1258_v32 = vpop.f32.mrb[35].mxu1 }
 0x199   :  { %v1271_v33 = vadd.f32 %v1268_v17, %v1261_v24  ;;  %v1273_v34 = vadd.f32 %v1268_v17, %v1263_v25 }
 0x19a   :  { %v1274_v35 = vmul.f32 0.1, %v1270_v29  ;;  %v1276_v36 = vmul.f32 0.1, %v1272_v30 }
 0x19b   :  { %v1275_v38 = vmul.f32 0.1, %v1271_v33  ;;  %v1277_v39 = vmul.f32 0.1, %v1273_v34 }
 0x19d   :  { %v1282_v40 = vcombine.low %v1274_v35, %v1275_v38  ;;  %v1283_v41 = vcombine.low %v1276_v36, %v1277_v39 }
 0x19f   :  { %v1290_v42 = vrot.slane %v1282_v40, %v1289_v37  ;;  %v1297_v43 = vrot.slane %v1283_v41, %v1289_v37 }
 0x1a1   :  { %v1298_v44 = vcombine.low %v1290_v42, %v1297_v43 }
 0x1a3   :  { %1300 = vst [vmem:[%s1704_s4] sm:$0xff] %v1298_v44 }

</bundles_post_ra>
